<compile_context>
chip_gen: v7x
topology: tpu7x:2x2x1
jax: 0.10.0
libtpu: 0.0.40
codegen_flags: <defaults>
</compile_context>

<pallas_src>
import jax
import jax.numpy as jnp
from jax.experimental import pallas as pl
from jax.experimental.pallas import tpu as pltpu

# ------------------------- static model configuration -------------------------
BATCH = 4
TIME = 8
SAMPLE_LEN = 2
ATTR_LATENT = 8          # attribute_latent_dim
ATTR_UNITS = 32          # attribute_num_units
ATTR_LAYERS = 3          # attribute_num_layers -> 2 (Linear+ReLU+BatchNorm1d) blocks
FEAT_LATENT = 8          # feature_latent_dim
FEAT_UNITS = 32          # feature_num_units
FEAT_LAYERS = 2          # feature_num_layers (stacked LSTMCells)
EPS = 1e-5

# attribute outputs: one real discrete (dim 3), two additive continuous (dim 1 each)
REAL_ATTR_SPECS = [(3, 'discrete', None)]
ADDI_ATTR_SPECS = [(1, 'continuous', 'zero_one'), (1, 'continuous', 'minusone_one')]
REAL_ATTR_DIM = sum(d for d, _, _ in REAL_ATTR_SPECS)      # 3
ADDI_ATTR_DIM = sum(d for d, _, _ in ADDI_ATTR_SPECS)      # 2
ATTR_OUT_DIM = REAL_ATTR_DIM + ADDI_ATTR_DIM               # 5

# feature outputs: one continuous (dim 1, [0,1]) + gen_flag discrete (dim 2)
FEAT_SPECS = [(1, 'continuous', 'zero_one'), (2, 'discrete', None)]
FEATURE_DIM2 = sum(d for d, _, _ in FEAT_SPECS)            # 3 (== feature_dim2)
FEATURE_OUT_DIM = FEATURE_DIM2 * SAMPLE_LEN                # 6
N_HEADS = SAMPLE_LEN * len(FEAT_SPECS)                     # 4

NOISE = True
FEEDBACK = False
RNN_INPUT_DIM = ATTR_OUT_DIM + FEAT_LATENT                 # 13

SLAB_LANES = 128                                           # lane-dense output width
ATTR_COL = 16                                              # lane offset of attr block

# ---- packed LSTM weight slab row offsets (width = 4*FEAT_UNITS = 128) ----
L0_WIH_R0, L0_WIH_R1 = 0, RNN_INPUT_DIM                    # 0:13  w_ih0^T (attr 0:5, noise 5:13)
L0_WHH_R0, L0_WHH_R1 = 16, 48                              # w_hh0^T
L0_B_R = 48                                                # b_ih0 + b_hh0
L1_W_R0, L1_W_R1 = 56, 120                                 # [w_ih1^T ; w_hh1^T]
L1_B_R = 120                                               # b_ih1 + b_hh1
LSTM_SLAB_ROWS = 128

# ---- packed MLP / head weight slab row offsets (width = ATTR_UNITS = 32) ----
RW0_R0, RW0_R1 = 0, 8
RW1_R0, RW1_R1 = 8, 40
RHW_R0, RHW_R1 = 40, 72
AW0_R0, AW0_R1 = 72, 83
AW1_R0, AW1_R1 = 88, 120
AHW_R0, AHW_R1 = 120, 152
HW_R0, HW_R1 = 152, 184
MLP_SLAB_ROWS = 184

BIAS_SLAB_ROWS = 16
# bias slab row meaning: 0..2 real b0/g0/be0, 3..5 real b1/g1/be1, 6 real head b,
# 7..9 addi b0/g0/be0, 10..12 addi b1/g1/be1, 13 addi head b, 14 rnn head b, 15 pad.


# ------------------------- the fused generator kernel -------------------------
def generator_kernel(acts_ref, noise_ref, states_ref, lstm_w_ref, mlp_w_ref, bias_ref,
                     out_ref, pre_gates_ref, h1_all_ref):
    f32 = jnp.float32
    B = acts_ref.shape[0]
    U = FEAT_UNITS
    T = TIME
    TB = T * B

    def mlp_block(h, w, b, g, be):
        # Linear -> ReLU -> BatchNorm1d (train mode: biased batch statistics)
        h = jnp.dot(h, w, preferred_element_type=f32) + b
        h = jnp.maximum(h, 0.0)
        mean = jnp.mean(h, axis=0, keepdims=True)
        var = jnp.mean(jnp.square(h - mean), axis=0, keepdims=True)
        return g * (h - mean) * jax.lax.rsqrt(var + EPS) + be

    # ---------------- real attribute MLP ----------------
    attr_noise = acts_ref[:, 0:ATTR_LATENT]
    addi_noise = acts_ref[:, ATTR_LATENT:2 * ATTR_LATENT]

    h = mlp_block(attr_noise, mlp_w_ref[RW0_R0:RW0_R1, :],
                  bias_ref[0:1, :], bias_ref[1:2, :], bias_ref[2:3, :])
    h = mlp_block(h, mlp_w_ref[RW1_R0:RW1_R1, :],
                  bias_ref[3:4, :], bias_ref[4:5, :], bias_ref[5:6, :])
    zr = (jnp.dot(h, mlp_w_ref[RHW_R0:RHW_R1, 0:REAL_ATTR_DIM], preferred_element_type=f32)
          + bias_ref[6:7, 0:REAL_ATTR_DIM])                                     # (B, 3)
    zs = zr - jnp.max(zr, axis=1, keepdims=True)
    ez = jnp.exp(zs)
    real_attr = ez / jnp.sum(ez, axis=1, keepdims=True)
    # one-hot(argmax) via direct compares (first-max tie-break, softmax is monotone)
    z0, z1, z2 = zr[:, 0:1], zr[:, 1:2], zr[:, 2:3]
    is0 = jnp.logical_and(z0 >= z1, z0 >= z2)
    is1 = jnp.logical_and(jnp.logical_not(is0), z1 >= z2)
    is2 = jnp.logical_not(jnp.logical_or(is0, is1))
    real_disc = jnp.concatenate([is0.astype(f32), is1.astype(f32), is2.astype(f32)], axis=1)

    # ---------------- additive attribute MLP ----------------
    h = jnp.concatenate([addi_noise, real_disc], axis=1)                        # (B, 11)
    h = mlp_block(h, mlp_w_ref[AW0_R0:AW0_R1, :],
                  bias_ref[7:8, :], bias_ref[8:9, :], bias_ref[9:10, :])
    h = mlp_block(h, mlp_w_ref[AW1_R0:AW1_R1, :],
                  bias_ref[10:11, :], bias_ref[11:12, :], bias_ref[12:13, :])
    za = (jnp.dot(h, mlp_w_ref[AHW_R0:AHW_R1, 0:ADDI_ATTR_DIM], preferred_element_type=f32)
          + bias_ref[13:14, 0:ADDI_ATTR_DIM])                                   # (B, 2)
    addi_vals = jnp.concatenate([jax.nn.sigmoid(za[:, 0:1]), jnp.tanh(za[:, 1:2])], axis=1)

    all_attr = jnp.concatenate([real_attr, addi_vals], axis=1)                  # (B, 5)
    all_disc = jnp.concatenate([real_disc, addi_vals], axis=1)                  # (B, 5)

    # ------------- pre-compute layer-0 gate inputs for ALL steps, stage in VMEM -------------
    attr_rows = jnp.concatenate([all_disc] * T, axis=0)                         # (TB, 5)
    pre_gates = (jnp.dot(attr_rows, lstm_w_ref[L0_WIH_R0:ATTR_OUT_DIM, :],
                         preferred_element_type=f32)
                 + jnp.dot(noise_ref[...], lstm_w_ref[ATTR_OUT_DIM:L0_WIH_R1, :],
                           preferred_element_type=f32)
                 + lstm_w_ref[L0_B_R:L0_B_R + 1, :])                            # (TB, 4U)
    pre_gates_ref[...] = pre_gates

    l0_whh = lstm_w_ref[L0_WHH_R0:L0_WHH_R1, :]                                 # (32, 128)
    l1_w = lstm_w_ref[L1_W_R0:L1_W_R1, :]                                       # (64, 128)
    l1_b = lstm_w_ref[L1_B_R:L1_B_R + 1, :]                                     # (1, 128)

    lane = jax.lax.broadcasted_iota(jnp.int32, (B, 4 * U), 1)
    g_lane = jnp.logical_and(lane >= 2 * U, lane < 3 * U)                       # g-gate lanes

    def lstm_cell(gates, c_prev):
        # i/f/o weight columns & biases were pre-scaled by 0.5 host-side, so
        # sigmoid(x) = 0.5*tanh(x/2)+0.5 costs ONE tanh pass for all four gates.
        th = jnp.tanh(gates)
        act = jnp.where(g_lane, th, 0.5 * th + 0.5)
        i_g = act[:, 0 * U:1 * U]
        f_g = act[:, 1 * U:2 * U]
        g_g = act[:, 2 * U:3 * U]
        o_g = act[:, 3 * U:4 * U]
        c_new = f_g * c_prev + i_g * g_g
        return o_g * jnp.tanh(c_new), c_new

    h0 = states_ref[0]
    h1 = states_ref[1]
    c0 = states_ref[2]
    c1 = states_ref[3]

    # ---------------- serial recurrence: ONLY LSTM state math on the critical chain ----------------
    for t in range(T):
        gates0 = (pre_gates_ref[t * B:(t + 1) * B, :]
                  + jnp.dot(h0, l0_whh, preferred_element_type=f32))
        h0, c0 = lstm_cell(gates0, c0)
        gates1 = (jnp.dot(jnp.concatenate([h0, h1], axis=1), l1_w,
                          preferred_element_type=f32) + l1_b)
        h1, c1 = lstm_cell(gates1, c1)
        h1_all_ref[t * B:(t + 1) * B, :] = h1

    # ---------------- hoisted output heads (feedback=False => nothing feeds back) ----------------
    h1_all = h1_all_ref[...]                                                    # (TB, 32)
    z = (jnp.dot(h1_all, mlp_w_ref[HW_R0:HW_R1, 0:FEATURE_OUT_DIM],
                 preferred_element_type=f32)
         + bias_ref[14:15, 0:FEATURE_OUT_DIM])                                  # (TB, 6)
    out0 = jax.nn.sigmoid(z[:, 0:1])
    out1 = jax.nn.sigmoid(z[:, 3:4])
    d0a = jax.nn.sigmoid(z[:, 1:2] - z[:, 2:3])   # softmax([a,b]) == [sigm(a-b), 1-sigm(a-b)]
    d1a = jax.nn.sigmoid(z[:, 4:5] - z[:, 5:6])
    new_output = jnp.concatenate([out0, d0a, 1.0 - d0a, out1, d1a, 1.0 - d1a], axis=1)
    am0 = (z[:, 2:3] > z[:, 1:2]).astype(f32)     # argmax of 2-wide softmax == logit compare
    am1 = (z[:, 5:6] > z[:, 4:5]).astype(f32)

    # ---------------- gen_flag scan (tiny post-loop VPU work) ----------------
    # TODO(synk): the PyTorch loop exits early when all gen_flags hit 0; tail steps are
    # still computed here but every output is masked/gated so it matches fill_rest() exactly.
    gf = jnp.ones((B, 1), f32)
    gf0_parts, gf1_parts, am0_parts, am1_parts = [], [], [], []
    for t in range(T):
        a0 = am0[t * B:(t + 1) * B, :]
        a1 = am1[t * B:(t + 1) * B, :]
        active = (jnp.max(gf, axis=(0, 1), keepdims=True) >= 0.5).astype(f32)   # (1, 1)
        gf0_parts.append(gf)                      # gen_flag written for sub-sample 0
        gf1 = gf * (1.0 - a0)                     # gen_flag written for sub-sample 1
        gf1_parts.append(gf1)
        am0_parts.append(a0 * active)             # zeroed once the reference loop exits
        am1_parts.append(a1 * active)
        gf = gf1 * (1.0 - a1)                     # carried to the next step
    gf0_all = jnp.concatenate(gf0_parts, axis=0)                                # (TB, 1)
    gf1_all = jnp.concatenate(gf1_parts, axis=0)
    am0_g = jnp.concatenate(am0_parts, axis=0)
    am1_g = jnp.concatenate(am1_parts, axis=0)

    # ---------------- single lane-dense (TB, 128) unmasked store ----------------
    attr_block = jnp.concatenate(
        [all_attr, jnp.zeros((TB - B, ATTR_OUT_DIM), f32)], axis=0)             # rows 0:B valid
    out_ref[...] = jnp.concatenate(
        [new_output * gf0_all,                                 # lanes 0:6   feature (masked)
         gf0_all, gf1_all,                                     # lanes 6:8   gen_flag pair
         am0_g, am1_g,                                         # lanes 8:10  argmax (gated)
         jnp.zeros((TB, ATTR_COL - (FEATURE_OUT_DIM + 2 * SAMPLE_LEN)), f32),
         attr_block,                                           # lanes 16:21 attributes
         jnp.zeros((TB, SLAB_LANES - ATTR_COL - ATTR_OUT_DIM), f32)], axis=1)


# ------------------------- parameter packing (host side, once) -------------------------
def _pack_rows(blocks, total_rows, width):
    """blocks: list of (row_offset, array (r, c<=width)). Returns a (total_rows, width) slab."""
    out = jnp.zeros((total_rows, width), jnp.float32)
    for off, arr in blocks:
        arr = jnp.asarray(arr, jnp.float32)
        if arr.shape[1] < width:
            arr = jnp.pad(arr, ((0, 0), (0, width - arr.shape[1])))
        out = out.at[off:off + arr.shape[0], :].set(arr)
    return out


def prepare_params(params):
    """Transpose to (in,out), merge heads & LSTM biases, fold the 0.5 sigmoid-as-tanh scale
    into the i/f/o gate columns, and pack everything into 3 aligned slabs."""
    f32 = jnp.float32
    U = FEAT_UNITS
    # PyTorch gate column order: [i, f, g, o] -> scale i/f/o by 0.5, keep g.
    ifo_scale = jnp.concatenate(
        [jnp.full((1, 2 * U), 0.5, f32), jnp.ones((1, U), f32), jnp.full((1, U), 0.5, f32)],
        axis=1)

    (w_ih0, w_hh0, b_ih0, b_hh0) = params['lstm'][0]
    (w_ih1, w_hh1, b_ih1, b_hh1) = params['lstm'][1]
    lstm_w = _pack_rows(
        [(L0_WIH_R0, w_ih0.T * ifo_scale),
         (L0_WHH_R0, w_hh0.T * ifo_scale),
         (L0_B_R, (b_ih0 + b_hh0) * ifo_scale),
         (L1_W_R0, jnp.concatenate([w_ih1.T, w_hh1.T], axis=0) * ifo_scale),
         (L1_B_R, (b_ih1 + b_hh1) * ifo_scale)],
        LSTM_SLAB_ROWS, 4 * U)

    rh = params['attr_hidden_real']
    ah = params['attr_hidden_addi']
    real_head_w = jnp.concatenate([w.T for (w, _) in params['attr_head_real']], axis=1)  # (32,3)
    real_head_b = jnp.concatenate([b for (_, b) in params['attr_head_real']], axis=1)    # (1,3)
    addi_head_w = jnp.concatenate([w.T for (w, _) in params['attr_head_addi']], axis=1)  # (32,2)
    addi_head_b = jnp.concatenate([b for (_, b) in params['attr_head_addi']], axis=1)    # (1,2)
    rnn_head_w = jnp.concatenate([w.T for (w, _) in params['rnn_head']], axis=1)         # (32,6)
    rnn_head_b = jnp.concatenate([b for (_, b) in params['rnn_head']], axis=1)           # (1,6)

    mlp_w = _pack_rows(
        [(RW0_R0, rh[0][0].T), (RW1_R0, rh[1][0].T), (RHW_R0, real_head_w),
         (AW0_R0, ah[0][0].T), (AW1_R0, ah[1][0].T), (AHW_R0, addi_head_w),
         (HW_R0, rnn_head_w)],
        MLP_SLAB_ROWS, ATTR_UNITS)

    bias_rows = [rh[0][1], rh[0][2], rh[0][3], rh[1][1], rh[1][2], rh[1][3], real_head_b,
                 ah[0][1], ah[0][2], ah[0][3], ah[1][1], ah[1][2], ah[1][3], addi_head_b,
                 rnn_head_b]
    bias_w = _pack_rows(list(enumerate(bias_rows)), BIAS_SLAB_ROWS, ATTR_UNITS)

    return dict(lstm_w=lstm_w, mlp_w=mlp_w, bias_w=bias_w)


# ------------------------- full forward (single pallas_call + free slicing) -------------------------
def generator_forward(prep, attribute_input_noise, addi_attribute_input_noise,
                      feature_input_noise, feature_input_data, init_h, init_c):
    # feature_input_data is only the feedback seed; feedback=False here -> unused.
    del feature_input_data
    B, T, lat = feature_input_noise.shape
    f32 = jnp.float32

    # pack activations: 3 input DMAs instead of 5
    acts = jnp.concatenate([attribute_input_noise, addi_attribute_input_noise], axis=1)   # (B,16)
    noise_flat = jnp.transpose(feature_input_noise, (1, 0, 2)).reshape(T * B, lat)        # (TB,8)
    states = jnp.concatenate([init_h, init_c], axis=0)                                    # (4,B,32)

    vmem = pl.BlockSpec(memory_space=pltpu.MemorySpace.VMEM)
    slab = pl.pallas_call(
        generator_kernel,
        out_shape=jax.ShapeDtypeStruct((T * B, SLAB_LANES), f32),
        in_specs=[vmem] * 6,
        out_specs=vmem,
        scratch_shapes=[pltpu.VMEM((T * B, 4 * FEAT_UNITS), f32),   # per-step layer-0 gate inputs
                        pltpu.VMEM((T * B, FEAT_UNITS), f32)],      # staged h1 for all steps
    )(acts, noise_flat, states, prep['lstm_w'], prep['mlp_w'], prep['bias_w'])

    # free layout plumbing: slice the lane-dense slab and reorder to batch-major
    slab_t = slab.reshape(T, B, SLAB_LANES)
    feature = jnp.transpose(slab_t[:, :, 0:FEATURE_OUT_DIM], (1, 0, 2))
    feature = feature.reshape(B, T * SAMPLE_LEN, FEATURE_DIM2)
    gf = jnp.transpose(slab_t[:, :, FEATURE_OUT_DIM:FEATURE_OUT_DIM + SAMPLE_LEN], (1, 0, 2))
    all_gen_flag = gf.reshape(B, T * SAMPLE_LEN, 1)
    am = jnp.transpose(
        slab_t[:, :, FEATURE_OUT_DIM + SAMPLE_LEN:FEATURE_OUT_DIM + 2 * SAMPLE_LEN], (1, 0, 2))
    # TODO(synk): reference returns int64 argmax; int32 used here (JAX default, x64 disabled).
    all_cur_argmax = am.reshape(B, T * SAMPLE_LEN).astype(jnp.int32)
    length = jnp.sum(all_gen_flag, axis=(1, 2))
    all_attribute = slab[0:B, ATTR_COL:ATTR_COL + ATTR_OUT_DIM]
    return feature, all_attribute, all_gen_flag, length, all_cur_argmax


# ------------------------- deterministic parameter init (PyTorch layout) -------------------------
def init_params(key):
    keys = iter(jax.random.split(key, 64))

    def dense(shape, scale):
        return jax.random.normal(next(keys), shape, jnp.float32) * scale

    def mlp_hidden(in_dim):
        layers = []
        d = in_dim
        for _ in range(ATTR_LAYERS - 1):
            layers.append((dense((ATTR_UNITS, d), d ** -0.5),
                           dense((1, ATTR_UNITS), 0.01),
                           jnp.ones((1, ATTR_UNITS), jnp.float32),
                           jnp.zeros((1, ATTR_UNITS), jnp.float32)))
            d = ATTR_UNITS
        return layers

    params = {
        'attr_hidden_real': mlp_hidden(ATTR_LATENT),
        'attr_hidden_addi': mlp_hidden(ATTR_LATENT + REAL_ATTR_DIM),
        'attr_head_real': [(dense((d, ATTR_UNITS), 0.2), dense((1, d), 0.01))
                           for d, _, _ in REAL_ATTR_SPECS],
        'attr_head_addi': [(dense((d, ATTR_UNITS), 0.2), dense((1, d), 0.01))
                           for d, _, _ in ADDI_ATTR_SPECS],
    }
    lstm = []
    d = RNN_INPUT_DIM
    for _ in range(FEAT_LAYERS):
        lstm.append((dense((4 * FEAT_UNITS, d), FEAT_UNITS ** -0.5),
                     dense((4 * FEAT_UNITS, FEAT_UNITS), FEAT_UNITS ** -0.5),
                     dense((1, 4 * FEAT_UNITS), 0.01),
                     dense((1, 4 * FEAT_UNITS), 0.01)))
        d = FEAT_UNITS
    params['lstm'] = lstm
    heads = []
    for m in range(N_HEADS):
        dim = FEAT_SPECS[m % len(FEAT_SPECS)][0]
        heads.append((dense((dim, FEAT_UNITS), 0.2), dense((1, dim), 0.01)))
    params['rnn_head'] = heads
    return params


if __name__ == "__main__":
    key = jax.random.PRNGKey(0)
    k_param, k1, k2, k3, kh, kc = jax.random.split(key, 6)
    params = init_params(k_param)
    prep = prepare_params(params)   # transpose / merge / scale / pack once, outside jit

    attribute_input_noise = jax.random.normal(k1, (BATCH, ATTR_LATENT), jnp.float32)
    addi_attribute_input_noise = jax.random.normal(k2, (BATCH, ATTR_LATENT), jnp.float32)
    feature_input_noise = jax.random.normal(k3, (BATCH, TIME, FEAT_LATENT), jnp.float32)
    feature_input_data = jnp.zeros((BATCH, SAMPLE_LEN * FEATURE_DIM2), jnp.float32)
    # RNNInitialStateType.RANDOM: random initial LSTM states (per forward call)
    init_h = jax.random.normal(kh, (FEAT_LAYERS, BATCH, FEAT_UNITS), jnp.float32)
    init_c = jax.random.normal(kc, (FEAT_LAYERS, BATCH, FEAT_UNITS), jnp.float32)

    fwd = jax.jit(generator_forward)
    outs = fwd(prep, attribute_input_noise, addi_attribute_input_noise,
               feature_input_noise, feature_input_data, init_h, init_c)
    outs = jax.block_until_ready(outs)
    feature, all_attribute, all_gen_flag, length, all_cur_argmax = outs

    assert feature.shape == (BATCH, TIME * SAMPLE_LEN, FEATURE_DIM2)
    assert all_attribute.shape == (BATCH, ATTR_OUT_DIM)
    assert all_gen_flag.shape == (BATCH, TIME * SAMPLE_LEN, 1)
    assert length.shape == (BATCH,)
    assert all_cur_argmax.shape == (BATCH, TIME * SAMPLE_LEN)
    print("KERNEL_OK")
</pallas_src>

<mosaic_0001>
module attributes {stable_mosaic.version = 11 : i64} {
  func.func @generator_kernel(%arg0: memref<4x16xf32, #tpu.memory_space<vmem>>, %arg1: memref<32x8xf32, #tpu.memory_space<vmem>>, %arg2: memref<4x4x32xf32, #tpu.memory_space<vmem>>, %arg3: memref<128x128xf32, #tpu.memory_space<vmem>>, %arg4: memref<184x32xf32, #tpu.memory_space<vmem>>, %arg5: memref<16x32xf32, #tpu.memory_space<vmem>>, %arg6: memref<32x128xf32, #tpu.memory_space<vmem>>, %arg7: memref<32x128xf32, #tpu.memory_space<vmem>>, %arg8: memref<32x32xf32, #tpu.memory_space<vmem>>) attributes {dimension_semantics = [], scalar_prefetch = 0 : i64, scratch_operands = 2 : i64, tpu.core_type = #tpu.core_type<tc>} {
    %c0 = arith.constant 0 : index
    %c0_0 = arith.constant 0 : index
    %0 = vector.load %arg0[%c0, %c0_0] : memref<4x16xf32, #tpu.memory_space<vmem>>, vector<4x8xf32>
    %c0_1 = arith.constant 0 : index
    %c8 = arith.constant 8 : index
    %1 = vector.load %arg0[%c0_1, %c8] : memref<4x16xf32, #tpu.memory_space<vmem>>, vector<4x8xf32>
    %c0_2 = arith.constant 0 : index
    %c0_3 = arith.constant 0 : index
    %2 = vector.load %arg4[%c0_2, %c0_3] : memref<184x32xf32, #tpu.memory_space<vmem>>, vector<8x32xf32>
    %c0_4 = arith.constant 0 : index
    %c0_5 = arith.constant 0 : index
    %3 = vector.load %arg5[%c0_4, %c0_5] : memref<16x32xf32, #tpu.memory_space<vmem>>, vector<1x32xf32>
    %c1 = arith.constant 1 : index
    %c0_6 = arith.constant 0 : index
    %4 = vector.load %arg5[%c1, %c0_6] : memref<16x32xf32, #tpu.memory_space<vmem>>, vector<1x32xf32>
    %c2 = arith.constant 2 : index
    %c0_7 = arith.constant 0 : index
    %5 = vector.load %arg5[%c2, %c0_7] : memref<16x32xf32, #tpu.memory_space<vmem>>, vector<1x32xf32>
    %cst = arith.constant dense<0.000000e+00> : vector<4x32xf32>
    %6 = tpu.matmul %0, %2, %cst {dimension_numbers = #tpu.dot_dimension_numbers<[1], [0], [0], [1], [0, 0, 1, 1], [], []>} : vector<4x8xf32>, vector<8x32xf32>, vector<4x32xf32> -> vector<4x32xf32>
    %7 = vector.broadcast %3 : vector<1x32xf32> to vector<4x32xf32>
    %8 = arith.addf %6, %7 : vector<4x32xf32>
    %cst_8 = arith.constant 0.000000e+00 : f32
    %9 = vector.broadcast %cst_8 : f32 to vector<4x32xf32>
    %10 = arith.maximumf %8, %9 : vector<4x32xf32>
    %cst_9 = arith.constant dense<0.000000e+00> : vector<32xf32>
    %11 = vector.multi_reduction <add>, %10, %cst_9 [0] : vector<4x32xf32> to vector<32xf32>
    %12 = vector.shape_cast %11 : vector<32xf32> to vector<1x32xf32>
    %cst_10 = arith.constant 4.000000e+00 : f32
    %13 = vector.broadcast %cst_10 : f32 to vector<1x32xf32>
    %14 = arith.divf %12, %13 : vector<1x32xf32>
    %15 = vector.broadcast %14 : vector<1x32xf32> to vector<4x32xf32>
    %16 = arith.subf %10, %15 : vector<4x32xf32>
    %17 = arith.mulf %16, %16 : vector<4x32xf32>
    %cst_11 = arith.constant dense<0.000000e+00> : vector<32xf32>
    %18 = vector.multi_reduction <add>, %17, %cst_11 [0] : vector<4x32xf32> to vector<32xf32>
    %19 = vector.shape_cast %18 : vector<32xf32> to vector<1x32xf32>
    %cst_12 = arith.constant 4.000000e+00 : f32
    %20 = vector.broadcast %cst_12 : f32 to vector<1x32xf32>
    %21 = arith.divf %19, %20 : vector<1x32xf32>
    %22 = vector.broadcast %14 : vector<1x32xf32> to vector<4x32xf32>
    %23 = arith.subf %10, %22 : vector<4x32xf32>
    %24 = vector.broadcast %4 : vector<1x32xf32> to vector<4x32xf32>
    %25 = arith.mulf %24, %23 : vector<4x32xf32>
    %cst_13 = arith.constant 9.99999974E-6 : f32
    %26 = vector.broadcast %cst_13 : f32 to vector<1x32xf32>
    %27 = arith.addf %21, %26 : vector<1x32xf32>
    %28 = math.rsqrt %27 : vector<1x32xf32>
    %29 = vector.broadcast %28 : vector<1x32xf32> to vector<4x32xf32>
    %30 = arith.mulf %25, %29 : vector<4x32xf32>
    %31 = vector.broadcast %5 : vector<1x32xf32> to vector<4x32xf32>
    %32 = arith.addf %30, %31 : vector<4x32xf32>
    %c8_14 = arith.constant 8 : index
    %c0_15 = arith.constant 0 : index
    %33 = vector.load %arg4[%c8_14, %c0_15] : memref<184x32xf32, #tpu.memory_space<vmem>>, vector<32x32xf32>
    %c3 = arith.constant 3 : index
    %c0_16 = arith.constant 0 : index
    %34 = vector.load %arg5[%c3, %c0_16] : memref<16x32xf32, #tpu.memory_space<vmem>>, vector<1x32xf32>
    %c4 = arith.constant 4 : index
    %c0_17 = arith.constant 0 : index
    %35 = vector.load %arg5[%c4, %c0_17] : memref<16x32xf32, #tpu.memory_space<vmem>>, vector<1x32xf32>
    %c5 = arith.constant 5 : index
    %c0_18 = arith.constant 0 : index
    %36 = vector.load %arg5[%c5, %c0_18] : memref<16x32xf32, #tpu.memory_space<vmem>>, vector<1x32xf32>
    %cst_19 = arith.constant dense<0.000000e+00> : vector<4x32xf32>
    %37 = tpu.matmul %32, %33, %cst_19 {dimension_numbers = #tpu.dot_dimension_numbers<[1], [0], [0], [1], [0, 0, 1, 1], [], []>} : vector<4x32xf32>, vector<32x32xf32>, vector<4x32xf32> -> vector<4x32xf32>
    %38 = vector.broadcast %34 : vector<1x32xf32> to vector<4x32xf32>
    %39 = arith.addf %37, %38 : vector<4x32xf32>
    %cst_20 = arith.constant 0.000000e+00 : f32
    %40 = vector.broadcast %cst_20 : f32 to vector<4x32xf32>
    %41 = arith.maximumf %39, %40 : vector<4x32xf32>
    %cst_21 = arith.constant dense<0.000000e+00> : vector<32xf32>
    %42 = vector.multi_reduction <add>, %41, %cst_21 [0] : vector<4x32xf32> to vector<32xf32>
    %43 = vector.shape_cast %42 : vector<32xf32> to vector<1x32xf32>
    %cst_22 = arith.constant 4.000000e+00 : f32
    %44 = vector.broadcast %cst_22 : f32 to vector<1x32xf32>
    %45 = arith.divf %43, %44 : vector<1x32xf32>
    %46 = vector.broadcast %45 : vector<1x32xf32> to vector<4x32xf32>
    %47 = arith.subf %41, %46 : vector<4x32xf32>
    %48 = arith.mulf %47, %47 : vector<4x32xf32>
    %cst_23 = arith.constant dense<0.000000e+00> : vector<32xf32>
    %49 = vector.multi_reduction <add>, %48, %cst_23 [0] : vector<4x32xf32> to vector<32xf32>
    %50 = vector.shape_cast %49 : vector<32xf32> to vector<1x32xf32>
    %cst_24 = arith.constant 4.000000e+00 : f32
    %51 = vector.broadcast %cst_24 : f32 to vector<1x32xf32>
    %52 = arith.divf %50, %51 : vector<1x32xf32>
    %53 = vector.broadcast %45 : vector<1x32xf32> to vector<4x32xf32>
    %54 = arith.subf %41, %53 : vector<4x32xf32>
    %55 = vector.broadcast %35 : vector<1x32xf32> to vector<4x32xf32>
    %56 = arith.mulf %55, %54 : vector<4x32xf32>
    %cst_25 = arith.constant 9.99999974E-6 : f32
    %57 = vector.broadcast %cst_25 : f32 to vector<1x32xf32>
    %58 = arith.addf %52, %57 : vector<1x32xf32>
    %59 = math.rsqrt %58 : vector<1x32xf32>
    %60 = vector.broadcast %59 : vector<1x32xf32> to vector<4x32xf32>
    %61 = arith.mulf %56, %60 : vector<4x32xf32>
    %62 = vector.broadcast %36 : vector<1x32xf32> to vector<4x32xf32>
    %63 = arith.addf %61, %62 : vector<4x32xf32>
    %c40 = arith.constant 40 : index
    %c0_26 = arith.constant 0 : index
    %64 = vector.load %arg4[%c40, %c0_26] : memref<184x32xf32, #tpu.memory_space<vmem>>, vector<32x3xf32>
    %cst_27 = arith.constant dense<0.000000e+00> : vector<4x3xf32>
    %65 = tpu.matmul %63, %64, %cst_27 {dimension_numbers = #tpu.dot_dimension_numbers<[1], [0], [0], [1], [0, 0, 1, 1], [], []>} : vector<4x32xf32>, vector<32x3xf32>, vector<4x3xf32> -> vector<4x3xf32>
    %c6 = arith.constant 6 : index
    %c0_28 = arith.constant 0 : index
    %66 = vector.load %arg5[%c6, %c0_28] : memref<16x32xf32, #tpu.memory_space<vmem>>, vector<1x3xf32>
    %67 = vector.broadcast %66 : vector<1x3xf32> to vector<4x3xf32>
    %68 = arith.addf %65, %67 : vector<4x3xf32>
    %cst_29 = arith.constant dense<0xFF800000> : vector<4xf32>
    %69 = vector.multi_reduction <maximumf>, %68, %cst_29 [1] : vector<4x3xf32> to vector<4xf32>
    %70 = vector.shape_cast %69 : vector<4xf32> to vector<4x1xf32>
    %71 = vector.broadcast %70 : vector<4x1xf32> to vector<4x3xf32>
    %72 = arith.subf %68, %71 : vector<4x3xf32>
    %73 = math.exp %72 : vector<4x3xf32>
    %cst_30 = arith.constant dense<0.000000e+00> : vector<4xf32>
    %74 = vector.multi_reduction <add>, %73, %cst_30 [1] : vector<4x3xf32> to vector<4xf32>
    %75 = vector.shape_cast %74 : vector<4xf32> to vector<4x1xf32>
    %76 = vector.broadcast %75 : vector<4x1xf32> to vector<4x3xf32>
    %77 = arith.divf %73, %76 : vector<4x3xf32>
    %78 = vector.extract_strided_slice %68 {offsets = [0, 0], sizes = [4, 1], strides = [1, 1]} : vector<4x3xf32> to vector<4x1xf32>
    %79 = vector.extract_strided_slice %68 {offsets = [0, 1], sizes = [4, 1], strides = [1, 1]} : vector<4x3xf32> to vector<4x1xf32>
    %80 = vector.extract_strided_slice %68 {offsets = [0, 2], sizes = [4, 1], strides = [1, 1]} : vector<4x3xf32> to vector<4x1xf32>
    %81 = arith.cmpf oge, %78, %79 : vector<4x1xf32>
    %82 = arith.cmpf oge, %78, %80 : vector<4x1xf32>
    %83 = arith.andi %81, %82 : vector<4x1xi1>
    %cst_31 = arith.constant dense<true> : vector<4x1xi1>
    %84 = arith.xori %83, %cst_31 : vector<4x1xi1>
    %85 = arith.cmpf oge, %79, %80 : vector<4x1xf32>
    %86 = arith.andi %84, %85 : vector<4x1xi1>
    %87 = arith.ori %83, %86 : vector<4x1xi1>
    %cst_32 = arith.constant dense<true> : vector<4x1xi1>
    %88 = arith.xori %87, %cst_32 : vector<4x1xi1>
    %89 = arith.extui %83 : vector<4x1xi1> to vector<4x1xi32>
    %90 = arith.sitofp %89 : vector<4x1xi32> to vector<4x1xf32>
    %91 = arith.extui %86 : vector<4x1xi1> to vector<4x1xi32>
    %92 = arith.sitofp %91 : vector<4x1xi32> to vector<4x1xf32>
    %93 = arith.extui %88 : vector<4x1xi1> to vector<4x1xi32>
    %94 = arith.sitofp %93 : vector<4x1xi32> to vector<4x1xf32>
    %95 = tpu.concatenate %90, %92, %94 in 1 : vector<4x1xf32>, vector<4x1xf32>, vector<4x1xf32> -> vector<4x3xf32>
    %96 = tpu.concatenate %1, %95 in 1 : vector<4x8xf32>, vector<4x3xf32> -> vector<4x11xf32>
    %c72 = arith.constant 72 : index
    %c0_33 = arith.constant 0 : index
    %97 = vector.load %arg4[%c72, %c0_33] : memref<184x32xf32, #tpu.memory_space<vmem>>, vector<11x32xf32>
    %c7 = arith.constant 7 : index
    %c0_34 = arith.constant 0 : index
    %98 = vector.load %arg5[%c7, %c0_34] : memref<16x32xf32, #tpu.memory_space<vmem>>, vector<1x32xf32>
    %c8_35 = arith.constant 8 : index
    %c0_36 = arith.constant 0 : index
    %99 = vector.load %arg5[%c8_35, %c0_36] : memref<16x32xf32, #tpu.memory_space<vmem>>, vector<1x32xf32>
    %c9 = arith.constant 9 : index
    %c0_37 = arith.constant 0 : index
    %100 = vector.load %arg5[%c9, %c0_37] : memref<16x32xf32, #tpu.memory_space<vmem>>, vector<1x32xf32>
    %cst_38 = arith.constant dense<0.000000e+00> : vector<4x32xf32>
    %101 = tpu.matmul %96, %97, %cst_38 {dimension_numbers = #tpu.dot_dimension_numbers<[1], [0], [0], [1], [0, 0, 1, 1], [], []>} : vector<4x11xf32>, vector<11x32xf32>, vector<4x32xf32> -> vector<4x32xf32>
    %102 = vector.broadcast %98 : vector<1x32xf32> to vector<4x32xf32>
    %103 = arith.addf %101, %102 : vector<4x32xf32>
    %cst_39 = arith.constant 0.000000e+00 : f32
    %104 = vector.broadcast %cst_39 : f32 to vector<4x32xf32>
    %105 = arith.maximumf %103, %104 : vector<4x32xf32>
    %cst_40 = arith.constant dense<0.000000e+00> : vector<32xf32>
    %106 = vector.multi_reduction <add>, %105, %cst_40 [0] : vector<4x32xf32> to vector<32xf32>
    %107 = vector.shape_cast %106 : vector<32xf32> to vector<1x32xf32>
    %cst_41 = arith.constant 4.000000e+00 : f32
    %108 = vector.broadcast %cst_41 : f32 to vector<1x32xf32>
    %109 = arith.divf %107, %108 : vector<1x32xf32>
    %110 = vector.broadcast %109 : vector<1x32xf32> to vector<4x32xf32>
    %111 = arith.subf %105, %110 : vector<4x32xf32>
    %112 = arith.mulf %111, %111 : vector<4x32xf32>
    %cst_42 = arith.constant dense<0.000000e+00> : vector<32xf32>
    %113 = vector.multi_reduction <add>, %112, %cst_42 [0] : vector<4x32xf32> to vector<32xf32>
    %114 = vector.shape_cast %113 : vector<32xf32> to vector<1x32xf32>
    %cst_43 = arith.constant 4.000000e+00 : f32
    %115 = vector.broadcast %cst_43 : f32 to vector<1x32xf32>
    %116 = arith.divf %114, %115 : vector<1x32xf32>
    %117 = vector.broadcast %109 : vector<1x32xf32> to vector<4x32xf32>
    %118 = arith.subf %105, %117 : vector<4x32xf32>
    %119 = vector.broadcast %99 : vector<1x32xf32> to vector<4x32xf32>
    %120 = arith.mulf %119, %118 : vector<4x32xf32>
    %cst_44 = arith.constant 9.99999974E-6 : f32
    %121 = vector.broadcast %cst_44 : f32 to vector<1x32xf32>
    %122 = arith.addf %116, %121 : vector<1x32xf32>
    %123 = math.rsqrt %122 : vector<1x32xf32>
    %124 = vector.broadcast %123 : vector<1x32xf32> to vector<4x32xf32>
    %125 = arith.mulf %120, %124 : vector<4x32xf32>
    %126 = vector.broadcast %100 : vector<1x32xf32> to vector<4x32xf32>
    %127 = arith.addf %125, %126 : vector<4x32xf32>
    %c88 = arith.constant 88 : index
    %c0_45 = arith.constant 0 : index
    %128 = vector.load %arg4[%c88, %c0_45] : memref<184x32xf32, #tpu.memory_space<vmem>>, vector<32x32xf32>
    %c10 = arith.constant 10 : index
    %c0_46 = arith.constant 0 : index
    %129 = vector.load %arg5[%c10, %c0_46] : memref<16x32xf32, #tpu.memory_space<vmem>>, vector<1x32xf32>
    %c11 = arith.constant 11 : index
    %c0_47 = arith.constant 0 : index
    %130 = vector.load %arg5[%c11, %c0_47] : memref<16x32xf32, #tpu.memory_space<vmem>>, vector<1x32xf32>
    %c12 = arith.constant 12 : index
    %c0_48 = arith.constant 0 : index
    %131 = vector.load %arg5[%c12, %c0_48] : memref<16x32xf32, #tpu.memory_space<vmem>>, vector<1x32xf32>
    %cst_49 = arith.constant dense<0.000000e+00> : vector<4x32xf32>
    %132 = tpu.matmul %127, %128, %cst_49 {dimension_numbers = #tpu.dot_dimension_numbers<[1], [0], [0], [1], [0, 0, 1, 1], [], []>} : vector<4x32xf32>, vector<32x32xf32>, vector<4x32xf32> -> vector<4x32xf32>
    %133 = vector.broadcast %129 : vector<1x32xf32> to vector<4x32xf32>
    %134 = arith.addf %132, %133 : vector<4x32xf32>
    %cst_50 = arith.constant 0.000000e+00 : f32
    %135 = vector.broadcast %cst_50 : f32 to vector<4x32xf32>
    %136 = arith.maximumf %134, %135 : vector<4x32xf32>
    %cst_51 = arith.constant dense<0.000000e+00> : vector<32xf32>
    %137 = vector.multi_reduction <add>, %136, %cst_51 [0] : vector<4x32xf32> to vector<32xf32>
    %138 = vector.shape_cast %137 : vector<32xf32> to vector<1x32xf32>
    %cst_52 = arith.constant 4.000000e+00 : f32
    %139 = vector.broadcast %cst_52 : f32 to vector<1x32xf32>
    %140 = arith.divf %138, %139 : vector<1x32xf32>
    %141 = vector.broadcast %140 : vector<1x32xf32> to vector<4x32xf32>
    %142 = arith.subf %136, %141 : vector<4x32xf32>
    %143 = arith.mulf %142, %142 : vector<4x32xf32>
    %cst_53 = arith.constant dense<0.000000e+00> : vector<32xf32>
    %144 = vector.multi_reduction <add>, %143, %cst_53 [0] : vector<4x32xf32> to vector<32xf32>
    %145 = vector.shape_cast %144 : vector<32xf32> to vector<1x32xf32>
    %cst_54 = arith.constant 4.000000e+00 : f32
    %146 = vector.broadcast %cst_54 : f32 to vector<1x32xf32>
    %147 = arith.divf %145, %146 : vector<1x32xf32>
    %148 = vector.broadcast %140 : vector<1x32xf32> to vector<4x32xf32>
    %149 = arith.subf %136, %148 : vector<4x32xf32>
    %150 = vector.broadcast %130 : vector<1x32xf32> to vector<4x32xf32>
    %151 = arith.mulf %150, %149 : vector<4x32xf32>
    %cst_55 = arith.constant 9.99999974E-6 : f32
    %152 = vector.broadcast %cst_55 : f32 to vector<1x32xf32>
    %153 = arith.addf %147, %152 : vector<1x32xf32>
    %154 = math.rsqrt %153 : vector<1x32xf32>
    %155 = vector.broadcast %154 : vector<1x32xf32> to vector<4x32xf32>
    %156 = arith.mulf %151, %155 : vector<4x32xf32>
    %157 = vector.broadcast %131 : vector<1x32xf32> to vector<4x32xf32>
    %158 = arith.addf %156, %157 : vector<4x32xf32>
    %c120 = arith.constant 120 : index
    %c0_56 = arith.constant 0 : index
    %159 = vector.load %arg4[%c120, %c0_56] : memref<184x32xf32, #tpu.memory_space<vmem>>, vector<32x2xf32>
    %cst_57 = arith.constant dense<0.000000e+00> : vector<4x2xf32>
    %160 = tpu.matmul %158, %159, %cst_57 {dimension_numbers = #tpu.dot_dimension_numbers<[1], [0], [0], [1], [0, 0, 1, 1], [], []>} : vector<4x32xf32>, vector<32x2xf32>, vector<4x2xf32> -> vector<4x2xf32>
    %c13 = arith.constant 13 : index
    %c0_58 = arith.constant 0 : index
    %161 = vector.load %arg5[%c13, %c0_58] : memref<16x32xf32, #tpu.memory_space<vmem>>, vector<1x2xf32>
    %162 = vector.broadcast %161 : vector<1x2xf32> to vector<4x2xf32>
    %163 = arith.addf %160, %162 : vector<4x2xf32>
    %164 = vector.extract_strided_slice %163 {offsets = [0, 0], sizes = [4, 1], strides = [1, 1]} : vector<4x2xf32> to vector<4x1xf32>
    %165 = arith.negf %164 : vector<4x1xf32>
    %166 = math.exp %165 : vector<4x1xf32>
    %cst_59 = arith.constant 1.000000e+00 : f32
    %167 = vector.broadcast %cst_59 : f32 to vector<4x1xf32>
    %168 = arith.addf %167, %166 : vector<4x1xf32>
    %169 = arith.divf %167, %168 : vector<4x1xf32>
    %170 = vector.extract_strided_slice %163 {offsets = [0, 1], sizes = [4, 1], strides = [1, 1]} : vector<4x2xf32> to vector<4x1xf32>
    %171 = math.tanh %170 : vector<4x1xf32>
    %172 = tpu.concatenate %169, %171 in 1 : vector<4x1xf32>, vector<4x1xf32> -> vector<4x2xf32>
    %173 = tpu.concatenate %77, %172 in 1 : vector<4x3xf32>, vector<4x2xf32> -> vector<4x5xf32>
    %174 = tpu.concatenate %95, %172 in 1 : vector<4x3xf32>, vector<4x2xf32> -> vector<4x5xf32>
    %175 = tpu.concatenate %174, %174, %174, %174, %174, %174, %174, %174 in 0 : vector<4x5xf32>, vector<4x5xf32>, vector<4x5xf32>, vector<4x5xf32>, vector<4x5xf32>, vector<4x5xf32>, vector<4x5xf32>, vector<4x5xf32> -> vector<32x5xf32>
    %c0_60 = arith.constant 0 : index
    %c0_61 = arith.constant 0 : index
    %176 = vector.load %arg3[%c0_60, %c0_61] : memref<128x128xf32, #tpu.memory_space<vmem>>, vector<5x128xf32>
    %cst_62 = arith.constant dense<0.000000e+00> : vector<32x128xf32>
    %177 = tpu.matmul %175, %176, %cst_62 {dimension_numbers = #tpu.dot_dimension_numbers<[1], [0], [0], [1], [0, 0, 1, 1], [], []>} : vector<32x5xf32>, vector<5x128xf32>, vector<32x128xf32> -> vector<32x128xf32>
    %c0_63 = arith.constant 0 : index
    %c0_64 = arith.constant 0 : index
    %178 = vector.load %arg1[%c0_63, %c0_64] : memref<32x8xf32, #tpu.memory_space<vmem>>, vector<32x8xf32>
    %c5_65 = arith.constant 5 : index
    %c0_66 = arith.constant 0 : index
    %179 = vector.load %arg3[%c5_65, %c0_66] : memref<128x128xf32, #tpu.memory_space<vmem>>, vector<8x128xf32>
    %cst_67 = arith.constant dense<0.000000e+00> : vector<32x128xf32>
    %180 = tpu.matmul %178, %179, %cst_67 {dimension_numbers = #tpu.dot_dimension_numbers<[1], [0], [0], [1], [0, 0, 1, 1], [], []>} : vector<32x8xf32>, vector<8x128xf32>, vector<32x128xf32> -> vector<32x128xf32>
    %181 = arith.addf %177, %180 : vector<32x128xf32>
    %c48 = arith.constant 48 : index
    %c0_68 = arith.constant 0 : index
    %182 = vector.load %arg3[%c48, %c0_68] : memref<128x128xf32, #tpu.memory_space<vmem>>, vector<1x128xf32>
    %183 = vector.broadcast %182 : vector<1x128xf32> to vector<32x128xf32>
    %184 = arith.addf %181, %183 : vector<32x128xf32>
    %c0_69 = arith.constant 0 : index
    %c0_70 = arith.constant 0 : index
    %185 = vector.load %arg7[%c0_69, %c0_70] : memref<32x128xf32, #tpu.memory_space<vmem>>, vector<32x128xf32>
    tpu.vector_store %arg7[%c0_69, %c0_70], %184 {strides = array<i32>} : memref<32x128xf32, #tpu.memory_space<vmem>>, vector<32x128xf32>,
    %c16 = arith.constant 16 : index
    %c0_71 = arith.constant 0 : index
    %186 = vector.load %arg3[%c16, %c0_71] : memref<128x128xf32, #tpu.memory_space<vmem>>, vector<32x128xf32>
    %c56 = arith.constant 56 : index
    %c0_72 = arith.constant 0 : index
    %187 = vector.load %arg3[%c56, %c0_72] : memref<128x128xf32, #tpu.memory_space<vmem>>, vector<64x128xf32>
    %c120_73 = arith.constant 120 : index
    %c0_74 = arith.constant 0 : index
    %188 = vector.load %arg3[%c120_73, %c0_74] : memref<128x128xf32, #tpu.memory_space<vmem>>, vector<1x128xf32>
    %189 = tpu.iota {dimensions = array<i32: 1>} : vector<4x128xi32>
    %c64_i32 = arith.constant 64 : i32
    %190 = vector.broadcast %c64_i32 : i32 to vector<4x128xi32>
    %191 = arith.cmpi sge, %189, %190 : vector<4x128xi32>
    %c96_i32 = arith.constant 96 : i32
    %192 = vector.broadcast %c96_i32 : i32 to vector<4x128xi32>
    %193 = arith.cmpi slt, %189, %192 : vector<4x128xi32>
    %194 = arith.andi %191, %193 : vector<4x128xi1>
    %c0_75 = arith.constant 0 : index
    %c0_76 = arith.constant 0 : index
    %c0_77 = arith.constant 0 : index
    %195 = vector.load %arg2[%c0_75, %c0_76, %c0_77] : memref<4x4x32xf32, #tpu.memory_space<vmem>>, vector<1x4x32xf32>
    %196 = vector.shape_cast %195 : vector<1x4x32xf32> to vector<4x32xf32>
    %c1_78 = arith.constant 1 : index
    %c0_79 = arith.constant 0 : index
    %c0_80 = arith.constant 0 : index
    %197 = vector.load %arg2[%c1_78, %c0_79, %c0_80] : memref<4x4x32xf32, #tpu.memory_space<vmem>>, vector<1x4x32xf32>
    %198 = vector.shape_cast %197 : vector<1x4x32xf32> to vector<4x32xf32>
    %c2_81 = arith.constant 2 : index
    %c0_82 = arith.constant 0 : index
    %c0_83 = arith.constant 0 : index
    %199 = vector.load %arg2[%c2_81, %c0_82, %c0_83] : memref<4x4x32xf32, #tpu.memory_space<vmem>>, vector<1x4x32xf32>
    %200 = vector.shape_cast %199 : vector<1x4x32xf32> to vector<4x32xf32>
    %c3_84 = arith.constant 3 : index
    %c0_85 = arith.constant 0 : index
    %c0_86 = arith.constant 0 : index
    %201 = vector.load %arg2[%c3_84, %c0_85, %c0_86] : memref<4x4x32xf32, #tpu.memory_space<vmem>>, vector<1x4x32xf32>
    %202 = vector.shape_cast %201 : vector<1x4x32xf32> to vector<4x32xf32>
    %c0_87 = arith.constant 0 : index
    %c0_88 = arith.constant 0 : index
    %203 = vector.load %arg7[%c0_87, %c0_88] : memref<32x128xf32, #tpu.memory_space<vmem>>, vector<4x128xf32>
    %cst_89 = arith.constant dense<0.000000e+00> : vector<4x128xf32>
    %204 = tpu.matmul %196, %186, %cst_89 {dimension_numbers = #tpu.dot_dimension_numbers<[1], [0], [0], [1], [0, 0, 1, 1], [], []>} : vector<4x32xf32>, vector<32x128xf32>, vector<4x128xf32> -> vector<4x128xf32>
    %205 = arith.addf %203, %204 : vector<4x128xf32>
    %206 = math.tanh %205 : vector<4x128xf32>
    %cst_90 = arith.constant 5.000000e-01 : f32
    %207 = vector.broadcast %cst_90 : f32 to vector<4x128xf32>
    %208 = arith.mulf %207, %206 : vector<4x128xf32>
    %cst_91 = arith.constant 5.000000e-01 : f32
    %209 = vector.broadcast %cst_91 : f32 to vector<4x128xf32>
    %210 = arith.addf %208, %209 : vector<4x128xf32>
    %211 = arith.select %194, %206, %210 : vector<4x128xi1>, vector<4x128xf32>
    %212 = vector.extract_strided_slice %211 {offsets = [0, 0], sizes = [4, 32], strides = [1, 1]} : vector<4x128xf32> to vector<4x32xf32>
    %213 = vector.extract_strided_slice %211 {offsets = [0, 32], sizes = [4, 32], strides = [1, 1]} : vector<4x128xf32> to vector<4x32xf32>
    %214 = vector.extract_strided_slice %211 {offsets = [0, 64], sizes = [4, 32], strides = [1, 1]} : vector<4x128xf32> to vector<4x32xf32>
    %215 = vector.extract_strided_slice %211 {offsets = [0, 96], sizes = [4, 32], strides = [1, 1]} : vector<4x128xf32> to vector<4x32xf32>
    %216 = arith.mulf %213, %200 : vector<4x32xf32>
    %217 = arith.mulf %212, %214 : vector<4x32xf32>
    %218 = arith.addf %216, %217 : vector<4x32xf32>
    %219 = math.tanh %218 : vector<4x32xf32>
    %220 = arith.mulf %215, %219 : vector<4x32xf32>
    %221 = tpu.concatenate %220, %198 in 1 : vector<4x32xf32>, vector<4x32xf32> -> vector<4x64xf32>
    %cst_92 = arith.constant dense<0.000000e+00> : vector<4x128xf32>
    %222 = tpu.matmul %221, %187, %cst_92 {dimension_numbers = #tpu.dot_dimension_numbers<[1], [0], [0], [1], [0, 0, 1, 1], [], []>} : vector<4x64xf32>, vector<64x128xf32>, vector<4x128xf32> -> vector<4x128xf32>
    %223 = vector.broadcast %188 : vector<1x128xf32> to vector<4x128xf32>
    %224 = arith.addf %222, %223 : vector<4x128xf32>
    %225 = math.tanh %224 : vector<4x128xf32>
    %cst_93 = arith.constant 5.000000e-01 : f32
    %226 = vector.broadcast %cst_93 : f32 to vector<4x128xf32>
    %227 = arith.mulf %226, %225 : vector<4x128xf32>
    %cst_94 = arith.constant 5.000000e-01 : f32
    %228 = vector.broadcast %cst_94 : f32 to vector<4x128xf32>
    %229 = arith.addf %227, %228 : vector<4x128xf32>
    %230 = arith.select %194, %225, %229 : vector<4x128xi1>, vector<4x128xf32>
    %231 = vector.extract_strided_slice %230 {offsets = [0, 0], sizes = [4, 32], strides = [1, 1]} : vector<4x128xf32> to vector<4x32xf32>
    %232 = vector.extract_strided_slice %230 {offsets = [0, 32], sizes = [4, 32], strides = [1, 1]} : vector<4x128xf32> to vector<4x32xf32>
    %233 = vector.extract_strided_slice %230 {offsets = [0, 64], sizes = [4, 32], strides = [1, 1]} : vector<4x128xf32> to vector<4x32xf32>
    %234 = vector.extract_strided_slice %230 {offsets = [0, 96], sizes = [4, 32], strides = [1, 1]} : vector<4x128xf32> to vector<4x32xf32>
    %235 = arith.mulf %232, %202 : vector<4x32xf32>
    %236 = arith.mulf %231, %233 : vector<4x32xf32>
    %237 = arith.addf %235, %236 : vector<4x32xf32>
    %238 = math.tanh %237 : vector<4x32xf32>
    %239 = arith.mulf %234, %238 : vector<4x32xf32>
    %c0_95 = arith.constant 0 : index
    %c0_96 = arith.constant 0 : index
    %240 = vector.load %arg8[%c0_95, %c0_96] : memref<32x32xf32, #tpu.memory_space<vmem>>, vector<4x32xf32>
    tpu.vector_store %arg8[%c0_95, %c0_96], %239 {strides = array<i32>} : memref<32x32xf32, #tpu.memory_space<vmem>>, vector<4x32xf32>,
    %c4_97 = arith.constant 4 : index
    %c0_98 = arith.constant 0 : index
    %241 = vector.load %arg7[%c4_97, %c0_98] : memref<32x128xf32, #tpu.memory_space<vmem>>, vector<4x128xf32>
    %cst_99 = arith.constant dense<0.000000e+00> : vector<4x128xf32>
    %242 = tpu.matmul %220, %186, %cst_99 {dimension_numbers = #tpu.dot_dimension_numbers<[1], [0], [0], [1], [0, 0, 1, 1], [], []>} : vector<4x32xf32>, vector<32x128xf32>, vector<4x128xf32> -> vector<4x128xf32>
    %243 = arith.addf %241, %242 : vector<4x128xf32>
    %244 = math.tanh %243 : vector<4x128xf32>
    %cst_100 = arith.constant 5.000000e-01 : f32
    %245 = vector.broadcast %cst_100 : f32 to vector<4x128xf32>
    %246 = arith.mulf %245, %244 : vector<4x128xf32>
    %cst_101 = arith.constant 5.000000e-01 : f32
    %247 = vector.broadcast %cst_101 : f32 to vector<4x128xf32>
    %248 = arith.addf %246, %247 : vector<4x128xf32>
    %249 = arith.select %194, %244, %248 : vector<4x128xi1>, vector<4x128xf32>
    %250 = vector.extract_strided_slice %249 {offsets = [0, 0], sizes = [4, 32], strides = [1, 1]} : vector<4x128xf32> to vector<4x32xf32>
    %251 = vector.extract_strided_slice %249 {offsets = [0, 32], sizes = [4, 32], strides = [1, 1]} : vector<4x128xf32> to vector<4x32xf32>
    %252 = vector.extract_strided_slice %249 {offsets = [0, 64], sizes = [4, 32], strides = [1, 1]} : vector<4x128xf32> to vector<4x32xf32>
    %253 = vector.extract_strided_slice %249 {offsets = [0, 96], sizes = [4, 32], strides = [1, 1]} : vector<4x128xf32> to vector<4x32xf32>
    %254 = arith.mulf %251, %218 : vector<4x32xf32>
    %255 = arith.mulf %250, %252 : vector<4x32xf32>
    %256 = arith.addf %254, %255 : vector<4x32xf32>
    %257 = math.tanh %256 : vector<4x32xf32>
    %258 = arith.mulf %253, %257 : vector<4x32xf32>
    %259 = tpu.concatenate %258, %239 in 1 : vector<4x32xf32>, vector<4x32xf32> -> vector<4x64xf32>
    %cst_102 = arith.constant dense<0.000000e+00> : vector<4x128xf32>
    %260 = tpu.matmul %259, %187, %cst_102 {dimension_numbers = #tpu.dot_dimension_numbers<[1], [0], [0], [1], [0, 0, 1, 1], [], []>} : vector<4x64xf32>, vector<64x128xf32>, vector<4x128xf32> -> vector<4x128xf32>
    %261 = vector.broadcast %188 : vector<1x128xf32> to vector<4x128xf32>
    %262 = arith.addf %260, %261 : vector<4x128xf32>
    %263 = math.tanh %262 : vector<4x128xf32>
    %cst_103 = arith.constant 5.000000e-01 : f32
    %264 = vector.broadcast %cst_103 : f32 to vector<4x128xf32>
    %265 = arith.mulf %264, %263 : vector<4x128xf32>
    %cst_104 = arith.constant 5.000000e-01 : f32
    %266 = vector.broadcast %cst_104 : f32 to vector<4x128xf32>
    %267 = arith.addf %265, %266 : vector<4x128xf32>
    %268 = arith.select %194, %263, %267 : vector<4x128xi1>, vector<4x128xf32>
    %269 = vector.extract_strided_slice %268 {offsets = [0, 0], sizes = [4, 32], strides = [1, 1]} : vector<4x128xf32> to vector<4x32xf32>
    %270 = vector.extract_strided_slice %268 {offsets = [0, 32], sizes = [4, 32], strides = [1, 1]} : vector<4x128xf32> to vector<4x32xf32>
    %271 = vector.extract_strided_slice %268 {offsets = [0, 64], sizes = [4, 32], strides = [1, 1]} : vector<4x128xf32> to vector<4x32xf32>
    %272 = vector.extract_strided_slice %268 {offsets = [0, 96], sizes = [4, 32], strides = [1, 1]} : vector<4x128xf32> to vector<4x32xf32>
    %273 = arith.mulf %270, %237 : vector<4x32xf32>
    %274 = arith.mulf %269, %271 : vector<4x32xf32>
    %275 = arith.addf %273, %274 : vector<4x32xf32>
    %276 = math.tanh %275 : vector<4x32xf32>
    %277 = arith.mulf %272, %276 : vector<4x32xf32>
    %c4_105 = arith.constant 4 : index
    %c0_106 = arith.constant 0 : index
    %278 = vector.load %arg8[%c4_105, %c0_106] : memref<32x32xf32, #tpu.memory_space<vmem>>, vector<4x32xf32>
    tpu.vector_store %arg8[%c4_105, %c0_106], %277 {strides = array<i32>} : memref<32x32xf32, #tpu.memory_space<vmem>>, vector<4x32xf32>,
    %c8_107 = arith.constant 8 : index
    %c0_108 = arith.constant 0 : index
    %279 = vector.load %arg7[%c8_107, %c0_108] : memref<32x128xf32, #tpu.memory_space<vmem>>, vector<4x128xf32>
    %cst_109 = arith.constant dense<0.000000e+00> : vector<4x128xf32>
    %280 = tpu.matmul %258, %186, %cst_109 {dimension_numbers = #tpu.dot_dimension_numbers<[1], [0], [0], [1], [0, 0, 1, 1], [], []>} : vector<4x32xf32>, vector<32x128xf32>, vector<4x128xf32> -> vector<4x128xf32>
    %281 = arith.addf %279, %280 : vector<4x128xf32>
    %282 = math.tanh %281 : vector<4x128xf32>
    %cst_110 = arith.constant 5.000000e-01 : f32
    %283 = vector.broadcast %cst_110 : f32 to vector<4x128xf32>
    %284 = arith.mulf %283, %282 : vector<4x128xf32>
    %cst_111 = arith.constant 5.000000e-01 : f32
    %285 = vector.broadcast %cst_111 : f32 to vector<4x128xf32>
    %286 = arith.addf %284, %285 : vector<4x128xf32>
    %287 = arith.select %194, %282, %286 : vector<4x128xi1>, vector<4x128xf32>
    %288 = vector.extract_strided_slice %287 {offsets = [0, 0], sizes = [4, 32], strides = [1, 1]} : vector<4x128xf32> to vector<4x32xf32>
    %289 = vector.extract_strided_slice %287 {offsets = [0, 32], sizes = [4, 32], strides = [1, 1]} : vector<4x128xf32> to vector<4x32xf32>
    %290 = vector.extract_strided_slice %287 {offsets = [0, 64], sizes = [4, 32], strides = [1, 1]} : vector<4x128xf32> to vector<4x32xf32>
    %291 = vector.extract_strided_slice %287 {offsets = [0, 96], sizes = [4, 32], strides = [1, 1]} : vector<4x128xf32> to vector<4x32xf32>
    %292 = arith.mulf %289, %256 : vector<4x32xf32>
    %293 = arith.mulf %288, %290 : vector<4x32xf32>
    %294 = arith.addf %292, %293 : vector<4x32xf32>
    %295 = math.tanh %294 : vector<4x32xf32>
    %296 = arith.mulf %291, %295 : vector<4x32xf32>
    %297 = tpu.concatenate %296, %277 in 1 : vector<4x32xf32>, vector<4x32xf32> -> vector<4x64xf32>
    %cst_112 = arith.constant dense<0.000000e+00> : vector<4x128xf32>
    %298 = tpu.matmul %297, %187, %cst_112 {dimension_numbers = #tpu.dot_dimension_numbers<[1], [0], [0], [1], [0, 0, 1, 1], [], []>} : vector<4x64xf32>, vector<64x128xf32>, vector<4x128xf32> -> vector<4x128xf32>
    %299 = vector.broadcast %188 : vector<1x128xf32> to vector<4x128xf32>
    %300 = arith.addf %298, %299 : vector<4x128xf32>
    %301 = math.tanh %300 : vector<4x128xf32>
    %cst_113 = arith.constant 5.000000e-01 : f32
    %302 = vector.broadcast %cst_113 : f32 to vector<4x128xf32>
    %303 = arith.mulf %302, %301 : vector<4x128xf32>
    %cst_114 = arith.constant 5.000000e-01 : f32
    %304 = vector.broadcast %cst_114 : f32 to vector<4x128xf32>
    %305 = arith.addf %303, %304 : vector<4x128xf32>
    %306 = arith.select %194, %301, %305 : vector<4x128xi1>, vector<4x128xf32>
    %307 = vector.extract_strided_slice %306 {offsets = [0, 0], sizes = [4, 32], strides = [1, 1]} : vector<4x128xf32> to vector<4x32xf32>
    %308 = vector.extract_strided_slice %306 {offsets = [0, 32], sizes = [4, 32], strides = [1, 1]} : vector<4x128xf32> to vector<4x32xf32>
    %309 = vector.extract_strided_slice %306 {offsets = [0, 64], sizes = [4, 32], strides = [1, 1]} : vector<4x128xf32> to vector<4x32xf32>
    %310 = vector.extract_strided_slice %306 {offsets = [0, 96], sizes = [4, 32], strides = [1, 1]} : vector<4x128xf32> to vector<4x32xf32>
    %311 = arith.mulf %308, %275 : vector<4x32xf32>
    %312 = arith.mulf %307, %309 : vector<4x32xf32>
    %313 = arith.addf %311, %312 : vector<4x32xf32>
    %314 = math.tanh %313 : vector<4x32xf32>
    %315 = arith.mulf %310, %314 : vector<4x32xf32>
    %c8_115 = arith.constant 8 : index
    %c0_116 = arith.constant 0 : index
    %316 = vector.load %arg8[%c8_115, %c0_116] : memref<32x32xf32, #tpu.memory_space<vmem>>, vector<4x32xf32>
    tpu.vector_store %arg8[%c8_115, %c0_116], %315 {strides = array<i32>} : memref<32x32xf32, #tpu.memory_space<vmem>>, vector<4x32xf32>,
    %c12_117 = arith.constant 12 : index
    %c0_118 = arith.constant 0 : index
    %317 = vector.load %arg7[%c12_117, %c0_118] : memref<32x128xf32, #tpu.memory_space<vmem>>, vector<4x128xf32>
    %cst_119 = arith.constant dense<0.000000e+00> : vector<4x128xf32>
    %318 = tpu.matmul %296, %186, %cst_119 {dimension_numbers = #tpu.dot_dimension_numbers<[1], [0], [0], [1], [0, 0, 1, 1], [], []>} : vector<4x32xf32>, vector<32x128xf32>, vector<4x128xf32> -> vector<4x128xf32>
    %319 = arith.addf %317, %318 : vector<4x128xf32>
    %320 = math.tanh %319 : vector<4x128xf32>
    %cst_120 = arith.constant 5.000000e-01 : f32
    %321 = vector.broadcast %cst_120 : f32 to vector<4x128xf32>
    %322 = arith.mulf %321, %320 : vector<4x128xf32>
    %cst_121 = arith.constant 5.000000e-01 : f32
    %323 = vector.broadcast %cst_121 : f32 to vector<4x128xf32>
    %324 = arith.addf %322, %323 : vector<4x128xf32>
    %325 = arith.select %194, %320, %324 : vector<4x128xi1>, vector<4x128xf32>
    %326 = vector.extract_strided_slice %325 {offsets = [0, 0], sizes = [4, 32], strides = [1, 1]} : vector<4x128xf32> to vector<4x32xf32>
    %327 = vector.extract_strided_slice %325 {offsets = [0, 32], sizes = [4, 32], strides = [1, 1]} : vector<4x128xf32> to vector<4x32xf32>
    %328 = vector.extract_strided_slice %325 {offsets = [0, 64], sizes = [4, 32], strides = [1, 1]} : vector<4x128xf32> to vector<4x32xf32>
    %329 = vector.extract_strided_slice %325 {offsets = [0, 96], sizes = [4, 32], strides = [1, 1]} : vector<4x128xf32> to vector<4x32xf32>
    %330 = arith.mulf %327, %294 : vector<4x32xf32>
    %331 = arith.mulf %326, %328 : vector<4x32xf32>
    %332 = arith.addf %330, %331 : vector<4x32xf32>
    %333 = math.tanh %332 : vector<4x32xf32>
    %334 = arith.mulf %329, %333 : vector<4x32xf32>
    %335 = tpu.concatenate %334, %315 in 1 : vector<4x32xf32>, vector<4x32xf32> -> vector<4x64xf32>
    %cst_122 = arith.constant dense<0.000000e+00> : vector<4x128xf32>
    %336 = tpu.matmul %335, %187, %cst_122 {dimension_numbers = #tpu.dot_dimension_numbers<[1], [0], [0], [1], [0, 0, 1, 1], [], []>} : vector<4x64xf32>, vector<64x128xf32>, vector<4x128xf32> -> vector<4x128xf32>
    %337 = vector.broadcast %188 : vector<1x128xf32> to vector<4x128xf32>
    %338 = arith.addf %336, %337 : vector<4x128xf32>
    %339 = math.tanh %338 : vector<4x128xf32>
    %cst_123 = arith.constant 5.000000e-01 : f32
    %340 = vector.broadcast %cst_123 : f32 to vector<4x128xf32>
    %341 = arith.mulf %340, %339 : vector<4x128xf32>
    %cst_124 = arith.constant 5.000000e-01 : f32
    %342 = vector.broadcast %cst_124 : f32 to vector<4x128xf32>
    %343 = arith.addf %341, %342 : vector<4x128xf32>
    %344 = arith.select %194, %339, %343 : vector<4x128xi1>, vector<4x128xf32>
    %345 = vector.extract_strided_slice %344 {offsets = [0, 0], sizes = [4, 32], strides = [1, 1]} : vector<4x128xf32> to vector<4x32xf32>
    %346 = vector.extract_strided_slice %344 {offsets = [0, 32], sizes = [4, 32], strides = [1, 1]} : vector<4x128xf32> to vector<4x32xf32>
    %347 = vector.extract_strided_slice %344 {offsets = [0, 64], sizes = [4, 32], strides = [1, 1]} : vector<4x128xf32> to vector<4x32xf32>
    %348 = vector.extract_strided_slice %344 {offsets = [0, 96], sizes = [4, 32], strides = [1, 1]} : vector<4x128xf32> to vector<4x32xf32>
    %349 = arith.mulf %346, %313 : vector<4x32xf32>
    %350 = arith.mulf %345, %347 : vector<4x32xf32>
    %351 = arith.addf %349, %350 : vector<4x32xf32>
    %352 = math.tanh %351 : vector<4x32xf32>
    %353 = arith.mulf %348, %352 : vector<4x32xf32>
    %c12_125 = arith.constant 12 : index
    %c0_126 = arith.constant 0 : index
    %354 = vector.load %arg8[%c12_125, %c0_126] : memref<32x32xf32, #tpu.memory_space<vmem>>, vector<4x32xf32>
    tpu.vector_store %arg8[%c12_125, %c0_126], %353 {strides = array<i32>} : memref<32x32xf32, #tpu.memory_space<vmem>>, vector<4x32xf32>,
    %c16_127 = arith.constant 16 : index
    %c0_128 = arith.constant 0 : index
    %355 = vector.load %arg7[%c16_127, %c0_128] : memref<32x128xf32, #tpu.memory_space<vmem>>, vector<4x128xf32>
    %cst_129 = arith.constant dense<0.000000e+00> : vector<4x128xf32>
    %356 = tpu.matmul %334, %186, %cst_129 {dimension_numbers = #tpu.dot_dimension_numbers<[1], [0], [0], [1], [0, 0, 1, 1], [], []>} : vector<4x32xf32>, vector<32x128xf32>, vector<4x128xf32> -> vector<4x128xf32>
    %357 = arith.addf %355, %356 : vector<4x128xf32>
    %358 = math.tanh %357 : vector<4x128xf32>
    %cst_130 = arith.constant 5.000000e-01 : f32
    %359 = vector.broadcast %cst_130 : f32 to vector<4x128xf32>
    %360 = arith.mulf %359, %358 : vector<4x128xf32>
    %cst_131 = arith.constant 5.000000e-01 : f32
    %361 = vector.broadcast %cst_131 : f32 to vector<4x128xf32>
    %362 = arith.addf %360, %361 : vector<4x128xf32>
    %363 = arith.select %194, %358, %362 : vector<4x128xi1>, vector<4x128xf32>
    %364 = vector.extract_strided_slice %363 {offsets = [0, 0], sizes = [4, 32], strides = [1, 1]} : vector<4x128xf32> to vector<4x32xf32>
    %365 = vector.extract_strided_slice %363 {offsets = [0, 32], sizes = [4, 32], strides = [1, 1]} : vector<4x128xf32> to vector<4x32xf32>
    %366 = vector.extract_strided_slice %363 {offsets = [0, 64], sizes = [4, 32], strides = [1, 1]} : vector<4x128xf32> to vector<4x32xf32>
    %367 = vector.extract_strided_slice %363 {offsets = [0, 96], sizes = [4, 32], strides = [1, 1]} : vector<4x128xf32> to vector<4x32xf32>
    %368 = arith.mulf %365, %332 : vector<4x32xf32>
    %369 = arith.mulf %364, %366 : vector<4x32xf32>
    %370 = arith.addf %368, %369 : vector<4x32xf32>
    %371 = math.tanh %370 : vector<4x32xf32>
    %372 = arith.mulf %367, %371 : vector<4x32xf32>
    %373 = tpu.concatenate %372, %353 in 1 : vector<4x32xf32>, vector<4x32xf32> -> vector<4x64xf32>
    %cst_132 = arith.constant dense<0.000000e+00> : vector<4x128xf32>
    %374 = tpu.matmul %373, %187, %cst_132 {dimension_numbers = #tpu.dot_dimension_numbers<[1], [0], [0], [1], [0, 0, 1, 1], [], []>} : vector<4x64xf32>, vector<64x128xf32>, vector<4x128xf32> -> vector<4x128xf32>
    %375 = vector.broadcast %188 : vector<1x128xf32> to vector<4x128xf32>
    %376 = arith.addf %374, %375 : vector<4x128xf32>
    %377 = math.tanh %376 : vector<4x128xf32>
    %cst_133 = arith.constant 5.000000e-01 : f32
    %378 = vector.broadcast %cst_133 : f32 to vector<4x128xf32>
    %379 = arith.mulf %378, %377 : vector<4x128xf32>
    %cst_134 = arith.constant 5.000000e-01 : f32
    %380 = vector.broadcast %cst_134 : f32 to vector<4x128xf32>
    %381 = arith.addf %379, %380 : vector<4x128xf32>
    %382 = arith.select %194, %377, %381 : vector<4x128xi1>, vector<4x128xf32>
    %383 = vector.extract_strided_slice %382 {offsets = [0, 0], sizes = [4, 32], strides = [1, 1]} : vector<4x128xf32> to vector<4x32xf32>
    %384 = vector.extract_strided_slice %382 {offsets = [0, 32], sizes = [4, 32], strides = [1, 1]} : vector<4x128xf32> to vector<4x32xf32>
    %385 = vector.extract_strided_slice %382 {offsets = [0, 64], sizes = [4, 32], strides = [1, 1]} : vector<4x128xf32> to vector<4x32xf32>
    %386 = vector.extract_strided_slice %382 {offsets = [0, 96], sizes = [4, 32], strides = [1, 1]} : vector<4x128xf32> to vector<4x32xf32>
    %387 = arith.mulf %384, %351 : vector<4x32xf32>
    %388 = arith.mulf %383, %385 : vector<4x32xf32>
    %389 = arith.addf %387, %388 : vector<4x32xf32>
    %390 = math.tanh %389 : vector<4x32xf32>
    %391 = arith.mulf %386, %390 : vector<4x32xf32>
    %c16_135 = arith.constant 16 : index
    %c0_136 = arith.constant 0 : index
    %392 = vector.load %arg8[%c16_135, %c0_136] : memref<32x32xf32, #tpu.memory_space<vmem>>, vector<4x32xf32>
    tpu.vector_store %arg8[%c16_135, %c0_136], %391 {strides = array<i32>} : memref<32x32xf32, #tpu.memory_space<vmem>>, vector<4x32xf32>,
    %c20 = arith.constant 20 : index
    %c0_137 = arith.constant 0 : index
    %393 = vector.load %arg7[%c20, %c0_137] : memref<32x128xf32, #tpu.memory_space<vmem>>, vector<4x128xf32>
    %cst_138 = arith.constant dense<0.000000e+00> : vector<4x128xf32>
    %394 = tpu.matmul %372, %186, %cst_138 {dimension_numbers = #tpu.dot_dimension_numbers<[1], [0], [0], [1], [0, 0, 1, 1], [], []>} : vector<4x32xf32>, vector<32x128xf32>, vector<4x128xf32> -> vector<4x128xf32>
    %395 = arith.addf %393, %394 : vector<4x128xf32>
    %396 = math.tanh %395 : vector<4x128xf32>
    %cst_139 = arith.constant 5.000000e-01 : f32
    %397 = vector.broadcast %cst_139 : f32 to vector<4x128xf32>
    %398 = arith.mulf %397, %396 : vector<4x128xf32>
    %cst_140 = arith.constant 5.000000e-01 : f32
    %399 = vector.broadcast %cst_140 : f32 to vector<4x128xf32>
    %400 = arith.addf %398, %399 : vector<4x128xf32>
    %401 = arith.select %194, %396, %400 : vector<4x128xi1>, vector<4x128xf32>
    %402 = vector.extract_strided_slice %401 {offsets = [0, 0], sizes = [4, 32], strides = [1, 1]} : vector<4x128xf32> to vector<4x32xf32>
    %403 = vector.extract_strided_slice %401 {offsets = [0, 32], sizes = [4, 32], strides = [1, 1]} : vector<4x128xf32> to vector<4x32xf32>
    %404 = vector.extract_strided_slice %401 {offsets = [0, 64], sizes = [4, 32], strides = [1, 1]} : vector<4x128xf32> to vector<4x32xf32>
    %405 = vector.extract_strided_slice %401 {offsets = [0, 96], sizes = [4, 32], strides = [1, 1]} : vector<4x128xf32> to vector<4x32xf32>
    %406 = arith.mulf %403, %370 : vector<4x32xf32>
    %407 = arith.mulf %402, %404 : vector<4x32xf32>
    %408 = arith.addf %406, %407 : vector<4x32xf32>
    %409 = math.tanh %408 : vector<4x32xf32>
    %410 = arith.mulf %405, %409 : vector<4x32xf32>
    %411 = tpu.concatenate %410, %391 in 1 : vector<4x32xf32>, vector<4x32xf32> -> vector<4x64xf32>
    %cst_141 = arith.constant dense<0.000000e+00> : vector<4x128xf32>
    %412 = tpu.matmul %411, %187, %cst_141 {dimension_numbers = #tpu.dot_dimension_numbers<[1], [0], [0], [1], [0, 0, 1, 1], [], []>} : vector<4x64xf32>, vector<64x128xf32>, vector<4x128xf32> -> vector<4x128xf32>
    %413 = vector.broadcast %188 : vector<1x128xf32> to vector<4x128xf32>
    %414 = arith.addf %412, %413 : vector<4x128xf32>
    %415 = math.tanh %414 : vector<4x128xf32>
    %cst_142 = arith.constant 5.000000e-01 : f32
    %416 = vector.broadcast %cst_142 : f32 to vector<4x128xf32>
    %417 = arith.mulf %416, %415 : vector<4x128xf32>
    %cst_143 = arith.constant 5.000000e-01 : f32
    %418 = vector.broadcast %cst_143 : f32 to vector<4x128xf32>
    %419 = arith.addf %417, %418 : vector<4x128xf32>
    %420 = arith.select %194, %415, %419 : vector<4x128xi1>, vector<4x128xf32>
    %421 = vector.extract_strided_slice %420 {offsets = [0, 0], sizes = [4, 32], strides = [1, 1]} : vector<4x128xf32> to vector<4x32xf32>
    %422 = vector.extract_strided_slice %420 {offsets = [0, 32], sizes = [4, 32], strides = [1, 1]} : vector<4x128xf32> to vector<4x32xf32>
    %423 = vector.extract_strided_slice %420 {offsets = [0, 64], sizes = [4, 32], strides = [1, 1]} : vector<4x128xf32> to vector<4x32xf32>
    %424 = vector.extract_strided_slice %420 {offsets = [0, 96], sizes = [4, 32], strides = [1, 1]} : vector<4x128xf32> to vector<4x32xf32>
    %425 = arith.mulf %422, %389 : vector<4x32xf32>
    %426 = arith.mulf %421, %423 : vector<4x32xf32>
    %427 = arith.addf %425, %426 : vector<4x32xf32>
    %428 = math.tanh %427 : vector<4x32xf32>
    %429 = arith.mulf %424, %428 : vector<4x32xf32>
    %c20_144 = arith.constant 20 : index
    %c0_145 = arith.constant 0 : index
    %430 = vector.load %arg8[%c20_144, %c0_145] : memref<32x32xf32, #tpu.memory_space<vmem>>, vector<4x32xf32>
    tpu.vector_store %arg8[%c20_144, %c0_145], %429 {strides = array<i32>} : memref<32x32xf32, #tpu.memory_space<vmem>>, vector<4x32xf32>,
    %c24 = arith.constant 24 : index
    %c0_146 = arith.constant 0 : index
    %431 = vector.load %arg7[%c24, %c0_146] : memref<32x128xf32, #tpu.memory_space<vmem>>, vector<4x128xf32>
    %cst_147 = arith.constant dense<0.000000e+00> : vector<4x128xf32>
    %432 = tpu.matmul %410, %186, %cst_147 {dimension_numbers = #tpu.dot_dimension_numbers<[1], [0], [0], [1], [0, 0, 1, 1], [], []>} : vector<4x32xf32>, vector<32x128xf32>, vector<4x128xf32> -> vector<4x128xf32>
    %433 = arith.addf %431, %432 : vector<4x128xf32>
    %434 = math.tanh %433 : vector<4x128xf32>
    %cst_148 = arith.constant 5.000000e-01 : f32
    %435 = vector.broadcast %cst_148 : f32 to vector<4x128xf32>
    %436 = arith.mulf %435, %434 : vector<4x128xf32>
    %cst_149 = arith.constant 5.000000e-01 : f32
    %437 = vector.broadcast %cst_149 : f32 to vector<4x128xf32>
    %438 = arith.addf %436, %437 : vector<4x128xf32>
    %439 = arith.select %194, %434, %438 : vector<4x128xi1>, vector<4x128xf32>
    %440 = vector.extract_strided_slice %439 {offsets = [0, 0], sizes = [4, 32], strides = [1, 1]} : vector<4x128xf32> to vector<4x32xf32>
    %441 = vector.extract_strided_slice %439 {offsets = [0, 32], sizes = [4, 32], strides = [1, 1]} : vector<4x128xf32> to vector<4x32xf32>
    %442 = vector.extract_strided_slice %439 {offsets = [0, 64], sizes = [4, 32], strides = [1, 1]} : vector<4x128xf32> to vector<4x32xf32>
    %443 = vector.extract_strided_slice %439 {offsets = [0, 96], sizes = [4, 32], strides = [1, 1]} : vector<4x128xf32> to vector<4x32xf32>
    %444 = arith.mulf %441, %408 : vector<4x32xf32>
    %445 = arith.mulf %440, %442 : vector<4x32xf32>
    %446 = arith.addf %444, %445 : vector<4x32xf32>
    %447 = math.tanh %446 : vector<4x32xf32>
    %448 = arith.mulf %443, %447 : vector<4x32xf32>
    %449 = tpu.concatenate %448, %429 in 1 : vector<4x32xf32>, vector<4x32xf32> -> vector<4x64xf32>
    %cst_150 = arith.constant dense<0.000000e+00> : vector<4x128xf32>
    %450 = tpu.matmul %449, %187, %cst_150 {dimension_numbers = #tpu.dot_dimension_numbers<[1], [0], [0], [1], [0, 0, 1, 1], [], []>} : vector<4x64xf32>, vector<64x128xf32>, vector<4x128xf32> -> vector<4x128xf32>
    %451 = vector.broadcast %188 : vector<1x128xf32> to vector<4x128xf32>
    %452 = arith.addf %450, %451 : vector<4x128xf32>
    %453 = math.tanh %452 : vector<4x128xf32>
    %cst_151 = arith.constant 5.000000e-01 : f32
    %454 = vector.broadcast %cst_151 : f32 to vector<4x128xf32>
    %455 = arith.mulf %454, %453 : vector<4x128xf32>
    %cst_152 = arith.constant 5.000000e-01 : f32
    %456 = vector.broadcast %cst_152 : f32 to vector<4x128xf32>
    %457 = arith.addf %455, %456 : vector<4x128xf32>
    %458 = arith.select %194, %453, %457 : vector<4x128xi1>, vector<4x128xf32>
    %459 = vector.extract_strided_slice %458 {offsets = [0, 0], sizes = [4, 32], strides = [1, 1]} : vector<4x128xf32> to vector<4x32xf32>
    %460 = vector.extract_strided_slice %458 {offsets = [0, 32], sizes = [4, 32], strides = [1, 1]} : vector<4x128xf32> to vector<4x32xf32>
    %461 = vector.extract_strided_slice %458 {offsets = [0, 64], sizes = [4, 32], strides = [1, 1]} : vector<4x128xf32> to vector<4x32xf32>
    %462 = vector.extract_strided_slice %458 {offsets = [0, 96], sizes = [4, 32], strides = [1, 1]} : vector<4x128xf32> to vector<4x32xf32>
    %463 = arith.mulf %460, %427 : vector<4x32xf32>
    %464 = arith.mulf %459, %461 : vector<4x32xf32>
    %465 = arith.addf %463, %464 : vector<4x32xf32>
    %466 = math.tanh %465 : vector<4x32xf32>
    %467 = arith.mulf %462, %466 : vector<4x32xf32>
    %c24_153 = arith.constant 24 : index
    %c0_154 = arith.constant 0 : index
    %468 = vector.load %arg8[%c24_153, %c0_154] : memref<32x32xf32, #tpu.memory_space<vmem>>, vector<4x32xf32>
    tpu.vector_store %arg8[%c24_153, %c0_154], %467 {strides = array<i32>} : memref<32x32xf32, #tpu.memory_space<vmem>>, vector<4x32xf32>,
    %c28 = arith.constant 28 : index
    %c0_155 = arith.constant 0 : index
    %469 = vector.load %arg7[%c28, %c0_155] : memref<32x128xf32, #tpu.memory_space<vmem>>, vector<4x128xf32>
    %cst_156 = arith.constant dense<0.000000e+00> : vector<4x128xf32>
    %470 = tpu.matmul %448, %186, %cst_156 {dimension_numbers = #tpu.dot_dimension_numbers<[1], [0], [0], [1], [0, 0, 1, 1], [], []>} : vector<4x32xf32>, vector<32x128xf32>, vector<4x128xf32> -> vector<4x128xf32>
    %471 = arith.addf %469, %470 : vector<4x128xf32>
    %472 = math.tanh %471 : vector<4x128xf32>
    %cst_157 = arith.constant 5.000000e-01 : f32
    %473 = vector.broadcast %cst_157 : f32 to vector<4x128xf32>
    %474 = arith.mulf %473, %472 : vector<4x128xf32>
    %cst_158 = arith.constant 5.000000e-01 : f32
    %475 = vector.broadcast %cst_158 : f32 to vector<4x128xf32>
    %476 = arith.addf %474, %475 : vector<4x128xf32>
    %477 = arith.select %194, %472, %476 : vector<4x128xi1>, vector<4x128xf32>
    %478 = vector.extract_strided_slice %477 {offsets = [0, 0], sizes = [4, 32], strides = [1, 1]} : vector<4x128xf32> to vector<4x32xf32>
    %479 = vector.extract_strided_slice %477 {offsets = [0, 32], sizes = [4, 32], strides = [1, 1]} : vector<4x128xf32> to vector<4x32xf32>
    %480 = vector.extract_strided_slice %477 {offsets = [0, 64], sizes = [4, 32], strides = [1, 1]} : vector<4x128xf32> to vector<4x32xf32>
    %481 = vector.extract_strided_slice %477 {offsets = [0, 96], sizes = [4, 32], strides = [1, 1]} : vector<4x128xf32> to vector<4x32xf32>
    %482 = arith.mulf %479, %446 : vector<4x32xf32>
    %483 = arith.mulf %478, %480 : vector<4x32xf32>
    %484 = arith.addf %482, %483 : vector<4x32xf32>
    %485 = math.tanh %484 : vector<4x32xf32>
    %486 = arith.mulf %481, %485 : vector<4x32xf32>
    %487 = tpu.concatenate %486, %467 in 1 : vector<4x32xf32>, vector<4x32xf32> -> vector<4x64xf32>
    %cst_159 = arith.constant dense<0.000000e+00> : vector<4x128xf32>
    %488 = tpu.matmul %487, %187, %cst_159 {dimension_numbers = #tpu.dot_dimension_numbers<[1], [0], [0], [1], [0, 0, 1, 1], [], []>} : vector<4x64xf32>, vector<64x128xf32>, vector<4x128xf32> -> vector<4x128xf32>
    %489 = vector.broadcast %188 : vector<1x128xf32> to vector<4x128xf32>
    %490 = arith.addf %488, %489 : vector<4x128xf32>
    %491 = math.tanh %490 : vector<4x128xf32>
    %cst_160 = arith.constant 5.000000e-01 : f32
    %492 = vector.broadcast %cst_160 : f32 to vector<4x128xf32>
    %493 = arith.mulf %492, %491 : vector<4x128xf32>
    %cst_161 = arith.constant 5.000000e-01 : f32
    %494 = vector.broadcast %cst_161 : f32 to vector<4x128xf32>
    %495 = arith.addf %493, %494 : vector<4x128xf32>
    %496 = arith.select %194, %491, %495 : vector<4x128xi1>, vector<4x128xf32>
    %497 = vector.extract_strided_slice %496 {offsets = [0, 0], sizes = [4, 32], strides = [1, 1]} : vector<4x128xf32> to vector<4x32xf32>
    %498 = vector.extract_strided_slice %496 {offsets = [0, 32], sizes = [4, 32], strides = [1, 1]} : vector<4x128xf32> to vector<4x32xf32>
    %499 = vector.extract_strided_slice %496 {offsets = [0, 64], sizes = [4, 32], strides = [1, 1]} : vector<4x128xf32> to vector<4x32xf32>
    %500 = vector.extract_strided_slice %496 {offsets = [0, 96], sizes = [4, 32], strides = [1, 1]} : vector<4x128xf32> to vector<4x32xf32>
    %501 = arith.mulf %498, %465 : vector<4x32xf32>
    %502 = arith.mulf %497, %499 : vector<4x32xf32>
    %503 = arith.addf %501, %502 : vector<4x32xf32>
    %504 = math.tanh %503 : vector<4x32xf32>
    %505 = arith.mulf %500, %504 : vector<4x32xf32>
    %c28_162 = arith.constant 28 : index
    %c0_163 = arith.constant 0 : index
    %506 = vector.load %arg8[%c28_162, %c0_163] : memref<32x32xf32, #tpu.memory_space<vmem>>, vector<4x32xf32>
    tpu.vector_store %arg8[%c28_162, %c0_163], %505 {strides = array<i32>} : memref<32x32xf32, #tpu.memory_space<vmem>>, vector<4x32xf32>,
    %c0_164 = arith.constant 0 : index
    %c0_165 = arith.constant 0 : index
    %507 = vector.load %arg8[%c0_164, %c0_165] : memref<32x32xf32, #tpu.memory_space<vmem>>, vector<32x32xf32>
    %c152 = arith.constant 152 : index
    %c0_166 = arith.constant 0 : index
    %508 = vector.load %arg4[%c152, %c0_166] : memref<184x32xf32, #tpu.memory_space<vmem>>, vector<32x6xf32>
    %cst_167 = arith.constant dense<0.000000e+00> : vector<32x6xf32>
    %509 = tpu.matmul %507, %508, %cst_167 {dimension_numbers = #tpu.dot_dimension_numbers<[1], [0], [0], [1], [0, 0, 1, 1], [], []>} : vector<32x32xf32>, vector<32x6xf32>, vector<32x6xf32> -> vector<32x6xf32>
    %c14 = arith.constant 14 : index
    %c0_168 = arith.constant 0 : index
    %510 = vector.load %arg5[%c14, %c0_168] : memref<16x32xf32, #tpu.memory_space<vmem>>, vector<1x6xf32>
    %511 = vector.broadcast %510 : vector<1x6xf32> to vector<32x6xf32>
    %512 = arith.addf %509, %511 : vector<32x6xf32>
    %513 = vector.extract_strided_slice %512 {offsets = [0, 0], sizes = [32, 1], strides = [1, 1]} : vector<32x6xf32> to vector<32x1xf32>
    %514 = arith.negf %513 : vector<32x1xf32>
    %515 = math.exp %514 : vector<32x1xf32>
    %cst_169 = arith.constant 1.000000e+00 : f32
    %516 = vector.broadcast %cst_169 : f32 to vector<32x1xf32>
    %517 = arith.addf %516, %515 : vector<32x1xf32>
    %518 = arith.divf %516, %517 : vector<32x1xf32>
    %519 = vector.extract_strided_slice %512 {offsets = [0, 3], sizes = [32, 1], strides = [1, 1]} : vector<32x6xf32> to vector<32x1xf32>
    %520 = arith.negf %519 : vector<32x1xf32>
    %521 = math.exp %520 : vector<32x1xf32>
    %cst_170 = arith.constant 1.000000e+00 : f32
    %522 = vector.broadcast %cst_170 : f32 to vector<32x1xf32>
    %523 = arith.addf %522, %521 : vector<32x1xf32>
    %524 = arith.divf %522, %523 : vector<32x1xf32>
    %525 = vector.extract_strided_slice %512 {offsets = [0, 1], sizes = [32, 1], strides = [1, 1]} : vector<32x6xf32> to vector<32x1xf32>
    %526 = vector.extract_strided_slice %512 {offsets = [0, 2], sizes = [32, 1], strides = [1, 1]} : vector<32x6xf32> to vector<32x1xf32>
    %527 = arith.subf %525, %526 : vector<32x1xf32>
    %528 = arith.negf %527 : vector<32x1xf32>
    %529 = math.exp %528 : vector<32x1xf32>
    %cst_171 = arith.constant 1.000000e+00 : f32
    %530 = vector.broadcast %cst_171 : f32 to vector<32x1xf32>
    %531 = arith.addf %530, %529 : vector<32x1xf32>
    %532 = arith.divf %530, %531 : vector<32x1xf32>
    %533 = vector.extract_strided_slice %512 {offsets = [0, 4], sizes = [32, 1], strides = [1, 1]} : vector<32x6xf32> to vector<32x1xf32>
    %534 = vector.extract_strided_slice %512 {offsets = [0, 5], sizes = [32, 1], strides = [1, 1]} : vector<32x6xf32> to vector<32x1xf32>
    %535 = arith.subf %533, %534 : vector<32x1xf32>
    %536 = arith.negf %535 : vector<32x1xf32>
    %537 = math.exp %536 : vector<32x1xf32>
    %cst_172 = arith.constant 1.000000e+00 : f32
    %538 = vector.broadcast %cst_172 : f32 to vector<32x1xf32>
    %539 = arith.addf %538, %537 : vector<32x1xf32>
    %540 = arith.divf %538, %539 : vector<32x1xf32>
    %cst_173 = arith.constant 1.000000e+00 : f32
    %541 = vector.broadcast %cst_173 : f32 to vector<32x1xf32>
    %542 = arith.subf %541, %532 : vector<32x1xf32>
    %cst_174 = arith.constant 1.000000e+00 : f32
    %543 = vector.broadcast %cst_174 : f32 to vector<32x1xf32>
    %544 = arith.subf %543, %540 : vector<32x1xf32>
    %545 = tpu.concatenate %518, %532, %542, %524, %540, %544 in 1 : vector<32x1xf32>, vector<32x1xf32>, vector<32x1xf32>, vector<32x1xf32>, vector<32x1xf32>, vector<32x1xf32> -> vector<32x6xf32>
    %546 = vector.extract_strided_slice %512 {offsets = [0, 2], sizes = [32, 1], strides = [1, 1]} : vector<32x6xf32> to vector<32x1xf32>
    %547 = vector.extract_strided_slice %512 {offsets = [0, 1], sizes = [32, 1], strides = [1, 1]} : vector<32x6xf32> to vector<32x1xf32>
    %548 = arith.cmpf ogt, %546, %547 : vector<32x1xf32>
    %549 = arith.extui %548 : vector<32x1xi1> to vector<32x1xi32>
    %550 = arith.sitofp %549 : vector<32x1xi32> to vector<32x1xf32>
    %551 = vector.extract_strided_slice %512 {offsets = [0, 5], sizes = [32, 1], strides = [1, 1]} : vector<32x6xf32> to vector<32x1xf32>
    %552 = vector.extract_strided_slice %512 {offsets = [0, 4], sizes = [32, 1], strides = [1, 1]} : vector<32x6xf32> to vector<32x1xf32>
    %553 = arith.cmpf ogt, %551, %552 : vector<32x1xf32>
    %554 = arith.extui %553 : vector<32x1xi1> to vector<32x1xi32>
    %555 = arith.sitofp %554 : vector<32x1xi32> to vector<32x1xf32>
    %cst_175 = arith.constant 1.000000e+00 : f32
    %556 = vector.broadcast %cst_175 : f32 to vector<4x1xf32>
    %557 = vector.extract_strided_slice %550 {offsets = [0, 0], sizes = [4, 1], strides = [1, 1]} : vector<32x1xf32> to vector<4x1xf32>
    %558 = vector.extract_strided_slice %555 {offsets = [0, 0], sizes = [4, 1], strides = [1, 1]} : vector<32x1xf32> to vector<4x1xf32>
    %559 = vector.shape_cast %556 : vector<4x1xf32> to vector<1x4x1xf32>
    %cst_176 = arith.constant dense<0xFF800000> : vector<1xf32>
    %560 = vector.multi_reduction <maximumf>, %559, %cst_176 [1, 2] : vector<1x4x1xf32> to vector<1xf32>
    %561 = vector.shape_cast %560 : vector<1xf32> to vector<1x1x1xf32>
    %562 = vector.extract %561[0, 0, 0] : f32 from vector<1x1x1xf32>
    %563 = vector.broadcast %562 : f32 to vector<1x1xf32>
    %cst_177 = arith.constant 5.000000e-01 : f32
    %564 = vector.broadcast %cst_177 : f32 to vector<1x1xf32>
    %565 = arith.cmpf oge, %563, %564 : vector<1x1xf32>
    %566 = arith.extui %565 : vector<1x1xi1> to vector<1x1xi32>
    %567 = arith.sitofp %566 : vector<1x1xi32> to vector<1x1xf32>
    %cst_178 = arith.constant 1.000000e+00 : f32
    %568 = vector.broadcast %cst_178 : f32 to vector<4x1xf32>
    %569 = arith.subf %568, %557 : vector<4x1xf32>
    %570 = arith.mulf %556, %569 : vector<4x1xf32>
    %571 = vector.broadcast %567 : vector<1x1xf32> to vector<4x1xf32>
    %572 = arith.mulf %557, %571 : vector<4x1xf32>
    %573 = vector.broadcast %567 : vector<1x1xf32> to vector<4x1xf32>
    %574 = arith.mulf %558, %573 : vector<4x1xf32>
    %cst_179 = arith.constant 1.000000e+00 : f32
    %575 = vector.broadcast %cst_179 : f32 to vector<4x1xf32>
    %576 = arith.subf %575, %558 : vector<4x1xf32>
    %577 = arith.mulf %570, %576 : vector<4x1xf32>
    %578 = vector.extract_strided_slice %550 {offsets = [4, 0], sizes = [4, 1], strides = [1, 1]} : vector<32x1xf32> to vector<4x1xf32>
    %579 = vector.extract_strided_slice %555 {offsets = [4, 0], sizes = [4, 1], strides = [1, 1]} : vector<32x1xf32> to vector<4x1xf32>
    %580 = vector.shape_cast %577 : vector<4x1xf32> to vector<1x4x1xf32>
    %cst_180 = arith.constant dense<0xFF800000> : vector<1xf32>
    %581 = vector.multi_reduction <maximumf>, %580, %cst_180 [1, 2] : vector<1x4x1xf32> to vector<1xf32>
    %582 = vector.shape_cast %581 : vector<1xf32> to vector<1x1x1xf32>
    %583 = vector.extract %582[0, 0, 0] : f32 from vector<1x1x1xf32>
    %584 = vector.broadcast %583 : f32 to vector<1x1xf32>
    %cst_181 = arith.constant 5.000000e-01 : f32
    %585 = vector.broadcast %cst_181 : f32 to vector<1x1xf32>
    %586 = arith.cmpf oge, %584, %585 : vector<1x1xf32>
    %587 = arith.extui %586 : vector<1x1xi1> to vector<1x1xi32>
    %588 = arith.sitofp %587 : vector<1x1xi32> to vector<1x1xf32>
    %cst_182 = arith.constant 1.000000e+00 : f32
    %589 = vector.broadcast %cst_182 : f32 to vector<4x1xf32>
    %590 = arith.subf %589, %578 : vector<4x1xf32>
    %591 = arith.mulf %577, %590 : vector<4x1xf32>
    %592 = vector.broadcast %588 : vector<1x1xf32> to vector<4x1xf32>
    %593 = arith.mulf %578, %592 : vector<4x1xf32>
    %594 = vector.broadcast %588 : vector<1x1xf32> to vector<4x1xf32>
    %595 = arith.mulf %579, %594 : vector<4x1xf32>
    %cst_183 = arith.constant 1.000000e+00 : f32
    %596 = vector.broadcast %cst_183 : f32 to vector<4x1xf32>
    %597 = arith.subf %596, %579 : vector<4x1xf32>
    %598 = arith.mulf %591, %597 : vector<4x1xf32>
    %599 = vector.extract_strided_slice %550 {offsets = [8, 0], sizes = [4, 1], strides = [1, 1]} : vector<32x1xf32> to vector<4x1xf32>
    %600 = vector.extract_strided_slice %555 {offsets = [8, 0], sizes = [4, 1], strides = [1, 1]} : vector<32x1xf32> to vector<4x1xf32>
    %601 = vector.shape_cast %598 : vector<4x1xf32> to vector<1x4x1xf32>
    %cst_184 = arith.constant dense<0xFF800000> : vector<1xf32>
    %602 = vector.multi_reduction <maximumf>, %601, %cst_184 [1, 2] : vector<1x4x1xf32> to vector<1xf32>
    %603 = vector.shape_cast %602 : vector<1xf32> to vector<1x1x1xf32>
    %604 = vector.extract %603[0, 0, 0] : f32 from vector<1x1x1xf32>
    %605 = vector.broadcast %604 : f32 to vector<1x1xf32>
    %cst_185 = arith.constant 5.000000e-01 : f32
    %606 = vector.broadcast %cst_185 : f32 to vector<1x1xf32>
    %607 = arith.cmpf oge, %605, %606 : vector<1x1xf32>
    %608 = arith.extui %607 : vector<1x1xi1> to vector<1x1xi32>
    %609 = arith.sitofp %608 : vector<1x1xi32> to vector<1x1xf32>
    %cst_186 = arith.constant 1.000000e+00 : f32
    %610 = vector.broadcast %cst_186 : f32 to vector<4x1xf32>
    %611 = arith.subf %610, %599 : vector<4x1xf32>
    %612 = arith.mulf %598, %611 : vector<4x1xf32>
    %613 = vector.broadcast %609 : vector<1x1xf32> to vector<4x1xf32>
    %614 = arith.mulf %599, %613 : vector<4x1xf32>
    %615 = vector.broadcast %609 : vector<1x1xf32> to vector<4x1xf32>
    %616 = arith.mulf %600, %615 : vector<4x1xf32>
    %cst_187 = arith.constant 1.000000e+00 : f32
    %617 = vector.broadcast %cst_187 : f32 to vector<4x1xf32>
    %618 = arith.subf %617, %600 : vector<4x1xf32>
    %619 = arith.mulf %612, %618 : vector<4x1xf32>
    %620 = vector.extract_strided_slice %550 {offsets = [12, 0], sizes = [4, 1], strides = [1, 1]} : vector<32x1xf32> to vector<4x1xf32>
    %621 = vector.extract_strided_slice %555 {offsets = [12, 0], sizes = [4, 1], strides = [1, 1]} : vector<32x1xf32> to vector<4x1xf32>
    %622 = vector.shape_cast %619 : vector<4x1xf32> to vector<1x4x1xf32>
    %cst_188 = arith.constant dense<0xFF800000> : vector<1xf32>
    %623 = vector.multi_reduction <maximumf>, %622, %cst_188 [1, 2] : vector<1x4x1xf32> to vector<1xf32>
    %624 = vector.shape_cast %623 : vector<1xf32> to vector<1x1x1xf32>
    %625 = vector.extract %624[0, 0, 0] : f32 from vector<1x1x1xf32>
    %626 = vector.broadcast %625 : f32 to vector<1x1xf32>
    %cst_189 = arith.constant 5.000000e-01 : f32
    %627 = vector.broadcast %cst_189 : f32 to vector<1x1xf32>
    %628 = arith.cmpf oge, %626, %627 : vector<1x1xf32>
    %629 = arith.extui %628 : vector<1x1xi1> to vector<1x1xi32>
    %630 = arith.sitofp %629 : vector<1x1xi32> to vector<1x1xf32>
    %cst_190 = arith.constant 1.000000e+00 : f32
    %631 = vector.broadcast %cst_190 : f32 to vector<4x1xf32>
    %632 = arith.subf %631, %620 : vector<4x1xf32>
    %633 = arith.mulf %619, %632 : vector<4x1xf32>
    %634 = vector.broadcast %630 : vector<1x1xf32> to vector<4x1xf32>
    %635 = arith.mulf %620, %634 : vector<4x1xf32>
    %636 = vector.broadcast %630 : vector<1x1xf32> to vector<4x1xf32>
    %637 = arith.mulf %621, %636 : vector<4x1xf32>
    %cst_191 = arith.constant 1.000000e+00 : f32
    %638 = vector.broadcast %cst_191 : f32 to vector<4x1xf32>
    %639 = arith.subf %638, %621 : vector<4x1xf32>
    %640 = arith.mulf %633, %639 : vector<4x1xf32>
    %641 = vector.extract_strided_slice %550 {offsets = [16, 0], sizes = [4, 1], strides = [1, 1]} : vector<32x1xf32> to vector<4x1xf32>
    %642 = vector.extract_strided_slice %555 {offsets = [16, 0], sizes = [4, 1], strides = [1, 1]} : vector<32x1xf32> to vector<4x1xf32>
    %643 = vector.shape_cast %640 : vector<4x1xf32> to vector<1x4x1xf32>
    %cst_192 = arith.constant dense<0xFF800000> : vector<1xf32>
    %644 = vector.multi_reduction <maximumf>, %643, %cst_192 [1, 2] : vector<1x4x1xf32> to vector<1xf32>
    %645 = vector.shape_cast %644 : vector<1xf32> to vector<1x1x1xf32>
    %646 = vector.extract %645[0, 0, 0] : f32 from vector<1x1x1xf32>
    %647 = vector.broadcast %646 : f32 to vector<1x1xf32>
    %cst_193 = arith.constant 5.000000e-01 : f32
    %648 = vector.broadcast %cst_193 : f32 to vector<1x1xf32>
    %649 = arith.cmpf oge, %647, %648 : vector<1x1xf32>
    %650 = arith.extui %649 : vector<1x1xi1> to vector<1x1xi32>
    %651 = arith.sitofp %650 : vector<1x1xi32> to vector<1x1xf32>
    %cst_194 = arith.constant 1.000000e+00 : f32
    %652 = vector.broadcast %cst_194 : f32 to vector<4x1xf32>
    %653 = arith.subf %652, %641 : vector<4x1xf32>
    %654 = arith.mulf %640, %653 : vector<4x1xf32>
    %655 = vector.broadcast %651 : vector<1x1xf32> to vector<4x1xf32>
    %656 = arith.mulf %641, %655 : vector<4x1xf32>
    %657 = vector.broadcast %651 : vector<1x1xf32> to vector<4x1xf32>
    %658 = arith.mulf %642, %657 : vector<4x1xf32>
    %cst_195 = arith.constant 1.000000e+00 : f32
    %659 = vector.broadcast %cst_195 : f32 to vector<4x1xf32>
    %660 = arith.subf %659, %642 : vector<4x1xf32>
    %661 = arith.mulf %654, %660 : vector<4x1xf32>
    %662 = vector.extract_strided_slice %550 {offsets = [20, 0], sizes = [4, 1], strides = [1, 1]} : vector<32x1xf32> to vector<4x1xf32>
    %663 = vector.extract_strided_slice %555 {offsets = [20, 0], sizes = [4, 1], strides = [1, 1]} : vector<32x1xf32> to vector<4x1xf32>
    %664 = vector.shape_cast %661 : vector<4x1xf32> to vector<1x4x1xf32>
    %cst_196 = arith.constant dense<0xFF800000> : vector<1xf32>
    %665 = vector.multi_reduction <maximumf>, %664, %cst_196 [1, 2] : vector<1x4x1xf32> to vector<1xf32>
    %666 = vector.shape_cast %665 : vector<1xf32> to vector<1x1x1xf32>
    %667 = vector.extract %666[0, 0, 0] : f32 from vector<1x1x1xf32>
    %668 = vector.broadcast %667 : f32 to vector<1x1xf32>
    %cst_197 = arith.constant 5.000000e-01 : f32
    %669 = vector.broadcast %cst_197 : f32 to vector<1x1xf32>
    %670 = arith.cmpf oge, %668, %669 : vector<1x1xf32>
    %671 = arith.extui %670 : vector<1x1xi1> to vector<1x1xi32>
    %672 = arith.sitofp %671 : vector<1x1xi32> to vector<1x1xf32>
    %cst_198 = arith.constant 1.000000e+00 : f32
    %673 = vector.broadcast %cst_198 : f32 to vector<4x1xf32>
    %674 = arith.subf %673, %662 : vector<4x1xf32>
    %675 = arith.mulf %661, %674 : vector<4x1xf32>
    %676 = vector.broadcast %672 : vector<1x1xf32> to vector<4x1xf32>
    %677 = arith.mulf %662, %676 : vector<4x1xf32>
    %678 = vector.broadcast %672 : vector<1x1xf32> to vector<4x1xf32>
    %679 = arith.mulf %663, %678 : vector<4x1xf32>
    %cst_199 = arith.constant 1.000000e+00 : f32
    %680 = vector.broadcast %cst_199 : f32 to vector<4x1xf32>
    %681 = arith.subf %680, %663 : vector<4x1xf32>
    %682 = arith.mulf %675, %681 : vector<4x1xf32>
    %683 = vector.extract_strided_slice %550 {offsets = [24, 0], sizes = [4, 1], strides = [1, 1]} : vector<32x1xf32> to vector<4x1xf32>
    %684 = vector.extract_strided_slice %555 {offsets = [24, 0], sizes = [4, 1], strides = [1, 1]} : vector<32x1xf32> to vector<4x1xf32>
    %685 = vector.shape_cast %682 : vector<4x1xf32> to vector<1x4x1xf32>
    %cst_200 = arith.constant dense<0xFF800000> : vector<1xf32>
    %686 = vector.multi_reduction <maximumf>, %685, %cst_200 [1, 2] : vector<1x4x1xf32> to vector<1xf32>
    %687 = vector.shape_cast %686 : vector<1xf32> to vector<1x1x1xf32>
    %688 = vector.extract %687[0, 0, 0] : f32 from vector<1x1x1xf32>
    %689 = vector.broadcast %688 : f32 to vector<1x1xf32>
    %cst_201 = arith.constant 5.000000e-01 : f32
    %690 = vector.broadcast %cst_201 : f32 to vector<1x1xf32>
    %691 = arith.cmpf oge, %689, %690 : vector<1x1xf32>
    %692 = arith.extui %691 : vector<1x1xi1> to vector<1x1xi32>
    %693 = arith.sitofp %692 : vector<1x1xi32> to vector<1x1xf32>
    %cst_202 = arith.constant 1.000000e+00 : f32
    %694 = vector.broadcast %cst_202 : f32 to vector<4x1xf32>
    %695 = arith.subf %694, %683 : vector<4x1xf32>
    %696 = arith.mulf %682, %695 : vector<4x1xf32>
    %697 = vector.broadcast %693 : vector<1x1xf32> to vector<4x1xf32>
    %698 = arith.mulf %683, %697 : vector<4x1xf32>
    %699 = vector.broadcast %693 : vector<1x1xf32> to vector<4x1xf32>
    %700 = arith.mulf %684, %699 : vector<4x1xf32>
    %cst_203 = arith.constant 1.000000e+00 : f32
    %701 = vector.broadcast %cst_203 : f32 to vector<4x1xf32>
    %702 = arith.subf %701, %684 : vector<4x1xf32>
    %703 = arith.mulf %696, %702 : vector<4x1xf32>
    %704 = vector.extract_strided_slice %550 {offsets = [28, 0], sizes = [4, 1], strides = [1, 1]} : vector<32x1xf32> to vector<4x1xf32>
    %705 = vector.extract_strided_slice %555 {offsets = [28, 0], sizes = [4, 1], strides = [1, 1]} : vector<32x1xf32> to vector<4x1xf32>
    %706 = vector.shape_cast %703 : vector<4x1xf32> to vector<1x4x1xf32>
    %cst_204 = arith.constant dense<0xFF800000> : vector<1xf32>
    %707 = vector.multi_reduction <maximumf>, %706, %cst_204 [1, 2] : vector<1x4x1xf32> to vector<1xf32>
    %708 = vector.shape_cast %707 : vector<1xf32> to vector<1x1x1xf32>
    %709 = vector.extract %708[0, 0, 0] : f32 from vector<1x1x1xf32>
    %710 = vector.broadcast %709 : f32 to vector<1x1xf32>
    %cst_205 = arith.constant 5.000000e-01 : f32
    %711 = vector.broadcast %cst_205 : f32 to vector<1x1xf32>
    %712 = arith.cmpf oge, %710, %711 : vector<1x1xf32>
    %713 = arith.extui %712 : vector<1x1xi1> to vector<1x1xi32>
    %714 = arith.sitofp %713 : vector<1x1xi32> to vector<1x1xf32>
    %cst_206 = arith.constant 1.000000e+00 : f32
    %715 = vector.broadcast %cst_206 : f32 to vector<4x1xf32>
    %716 = arith.subf %715, %704 : vector<4x1xf32>
    %717 = arith.mulf %703, %716 : vector<4x1xf32>
    %718 = vector.broadcast %714 : vector<1x1xf32> to vector<4x1xf32>
    %719 = arith.mulf %704, %718 : vector<4x1xf32>
    %720 = vector.broadcast %714 : vector<1x1xf32> to vector<4x1xf32>
    %721 = arith.mulf %705, %720 : vector<4x1xf32>
    %722 = tpu.concatenate %556, %577, %598, %619, %640, %661, %682, %703 in 0 : vector<4x1xf32>, vector<4x1xf32>, vector<4x1xf32>, vector<4x1xf32>, vector<4x1xf32>, vector<4x1xf32>, vector<4x1xf32>, vector<4x1xf32> -> vector<32x1xf32>
    %723 = tpu.concatenate %570, %591, %612, %633, %654, %675, %696, %717 in 0 : vector<4x1xf32>, vector<4x1xf32>, vector<4x1xf32>, vector<4x1xf32>, vector<4x1xf32>, vector<4x1xf32>, vector<4x1xf32>, vector<4x1xf32> -> vector<32x1xf32>
    %724 = tpu.concatenate %572, %593, %614, %635, %656, %677, %698, %719 in 0 : vector<4x1xf32>, vector<4x1xf32>, vector<4x1xf32>, vector<4x1xf32>, vector<4x1xf32>, vector<4x1xf32>, vector<4x1xf32>, vector<4x1xf32> -> vector<32x1xf32>
    %725 = tpu.concatenate %574, %595, %616, %637, %658, %679, %700, %721 in 0 : vector<4x1xf32>, vector<4x1xf32>, vector<4x1xf32>, vector<4x1xf32>, vector<4x1xf32>, vector<4x1xf32>, vector<4x1xf32>, vector<4x1xf32> -> vector<32x1xf32>
    %cst_207 = arith.constant 0.000000e+00 : f32
    %726 = vector.broadcast %cst_207 : f32 to vector<28x5xf32>
    %727 = tpu.concatenate %173, %726 in 0 : vector<4x5xf32>, vector<28x5xf32> -> vector<32x5xf32>
    %728 = vector.broadcast %722 : vector<32x1xf32> to vector<32x6xf32>
    %729 = arith.mulf %545, %728 : vector<32x6xf32>
    %cst_208 = arith.constant 0.000000e+00 : f32
    %730 = vector.broadcast %cst_208 : f32 to vector<32x6xf32>
    %cst_209 = arith.constant 0.000000e+00 : f32
    %731 = vector.broadcast %cst_209 : f32 to vector<32x107xf32>
    %732 = tpu.concatenate %729, %722, %723, %724, %725, %730, %727, %731 in 1 : vector<32x6xf32>, vector<32x1xf32>, vector<32x1xf32>, vector<32x1xf32>, vector<32x1xf32>, vector<32x6xf32>, vector<32x5xf32>, vector<32x107xf32> -> vector<32x128xf32>
    %c0_210 = arith.constant 0 : index
    %c0_211 = arith.constant 0 : index
    %733 = vector.load %arg6[%c0_210, %c0_211] : memref<32x128xf32, #tpu.memory_space<vmem>>, vector<32x128xf32>
    tpu.vector_store %arg6[%c0_210, %c0_211], %732 {strides = array<i32>} : memref<32x128xf32, #tpu.memory_space<vmem>>, vector<32x128xf32>,
    return
  }
}

</mosaic_0001>

<bundles_post_ra>
// kernel: generator_forward.1
= control target key start
LH: loop header
LB: loop body
LE: loop exit
PB: predicated region body
PF: predicated region fallthrough
CT: control target
= control target key end

     0   :  { %vm32_vm0 = vcmask 64512   ;;  %v4082_v0 = vmov 0.0   ;;  %vm4083_vm1 = vmmov 0   ;;  %v4084_v6 = vmov 0.0|0.0   ;;  %s4086_s29 = smov 127   ;;  %s4087_s30 = smov 126   ;;  %s5028_s4 = inlined_call_operand.vmem [shape: f32[184,32], index: 4, kind: input, shape index: {}]   ;;  %s5029_s0 = inlined_call_operand.vmem [shape: f32[4,16], index: 0, kind: input, shape index: {}]   ;;  %s5030_s5 = inlined_call_operand.vmem [shape: f32[16,32], index: 5, kind: input, shape index: {}]   ;;  %s5031_s3 = inlined_call_operand.vmem [shape: f32[128,128], index: 3, kind: input, shape index: {}]   ;;  %s5032_s1 = inlined_call_operand.vmem [shape: f32[32,8], index: 1, kind: input, shape index: {}]   ;;  %s5033_s2 = inlined_call_operand.vmem [shape: f32[4,4,32], index: 2, kind: input, shape index: {}]   ;;  %s5034_s6 = inlined_call_operand.vmem [shape: f32[32,128], index: 6, kind: output, shape index: {}]  }
   0x1   :  { %3423 = vmatprep.subr.mxu0 %v4082_v0  ;;  %v24_v1 = vld [vmem:[%s5028_s4] sm:$0xff]  ;;  %3425 = vmatprep.mubr.msk.f32.mxu0 %vm4083_vm1, %v4082_v0  ;;  %v140_v3 = vld [vmem:[%s5028_s4 + $0x8] sm:$0xff]  ;;  %v141_v4 = vld [vmem:[%s5028_s4 + $0x10] sm:$0xff]  ;;  %vm107_vm2 = vcmask 257024   ;;  %vm151_vm3 = vcmask 261120   ;;  %vm408_vm5 = vcmask 1042432  }
   0x2   :  { %v4145_v2 = vld [vmem:[%s5029_s0] sm:$0xf]  ;;  %3424 = vmatpush3.msra.mxu0 %v24_v1  ;;  %3436 = vmatprep.mubr.msk.f32.mxu1 %vm4083_vm1, %v4082_v0  ;;  %v3750_v5 = vpack.c.bf16 %v141_v4, %v140_v3  ;;  %v142_v7 = vld [vmem:[%s5028_s4 + $0x18] sm:$0xff]  ;;  %v257_v40 = vld [vmem:[%s5028_s4 + $0x28] sm:$0xff]  ;;  %vm4088_vm7 = vmmov 1   ;;  %s4089_s11 = smov 1  }
   0x3   :  { %3426 = vmatmul.mubr.msk.f32.vlgmr.msra.gmra.mrb[0].mxu0 %vm32_vm0, %v4145_v2  ;;  %3749 = vmatprep.subr.bf16.mxu1 %v4084_v6  ;;  %v143_v8 = vld [vmem:[%s5028_s4 + $0x20] sm:$0xff]  ;;  %v258_v41 = vld [vmem:[%s5028_s4 + $0x30] sm:$0xff]  ;;  %v259_v43 = vld [vmem:[%s5028_s4 + $0x38] sm:$0xff]  ;;  %s4090_s12 = smov 2   ;;  %s4091_s13 = smov 120   ;;  %vm383_vm15 = vcmask 7168  }
   0x4   :  { %3447 = vmatprep.mubr.msk.f32.mxu0 %vm4083_vm1, %v4082_v0  ;;  %3755 = vmatprep.subr.bf16.mxu0 %v4084_v6  ;;  %v3753_v9 = vpack.c.bf16 %v143_v8, %v142_v7  ;;  %v3189_v10 = vld [vmem:[%s5030_s5] ss:$0 sm:$0xff]  ;;  %v3191_v34 = vld [vmem:[%s5030_s5 + $0x1] ss:$0 sm:$0xff]  ;;  %v3192_v37 = vld [vmem:[%s5030_s5 + $0x2] ss:$0 sm:$0xff]  ;;  %v3756_v42 = vpack.c.bf16 %v258_v41, %v257_v40 }
   0x5   :  { %3751 = vmatpush3.bf16.msra.mxu1 %v3750_v5  ;;  %v260_v44 = vld [vmem:[%s5028_s4 + $0x40] sm:$0xff]  ;;  %vm3763_vm8 = vmpackc.low %vm408_vm5, %vm4088_vm7  ;;  %s4092_s14 = smov 8   ;;  %vm404_vm5 = vcmask 89088   ;;  %v516_v40 = vld [vmem:[%s5028_s4 + $0x68] sm:$0xff]  ;;  %s4093_s22 = smov 3  }
   0x6   :  { %3752 = vmatprep.subr.bf16.mxu1 %v4084_v6  ;;  %3757 = vmatpush3.bf16.msra.mxu0 %v3756_v42  ;;  %v3759_v45 = vpack.c.bf16 %v260_v44, %v259_v43  ;;  %v3193_v46 = vld [vmem:[%s5030_s5 + $0x3] ss:$0 sm:$0xff]  ;;  %v517_v41 = vld [vmem:[%s5028_s4 + $0x70] sm:$0xff]  ;;  %v3202_v43 = vld [vmem:[%s5030_s5 + $0x7] ss:$0 sm:$0xff]  ;;  %s4094_s25 = smov 32  }
   0x7   :  { %3758 = vmatprep.subr.bf16.mxu0 %v4084_v6  ;;  %v3769_v42 = vpack.c.bf16 %v517_v41, %v516_v40  ;;  %s4095_s28 = smov 64   ;;  %s4099_s15 = smov 4  }
   0x8   :  { %s4100_s19 = smov 16  }
   0x9   :  { %3754 = vmatpush3.bf16.msra.mxu1 %v3753_v9  ;;  %v3195_v9 = vld [vmem:[%s5030_s5 + $0x4] ss:$0 sm:$0xff] }
   0xa   :  { %3761 = vmatprep.subr.bf16.mxu1 %v4084_v6  ;;  %3760 = vmatpush3.bf16.msra.mxu0 %v3759_v45 }
   0xb   :  { %3765 = vmatprep.subr.bf16.mxu0 %v4084_v6 }
  0xd6   :  { %v102_v11 = vpop.f32.mrb[0].mxu0 }
  0xd7   :  { %v103_v12 = vadd.f32 %v3189_v10, %v102_v11  ;;  %v3427_v13 = vpop.f32.mrb[1].mxu0 }
  0xd9   :  { %v106_v14 = vmax.f32 %v103_v12, 0.0  ;;  %v3196_v12 = vld [vmem:[%s5030_s5 + $0x5] ss:$0 sm:$0xff] }
  0xdb   :  { %v108_v15 = vsel %vm107_vm2, %v106_v14, 0.0 }
  0xdc   :  { %v109_v16 = vrot.slane %v108_v15, 4 }
  0xde   :  { %v110_v17 = vadd.f32 %v109_v16, %v108_v15  ;;  %v4085_v15 = vmov 0   ;;  %v3197_v16 = vld [vmem:[%s5030_s5 + $0x6] ss:$0 sm:$0xff] }
  0xdf   :  { %3966 = vset.pattern.permute.xlu1 %v4085_v15  ;;  %3967 = vset.pattern.permute.xlu0 %v4085_v15 }
  0xe0   :  { %v111_v18 = vrot.slane %v110_v17, 2 }
  0xe2   :  { %v112_v19 = vadd.f32 %v111_v18, %v110_v17 }
  0xe4   :  { %v113_v20 = vrot.slane %v112_v19, 1 }
  0xe6   :  { %v114_v21 = vadd.f32 %v113_v20, %v112_v19 }
  0xe8   :  { %v116_v22 = vmul.f32 0.25, %v114_v21 }
  0xea   :  { %v117_v23 = vsub.f32 %v106_v14, %v116_v22 }
  0xec   :  { %v118_v24 = vmul.f32 %v117_v23, %v117_v23  ;;  %v131_v35 = vmul.f32 %v3191_v34, %v117_v23  ;;  %v395_v23 = vld [vmem:[%s5028_s4 + $0x48] sm:$0xff] }
  0xee   :  { %v119_v25 = vsel %vm107_vm2, %v118_v24, 0.0  ;;  %v396_v24 = vld [vmem:[%s5028_s4 + $0x50] sm:$0x7] }
  0xef   :  { %v120_v26 = vrot.slane %v119_v25, 4 }
  0xf1   :  { %v121_v27 = vadd.f32 %v120_v26, %v119_v25  ;;  %v3762_v25 = vpack.c.bf16 %v396_v24, %v395_v23 }
  0xf3   :  { %v122_v28 = vrot.slane %v121_v27, 2 }
  0xf5   :  { %v123_v29 = vadd.f32 %v122_v28, %v121_v27 }
  0xf7   :  { %v124_v30 = vrot.slane %v123_v29, 1 }
  0xf9   :  { %v125_v31 = vadd.f32 %v124_v30, %v123_v29 }
  0xfb   :  { %v126_v32 = vmul.f32 0.25, %v125_v31 }
  0xfd   :  { %v132_v33 = vadd.f32 1e-05, %v126_v32 }
  0xff   :  { %3968 = vrsqrt.f32 %v132_v33 }
 0x109   :  { %v3969_v36 = vpop.eup %3968 }
 0x10a   :  { %v134_v38 = vmul.f32 %v3969_v36, %v131_v35 }
 0x10c   :  { %v139_v39 = vadd.f32 %v3192_v37, %v134_v38  ;;  %v514_v37 = vld [vmem:[%s5028_s4 + $0x58] sm:$0xff]  ;;  %v515_v38 = vld [vmem:[%s5028_s4 + $0x60] sm:$0xff] }
 0x10e   :  { %3437 = vmatmul.mubr.msk.f32.vlgmr.msra.gmra.mrb[0].mxu1 %vm151_vm3, %v139_v39  ;;  %v3766_v39 = vpack.c.bf16 %v515_v38, %v514_v37 }
 0x10f   :  { %3454 = vmatprep.mubr.msk.f32.mxu1 %vm4083_vm1, %v4082_v0  ;;  %3764 = vmatpush3.bf16.msk.msra.mxu1 %vm3763_vm8, %v3762_v25  ;;  %vm730_vm8 = vcmask 1043456  }
 0x110   :  { %3771 = vmatprep.subr.bf16.mxu1 %v4084_v6 }
 0x1e1   :  { %v221_v47 = vpop.f32.mrb[0].mxu1 }
 0x1e2   :  { %v222_v48 = vadd.f32 %v3193_v46, %v221_v47  ;;  %v3438_v49 = vpop.f32.mrb[1].mxu1 }
 0x1e4   :  { %v225_v50 = vmax.f32 %v222_v48, 0.0 }
 0x1e6   :  { %v226_v51 = vsel %vm107_vm2, %v225_v50, 0.0 }
 0x1e7   :  { %v227_v52 = vrot.slane %v226_v51, 4 }
 0x1e9   :  { %v228_v53 = vadd.f32 %v227_v52, %v226_v51 }
 0x1eb   :  { %v229_v54 = vrot.slane %v228_v53, 2 }
 0x1ed   :  { %v230_v55 = vadd.f32 %v229_v54, %v228_v53 }
 0x1ef   :  { %v231_v56 = vrot.slane %v230_v55, 1 }
 0x1f1   :  { %v232_v57 = vadd.f32 %v231_v56, %v230_v55 }
 0x1f3   :  { %v233_v58 = vmul.f32 0.25, %v232_v57 }
 0x1f5   :  { %v234_v59 = vsub.f32 %v225_v50, %v233_v58 }
 0x1f7   :  { %v235_v60 = vmul.f32 %v234_v59, %v234_v59  ;;  %v248_v10 = vmul.f32 %v3195_v9, %v234_v59  ;;  %v3206_v9 = vld [vmem:[%s5030_s5 + $0x9] ss:$0 sm:$0xff] }
 0x1f9   :  { %v236_v61 = vsel %vm107_vm2, %v235_v60, 0.0 }
 0x1fa   :  { %v237_v62 = vrot.slane %v236_v61, 4 }
 0x1fc   :  { %v238_v63 = vadd.f32 %v237_v62, %v236_v61 }
 0x1fe   :  { %v239_v1 = vrot.slane %v238_v63, 2 }
 0x200   :  { %v240_v3 = vadd.f32 %v239_v1, %v238_v63 }
 0x202   :  { %v241_v4 = vrot.slane %v240_v3, 1 }
 0x204   :  { %v242_v5 = vadd.f32 %v241_v4, %v240_v3 }
 0x206   :  { %v243_v7 = vmul.f32 0.25, %v242_v5  ;;  %v3205_v5 = vld [vmem:[%s5030_s5 + $0x8] ss:$0 sm:$0xff] }
 0x208   :  { %v249_v8 = vadd.f32 1e-05, %v243_v7 }
 0x20a   :  { %3970 = vrsqrt.f32 %v249_v8 }
 0x214   :  { %v3971_v11 = vpop.eup %3970 }
 0x215   :  { %v251_v13 = vmul.f32 %v3971_v11, %v248_v10 }
 0x217   :  { %v256_v14 = vadd.f32 %v3196_v12, %v251_v13  ;;  %v630_v12 = vld [vmem:[%s5028_s4 + $0x78] sm:$0xff]  ;;  %v631_v13 = vld [vmem:[%s5028_s4 + $0x80] sm:$0xff] }
 0x219   :  { %3448 = vmatmul.mubr.msk.f32.vlgmr.msra.gmra.mrb[2].mxu0 %vm151_vm3, %v256_v14  ;;  %v3772_v14 = vpack.c.bf16 %v631_v13, %v630_v12 }
 0x21a   :  { %3465 = vmatprep.mubr.msk.f32.mxu0 %vm4083_vm1, %v4082_v0  ;;  %3767 = vmatpush3.bf16.msra.mxu0 %v3766_v39 }
 0x21b   :  { %3768 = vmatprep.subr.bf16.mxu0 %v4084_v6 }
 0x21e   :  { %3770 = vmatpush3.bf16.msra.mxu0 %v3769_v42 }
 0x2ec   :  { %v335_v17 = vpop.f32.mrb[2].mxu0 }
 0x2ed   :  { %v4214_v18 = vadd.f32 %v3197_v16, %v335_v17  ;;  %v3449_v19 = vpop.f32.mrb[3].mxu0  ;;  %v633_v16 = vld [vmem:[%s5028_s4 + $0x90] sm:$0xff] }
 0x2ee   :  { %v3207_v19 = vld [vmem:[%s5030_s5 + $0xa] ss:$0 sm:$0xff] }
 0x2ef   :  { %352 = vrot.lane.b32.xlu0 %v4214_v18, %s4086_s29 }
 0x2f3   :  { %356 = vrot.lane.b32.xlu0 %v4214_v18, %s4087_s30 }
 0x361   :  { %v353_v20 = vpop.permute.xlu0 %352 }
 0x362   :  { %vm355_vm4 = vcmp.ge.f32.partialorder %v4214_v18, %v353_v20 }
 0x363   :  { %v362_v21 = vsel %vm355_vm4, 1, %v4085_v15  ;;  %v632_v15 = vld [vmem:[%s5028_s4 + $0x88] sm:$0xff] }
 0x364   :  { %363 = vrot.lane.b32.xlu1 %v362_v21, %s4086_s29  ;;  %v3775_v17 = vpack.c.bf16 %v633_v16, %v632_v15 }
 0x365   :  { %v357_v22 = vpop.permute.xlu0 %356 }
 0x366   :  { %vm359_vm6 = vcmp.ge.f32.partialorder %v4214_v18, %v357_v22 }
 0x367   :  { %vm4229_vm9 = vmand %vm355_vm4, %vm359_vm6  ;;  %vm385_vm4 = vcmask 15360   ;;  %vm839_vm6 = vcmask 1044480  }
 0x368   :  { %vm361_vm11 = vmxor %vm4229_vm9, %vm4088_vm7  ;;  %v3199_v30 = vsel %vm4229_vm9, 1.0, %v4082_v0 }
 0x3d6   :  { %v364_v27 = vpop.permute.xlu1 %363 }
 0x3d7   :  { %vm365_vm10 = vcmp.ne.s32.totalorder %v364_v27, 0 }
 0x3d8   :  { %vm366_vm12 = vmand %vm361_vm11, %vm365_vm10 }
 0x3d9   :  { %v3200_v28 = vsel %vm366_vm12, 1.0, %v4082_v0  ;;  %vm367_vm13 = vmor %vm4229_vm9, %vm366_vm12  ;;  %vm835_vm9 = vcmask 39936  }
 0x3da   :  { %376 = vrot.lane.b32.xlu1 %v3200_v28, %s4089_s11  ;;  %vm368_vm14 = vmxor %vm367_vm13, %vm4088_vm7  ;;  %vm724_vm7 = vcmask 23552   ;;  %vm1079_vm13 = vcmask 523264  }
 0x3db   :  { %v3201_v29 = vsel %vm368_vm14, 1.0, %v4082_v0  ;;  %vm2851_vm14 = vcmask 19472  }
 0x3dc   :  { %380 = vrot.lane.b32.xlu0 %v3201_v29, %s4090_s12 }
 0x3de   :  { %387 = vrot.lane.b32.xlu1 %v4145_v2, %s4091_s13 }
 0x44c   :  { %v377_v31 = vpop.permute.xlu1 %376 }
 0x44d   :  { %v384_v32 = vsel %vm383_vm15, %v3199_v30, %v377_v31 }
 0x44e   :  { %v381_v33 = vpop.permute.xlu0 %380 }
 0x44f   :  { %v4247_v34 = vsel %vm385_vm4, %v384_v32, %v381_v33 }
 0x450   :  { %391 = vrot.lane.b32.xlu0 %v4247_v34, %s4092_s14  ;;  %v388_v35 = vpop.permute.xlu1 %387  ;;  %s4098_s14 = smov 5  }
 0x4c2   :  { %v392_v36 = vpop.permute.xlu0 %391 }
 0x4c3   :  { %v394_v2 = vsel %vm32_vm0, %v388_v35, %v392_v36 }
 0x4c4   :  { %3455 = vmatmul.mubr.msk.f32.vlgmr.msra.gmra.mrb[2].mxu1 %vm404_vm5, %v394_v2 }
 0x4c5   :  { %3476 = vmatprep.mubr.msk.f32.mxu1 %vm4083_vm1, %v4082_v0  ;;  %3773 = vmatpush3.bf16.msra.mxu1 %v3772_v14 }
 0x4c6   :  { %3774 = vmatprep.subr.bf16.mxu1 %v4084_v6 }
 0x4c9   :  { %3776 = vmatpush3.bf16.msra.mxu1 %v3775_v17  ;;  %v3223_v17 = vld [vmem:[%s5031_s3 + $0x30] ss:$0 sm:$0xff] }
 0x4ca   :  { %3777 = vmatprep.subr.bf16.mxu1 %v4084_v6 }
 0x597   :  { %v478_v44 = vpop.f32.mrb[2].mxu1 }
 0x598   :  { %v479_v45 = vadd.f32 %v3202_v43, %v478_v44  ;;  %v3456_v46 = vpop.f32.mrb[3].mxu1  ;;  %v3209_v43 = vld [vmem:[%s5030_s5 + $0xb] ss:$0 sm:$0xff] }
 0x599   :  { %v3210_v46 = vld [vmem:[%s5030_s5 + $0xc] ss:$0 sm:$0xff] }
 0x59a   :  { %v482_v47 = vmax.f32 %v479_v45, 0.0 }
 0x59c   :  { %v483_v48 = vsel %vm107_vm2, %v482_v47, 0.0 }
 0x59d   :  { %v484_v49 = vrot.slane %v483_v48, 4 }
 0x59f   :  { %v485_v50 = vadd.f32 %v484_v49, %v483_v48  ;;  %v737_v49 = vld [vmem:[%s5031_s3 + $0x5] sm:$0xff] }
 0x5a0   :  { %3479 = vmatprep.subr.mxu0 %v737_v49 }
 0x5a1   :  { %v486_v51 = vrot.slane %v485_v50, 2 }
 0x5a3   :  { %v487_v52 = vadd.f32 %v486_v51, %v485_v50  ;;  %v733_v50 = vld [vmem:[%s5032_s1] sm:$0xff] }
 0x5a4   :  { %v732_v51 = vld [vmem:[%s5031_s3] sm:$0x1f] }
 0x5a5   :  { %v488_v53 = vrot.slane %v487_v52, 1 }
 0x5a7   :  { %v489_v54 = vadd.f32 %v488_v53, %v487_v52  ;;  %v734_v52 = vld [vmem:[%s5032_s1 + $0x8] sm:$0xff] }
 0x5a8   :  { %v3211_v53 = vld [vmem:[%s5030_s5 + $0xd] ss:$0 sm:$0xff] }
 0x5a9   :  { %v490_v55 = vmul.f32 0.25, %v489_v54 }
 0x5ab   :  { %v491_v56 = vsub.f32 %v482_v47, %v490_v55 }
 0x5ad   :  { %v492_v57 = vmul.f32 %v491_v56, %v491_v56  ;;  %v505_v7 = vmul.f32 %v3205_v5, %v491_v56 }
 0x5af   :  { %v493_v58 = vsel %vm107_vm2, %v492_v57, 0.0 }
 0x5b0   :  { %v494_v59 = vrot.slane %v493_v58, 4 }
 0x5b2   :  { %v495_v60 = vadd.f32 %v494_v59, %v493_v58 }
 0x5b4   :  { %v496_v61 = vrot.slane %v495_v60, 2 }
 0x5b6   :  { %v497_v62 = vadd.f32 %v496_v61, %v495_v60  ;;  %v735_v60 = vld [vmem:[%s5032_s1 + $0x10] sm:$0xff]  ;;  %v736_v61 = vld [vmem:[%s5032_s1 + $0x18] sm:$0xff] }
 0x5b8   :  { %v498_v63 = vrot.slane %v497_v62, 1 }
 0x5ba   :  { %v499_v1 = vadd.f32 %v498_v63, %v497_v62  ;;  %v941_v62 = vld [vmem:[%s5031_s3 + $0x10] sm:$0xff]  ;;  %v942_v63 = vld [vmem:[%s5031_s3 + $0x18] sm:$0xff] }
 0x5bc   :  { %v500_v3 = vmul.f32 0.25, %v499_v1  ;;  %v4338_v1 = vpack.c.bf16 %v942_v63, %v941_v62 }
 0x5be   :  { %v506_v4 = vadd.f32 1e-05, %v500_v3  ;;  %v943_v3 = vld [vmem:[%s5031_s3 + $0x20] sm:$0xff] }
 0x5c0   :  { %3972 = vrsqrt.f32 %v506_v4  ;;  %v944_v4 = vld [vmem:[%s5031_s3 + $0x28] sm:$0xff] }
 0x5ca   :  { %v3973_v8 = vpop.eup %3972 }
 0x5cb   :  { %v508_v10 = vmul.f32 %v3973_v8, %v505_v7  ;;  %v4348_v7 = vpack.c.bf16 %v944_v4, %v943_v3 }
 0x5cd   :  { %v513_v11 = vadd.f32 %v3206_v9, %v508_v10  ;;  %v959_v10 = vld [vmem:[%s5033_s2] sm:$0xf] }
 0x5cf   :  { %3466 = vmatmul.mubr.msk.f32.vlgmr.msra.gmra.mrb[4].mxu0 %vm151_vm3, %v513_v11  ;;  %v3225_v11 = vld [vmem:[%s5033_s2 + $0x8] sm:$0xf] }
 0x5d0   :  { %3481 = vmatprep.mubr.msk.f32.mxu0 %vm32_vm0, %v733_v50  ;;  %3480 = vmatpush3.msra.mxu0 %v737_v49  ;;  %v950_v49 = vld [vmem:[%s5031_s3 + $0x60] sm:$0xff] }
 0x5d1   :  { %3487 = vmatprep.subr.msk.mxu0 %vm839_vm6, %v732_v51 }
 0x5d3   :  { %3482 = vmatmul.mubr.msk.f32.vlgmr.msra.gmra.mrb[6].mxu0 %vm32_vm0, %v734_v52  ;;  %v952_v52 = vld [vmem:[%s5031_s3 + $0x70] sm:$0xff] }
 0x5d4   :  { %3488 = vmatpush3.msk.msra.mxu0 %vm839_vm6, %v732_v51  ;;  %3484 = vmatprep.mubr.msk.f32.mxu0 %vm32_vm0, %v735_v60  ;;  %v951_v51 = vld [vmem:[%s5031_s3 + $0x68] sm:$0xff] }
 0x5d5   :  { %3795 = vmatprep.subr.bf16.mxu0 %v4084_v6 }
 0x5d7   :  { %3485 = vmatmul.mubr.msk.f32.gmra.mrb[8].mxu0 %vm32_vm0, %v736_v61  ;;  %v4461_v61 = vld [vmem:[%s5031_s3 + $0x78] ss:$0 sm:$0xff] }
 0x6a2   :  { %v594_v20 = vpop.f32.mrb[4].mxu0 }
 0x6a3   :  { %v595_v21 = vadd.f32 %v3207_v19, %v594_v20  ;;  %v3467_v22 = vpop.f32.mrb[5].mxu0 }
 0x6a5   :  { %v598_v23 = vmax.f32 %v595_v21, 0.0 }
 0x6a7   :  { %v599_v24 = vsel %vm107_vm2, %v598_v23, 0.0 }
 0x6a8   :  { %v600_v25 = vrot.slane %v599_v24, 4 }
 0x6aa   :  { %v601_v26 = vadd.f32 %v600_v25, %v599_v24 }
 0x6ac   :  { %v602_v27 = vrot.slane %v601_v26, 2 }
 0x6ae   :  { %v603_v28 = vadd.f32 %v602_v27, %v601_v26 }
 0x6b0   :  { %v604_v29 = vrot.slane %v603_v28, 1 }
 0x6b2   :  { %v605_v30 = vadd.f32 %v604_v29, %v603_v28  ;;  %v954_v29 = vlaneseq }
 0x6b4   :  { %v606_v31 = vmul.f32 0.25, %v605_v30  ;;  %v955_v30 = vand.u32 127, %v954_v29 }
 0x6b6   :  { %v607_v32 = vsub.f32 %v598_v23, %v606_v31  ;;  %vm956_vm10 = vcmp.ge.s32.totalorder %v955_v30, 64  ;;  %vm957_vm11 = vcmp.lt.s32.totalorder %v955_v30, 96 }
 0x6b7   :  { %vm4382_vm12 = vmand %vm956_vm10, %vm957_vm11 }
 0x6b8   :  { %v608_v33 = vmul.f32 %v607_v32, %v607_v32  ;;  %v621_v44 = vmul.f32 %v3209_v43, %v607_v32  ;;  %v946_v43 = vld [vmem:[%s5031_s3 + $0x40] sm:$0xff] }
 0x6ba   :  { %v609_v35 = vsel %vm107_vm2, %v608_v33, 0.0 }
 0x6bb   :  { %v610_v36 = vrot.slane %v609_v35, 4 }
 0x6bd   :  { %v611_v2 = vadd.f32 %v610_v36, %v609_v35 }
 0x6bf   :  { %v612_v37 = vrot.slane %v611_v2, 2 }
 0x6c1   :  { %v613_v38 = vadd.f32 %v612_v37, %v611_v2 }
 0x6c3   :  { %v614_v39 = vrot.slane %v613_v38, 1 }
 0x6c5   :  { %v615_v40 = vadd.f32 %v614_v39, %v613_v38 }
 0x6c7   :  { %v616_v41 = vmul.f32 0.25, %v615_v40 }
 0x6c9   :  { %v622_v42 = vadd.f32 1e-05, %v616_v41 }
 0x6cb   :  { %3974 = vrsqrt.f32 %v622_v42  ;;  %v945_v42 = vld [vmem:[%s5031_s3 + $0x38] sm:$0xff] }
 0x6d5   :  { %v3975_v45 = vpop.eup %3974 }
 0x6d6   :  { %v624_v47 = vmul.f32 %v3975_v45, %v621_v44  ;;  %v947_v44 = vld [vmem:[%s5031_s3 + $0x48] sm:$0xff]  ;;  %v4402_v45 = vpack.c.bf16 %v946_v43, %v945_v42 }
 0x6d8   :  { %v629_v48 = vadd.f32 %v3210_v46, %v624_v47  ;;  %v948_v46 = vld [vmem:[%s5031_s3 + $0x50] sm:$0xff] }
 0x6d9   :  { %v4408_v47 = vpack.c.bf16 %v948_v46, %v947_v44 }
 0x6da   :  { %3477 = vmatmul.mubr.msk.f32.vlgmr.msra.gmra.mrb[4].mxu1 %vm151_vm3, %v629_v48  ;;  %v949_v48 = vld [vmem:[%s5031_s3 + $0x58] sm:$0xff] }
 0x6db   :  { %3503 = vmatprep.mubr.msk.f32.mxu1 %vm4083_vm1, %v4082_v0  ;;  %3779 = vmatpush3.bf16.msra.mxu1 %v4338_v1  ;;  %v4418_v50 = vpack.c.bf16 %v950_v49, %v949_v48 }
 0x6dc   :  { %3780 = vmatprep.subr.bf16.mxu1 %v4084_v6 }
 0x6df   :  { %3782 = vmatpush3.bf16.msra.mxu1 %v4348_v7 }
 0x6e0   :  { %3783 = vmatprep.subr.bf16.mxu1 %v4084_v6 }
 0x6e2   :  { %3504 = vmatmul.mubr.msk.f32.vlgmr.msra.gmra.mrb[6].mxu1 %vm151_vm3, %v959_v10 }
 0x6e3   :  { %3522 = vmatprep.mubr.msk.f32.mxu1 %vm4083_vm1, %v4082_v0  ;;  %3785 = vmatpush3.bf16.msra.mxu1 %v4402_v45 }
 0x6e4   :  { %3786 = vmatprep.subr.bf16.mxu1 %v4084_v6 }
 0x6e7   :  { %3788 = vmatpush3.bf16.msra.mxu1 %v4408_v47 }
 0x6e8   :  { %3789 = vmatprep.subr.bf16.mxu1 %v4084_v6 }
 0x6eb   :  { %3791 = vmatpush3.bf16.msra.mxu1 %v4418_v50 }
 0x6ec   :  { %3792 = vmatprep.subr.bf16.mxu1 %v4084_v6 }
 0x7ad   :  { %v708_v54 = vpop.f32.mrb[4].mxu1 }
 0x7ae   :  { %v709_v55 = vadd.f32 %v3211_v53, %v708_v54  ;;  %v3478_v56 = vpop.f32.mrb[5].mxu1  ;;  %v4429_v54 = vpack.c.bf16 %v952_v52, %v951_v51 }
 0x7b0   :  { %v3213_v57 = vmul.f32 -1.442695, %v709_v55  ;;  %3794 = vmatpush3.bf16.msra.mxu1 %v4429_v54 }
 0x7b1   :  { %3813 = vmatprep.subr.bf16.mxu1 %v4084_v6 }
 0x7b2   :  { %3976 = vpow2.f32 %v3213_v57 }
 0x7b3   :  { %3978 = vtanh.f32 %v709_v55  ;;  %v3224_v55 = vld [vmem:[%s5033_s2 + $0x4] sm:$0xf] }
 0x7bc   :  { %v3977_v58 = vpop.eup %3976 }
 0x7bd   :  { %v715_v59 = vadd.f32 1.0, %v3977_v58  ;;  %v3979_v5 = vpop.eup %3978 }
 0x7bf   :  { %3980 = vrcp.f32 %v715_v59 }
 0x7c9   :  { %v3981_v8 = vpop.eup %3980 }
 0x7ca   :  { %v719_v9 = vsel %vm383_vm15, %v3981_v8, %v3979_v5 }
 0x7cb   :  { %721 = vrot.lane.b32.xlu1 %v719_v9, %s4093_s22 }
 0x7cf   :  { %1046 = vrot.lane.b32.xlu1 %v3225_v11, %s4094_s25 }
 0x83d   :  { %v4363_v12 = vpop.permute.xlu1 %721 }
 0x83e   :  { %v726_v13 = vsel %vm724_vm7, %v4247_v34, %v4363_v12  ;;  %v1036_v34 = vpop.f32.mrb[6].mxu1 }
 0x83f   :  { %v728_v14 = vrot.slane %v726_v13, 4  ;;  %v3505_v16 = vpop.f32.mrb[7].mxu1 }
 0x841   :  { %v731_v15 = vsel %vm730_vm8, %v726_v13, %v728_v14  ;;  %v1047_v38 = vpop.permute.xlu1 %1046 }
 0x842   :  { %3489 = vmatprep.mubr.msk.f32.mxu0 %vm835_vm9, %v731_v15 }
 0x843   :  { %3490 = vmatmul.mubr.msk.f32.vlgmr.msra.gmra.mrb[6].mxu0 %vm835_vm9, %v731_v15 }
 0x844   :  { %3492 = vmatprep.mubr.msk.f32.mxu0 %vm835_vm9, %v731_v15  ;;  %3797 = vmatpush3.bf16.msra.mxu0 %v4338_v1 }
 0x845   :  { %3798 = vmatprep.subr.bf16.mxu0 %v4084_v6 }
 0x847   :  { %3493 = vmatmul.mubr.msk.f32.gmra.mrb[8].mxu0 %vm835_vm9, %v731_v15 }
 0x848   :  { %3800 = vmatpush3.bf16.msra.mxu0 %v4348_v7  ;;  %3533 = vmatprep.mubr.msk.f32.mxu0 %vm4083_vm1, %v4082_v0 }
 0x849   :  { %3801 = vmatprep.subr.bf16.mxu0 %v4084_v6 }
 0x916   :  { %v3491_v19 = vpop.f32.mrb[6].mxu0 }
 0x917   :  { %v934_v20 = vadd.f32 %v3491_v19, %v3223_v17  ;;  %v909_v21 = vpop.f32.mrb[7].mxu0  ;;  %v3226_v19 = vld [vmem:[%s5033_s2 + $0xc] sm:$0xf] }
 0x918   :  { %v933_v22 = vadd.f32 %v3223_v17, %v909_v21 }
 0x919   :  { %938 = vst [vmem:[#allocation2 + $0x8] sm:$0xff] %v934_v20 }
 0x91a   :  { %937 = vst [vmem:[#allocation2] sm:$0xff] %v933_v22  ;;  %v3494_v23 = vpop.f32.mrb[8].mxu0 }
 0x91b   :  { %v936_v24 = vadd.f32 %v3494_v23, %v3223_v17  ;;  %v919_v25 = vpop.f32.mrb[9].mxu0 }
 0x91c   :  { %v935_v26 = vadd.f32 %v3223_v17, %v919_v25 }
 0x91d   :  { %940 = vst [vmem:[#allocation2 + $0x18] sm:$0xff] %v936_v24 }
 0x91e   :  { %939 = vst [vmem:[#allocation2 + $0x10] sm:$0xff] %v935_v26 }
 0x921   :  { %v966_v27 = vld [vmem:[#allocation2] sm:$0xf]  ;;  %v1183_v62 = vld [vmem:[#allocation2 + $0x4] sm:$0xf] }
 0x922   :  { %v1040_v28 = vadd.f32 %v1036_v34, %v966_v27 }
 0x924   :  { %3982 = vtanh.f32 %v1040_v28 }
 0x92e   :  { %v3983_v31 = vpop.eup %3982 }
 0x92f   :  { %v1042_v32 = vmul.f32 0.5, %v3983_v31 }
 0x931   :  { %v1043_v35 = vadd.f32 0.5, %v1042_v32 }
 0x933   :  { %v1044_v36 = vsel %vm4382_vm12, %v3983_v31, %v1043_v35 }
 0x934   :  { %1051 = vrot.lane.b32.xlu0 %v1044_v36, %s4095_s28  ;;  %v1049_v39 = vmul.f32 %v1047_v38, %v1044_v36 }
 0x9a6   :  { %v1052_v2 = vpop.permute.xlu0 %1051 }
 0x9a7   :  { %v1054_v37 = vmul.f32 %v1052_v2, %v1044_v36 }
 0x9a9   :  { %1056 = vrot.lane.b32.xlu0 %v1054_v37, %s4094_s25 }
 0xa1b   :  { %v1057_v40 = vpop.permute.xlu0 %1056 }
 0xa1c   :  { %v4390_v41 = vadd.f32 %v1057_v40, %v1049_v39 }
 0xa1e   :  { %3984 = vtanh.f32 %v4390_v41 }
 0xa28   :  { %v3985_v53 = vpop.eup %3984 }
 0xa29   :  { %1062 = vrot.lane.b32.xlu1 %v3985_v53, %s4095_s28 }
 0xa2d   :  { %1071 = vrot.lane.b32.xlu1 %v3224_v55, %s4094_s25 }
 0xa9b   :  { %v1063_v56 = vpop.permute.xlu1 %1062 }
 0xa9c   :  { %v1065_v57 = vmul.f32 %v1063_v56, %v1044_v36 }
 0xa9e   :  { %1067 = vrot.lane.b32.xlu0 %v1065_v57, %s4094_s25 }
 0xa9f   :  { %v1072_v58 = vpop.permute.xlu1 %1071 }
 0xb10   :  { %v1068_v59 = vpop.permute.xlu0 %1067 }
 0xb11   :  { %v1074_v60 = vsel %vm151_vm3, %v1068_v59, %v1072_v58  ;;  %3534 = vmatmul.mubr.msk.f32.vlgmr.msra.gmra.mrb[10].mxu0 %vm151_vm3, %v1068_v59 }
 0xb12   :  { %3523 = vmatmul.mubr.msk.f32.vlgmr.msra.gmra.mrb[8].mxu1 %vm1079_vm13, %v1074_v60  ;;  %3803 = vmatpush3.bf16.msra.mxu0 %v4402_v45 }
 0xb13   :  { %3804 = vmatprep.subr.bf16.mxu0 %v4084_v6  ;;  %3815 = vmatpush3.bf16.msra.mxu1 %v4338_v1 }
 0xb14   :  { %3816 = vmatprep.subr.bf16.mxu1 %v4084_v6  ;;  %3563 = vmatprep.mubr.msk.f32.mxu1 %vm4083_vm1, %v4082_v0 }
 0xb15   :  { %3552 = vmatprep.mubr.msk.f32.mxu0 %vm4083_vm1, %v4082_v0 }
 0xb16   :  { %3806 = vmatpush3.bf16.msra.mxu0 %v4408_v47 }
 0xb17   :  { %3807 = vmatprep.subr.bf16.mxu0 %v4084_v6  ;;  %3818 = vmatpush3.bf16.msra.mxu1 %v4348_v7 }
 0xb18   :  { %3819 = vmatprep.subr.bf16.mxu1 %v4084_v6 }
 0xb1a   :  { %3809 = vmatpush3.bf16.msra.mxu0 %v4418_v50 }
 0xb1b   :  { %3810 = vmatprep.subr.bf16.mxu0 %v4084_v6 }
 0xb1e   :  { %3812 = vmatpush3.bf16.msra.mxu0 %v4429_v54 }
 0xb1f   :  { %3831 = vmatprep.subr.bf16.mxu0 %v4084_v6 }
 0xbe4   :  { %v1252_v63 = vpop.f32.mrb[10].mxu0 }
 0xbe5   :  { %v1256_v3 = vadd.f32 %v1252_v63, %v1183_v62  ;;  %v1149_v4 = vpop.f32.mrb[8].mxu1  ;;  %v3535_v5 = vpop.f32.mrb[11].mxu0 }
 0xbe6   :  { %v1150_v8 = vadd.f32 %v4461_v61, %v1149_v4  ;;  %v3524_v9 = vpop.f32.mrb[9].mxu1 }
 0xbe7   :  { %3986 = vtanh.f32 %v1256_v3 }
 0xbe8   :  { %3988 = vtanh.f32 %v1150_v8 }
 0xbf1   :  { %v3987_v10 = vpop.eup %3986 }
 0xbf2   :  { %v3989_v11 = vpop.eup %3988  ;;  %v1258_v13 = vmul.f32 0.5, %v3987_v10 }
 0xbf3   :  { %v1154_v14 = vmul.f32 0.5, %v3989_v11 }
 0xbf4   :  { %v1259_v15 = vadd.f32 0.5, %v1258_v13 }
 0xbf5   :  { %v1155_v34 = vadd.f32 0.5, %v1154_v14 }
 0xbf6   :  { %v1260_v16 = vsel %vm4382_vm12, %v3987_v10, %v1259_v15 }
 0xbf7   :  { %1263 = vrot.lane.b32.xlu1 %v1260_v16, %s4095_s28  ;;  %v1156_v17 = vsel %vm4382_vm12, %v3989_v11, %v1155_v34  ;;  %v1261_v25 = vmul.f32 %v1260_v16, %v4390_v41  ;;  %v1385_v41 = vld [vmem:[#allocation2 + $0x8] sm:$0xf] }
 0xbf8   :  { %1163 = vrot.lane.b32.xlu0 %v1156_v17, %s4095_s28 }
 0xbfc   :  { %1158 = vrot.lane.b32.xlu0 %v3226_v19, %s4094_s25 }
 0xc69   :  { %v1264_v20 = vpop.permute.xlu1 %1263 }
 0xc6a   :  { %v1266_v21 = vmul.f32 %v1264_v20, %v1260_v16  ;;  %v1164_v22 = vpop.permute.xlu0 %1163 }
 0xc6b   :  { %v1166_v23 = vmul.f32 %v1164_v22, %v1156_v17  ;;  %v1587_v22 = vld [vmem:[#allocation2 + $0xc] sm:$0xf] }
 0xc6c   :  { %1268 = vrot.lane.b32.xlu0 %v1266_v21, %s4094_s25 }
 0xc6d   :  { %1168 = vrot.lane.b32.xlu1 %v1166_v23, %s4094_s25 }
 0xc6e   :  { %v1159_v24 = vpop.permute.xlu0 %1158 }
 0xc6f   :  { %v1161_v26 = vmul.f32 %v1159_v24, %v1156_v17 }
 0xcde   :  { %v1269_v27 = vpop.permute.xlu0 %1268 }
 0xcdf   :  { %v1271_v28 = vadd.f32 %v1269_v27, %v1261_v25  ;;  %v1169_v29 = vpop.permute.xlu1 %1168 }
 0xce0   :  { %v1171_v30 = vadd.f32 %v1169_v29, %v1161_v26 }
 0xce1   :  { %3990 = vtanh.f32 %v1271_v28 }
 0xce2   :  { %3992 = vtanh.f32 %v1171_v30 }
 0xceb   :  { %v3991_v31 = vpop.eup %3990 }
 0xcec   :  { %v3993_v32 = vpop.eup %3992  ;;  %1274 = vrot.lane.b32.xlu0 %v3991_v31, %s4095_s28 }
 0xced   :  { %1174 = vrot.lane.b32.xlu1 %v3993_v32, %s4095_s28 }
 0xd5e   :  { %v1275_v35 = vpop.permute.xlu0 %1274 }
 0xd5f   :  { %v1277_v36 = vmul.f32 %v1275_v35, %v1260_v16  ;;  %v1175_v2 = vpop.permute.xlu1 %1174 }
 0xd60   :  { %v4479_v37 = vmul.f32 %v1175_v2, %v1156_v17 }
 0xd61   :  { %1279 = vrot.lane.b32.xlu1 %v1277_v36, %s4094_s25 }
 0xd62   :  { %1282 = vrot.lane.b32.xlu0 %v4479_v37, %s4095_s28 }
 0xdd3   :  { %v1280_v38 = vpop.permute.xlu1 %1279 }
 0xdd4   :  { %3564 = vmatmul.mubr.msk.f32.vlgmr.msra.gmra.mrb[10].mxu1 %vm151_vm3, %v1280_v38  ;;  %v1283_v39 = vpop.permute.xlu0 %1282 }
 0xdd5   :  { %v1285_v40 = vsel %vm151_vm3, %v1280_v38, %v1283_v39  ;;  %3821 = vmatpush3.bf16.msra.mxu1 %v4402_v45  ;;  %3582 = vmatprep.mubr.msk.f32.mxu1 %vm4083_vm1, %v4082_v0 }
 0xdd6   :  { %3553 = vmatmul.mubr.msk.f32.vlgmr.msra.gmra.mrb[12].mxu0 %vm1079_vm13, %v1285_v40  ;;  %3822 = vmatprep.subr.bf16.mxu1 %v4084_v6 }
 0xdd7   :  { %3833 = vmatpush3.bf16.msra.mxu0 %v4338_v1  ;;  %3593 = vmatprep.mubr.msk.f32.mxu0 %vm4083_vm1, %v4082_v0 }
 0xdd8   :  { %3834 = vmatprep.subr.bf16.mxu0 %v4084_v6 }
 0xdd9   :  { %3824 = vmatpush3.bf16.msra.mxu1 %v4408_v47 }
 0xdda   :  { %3825 = vmatprep.subr.bf16.mxu1 %v4084_v6 }
 0xddb   :  { %3836 = vmatpush3.bf16.msra.mxu0 %v4348_v7 }
 0xddc   :  { %3837 = vmatprep.subr.bf16.mxu0 %v4084_v6 }
 0xddd   :  { %3827 = vmatpush3.bf16.msra.mxu1 %v4418_v50 }
 0xdde   :  { %3828 = vmatprep.subr.bf16.mxu1 %v4084_v6 }
 0xde1   :  { %3830 = vmatpush3.bf16.msra.mxu1 %v4429_v54 }
 0xde2   :  { %3849 = vmatprep.subr.bf16.mxu1 %v4084_v6 }
 0xea7   :  { %v1454_v42 = vpop.f32.mrb[10].mxu1 }
 0xea8   :  { %v1458_v43 = vadd.f32 %v1454_v42, %v1385_v41  ;;  %v3565_v44 = vpop.f32.mrb[11].mxu1 }
 0xea9   :  { %v1355_v46 = vpop.f32.mrb[12].mxu0 }
 0xeaa   :  { %3994 = vtanh.f32 %v1458_v43  ;;  %v1356_v48 = vadd.f32 %v4461_v61, %v1355_v46  ;;  %v3554_v49 = vpop.f32.mrb[13].mxu0 }
 0xeac   :  { %3996 = vtanh.f32 %v1356_v48 }
 0xeb4   :  { %v3995_v51 = vpop.eup %3994 }
 0xeb5   :  { %v1460_v52 = vmul.f32 0.5, %v3995_v51 }
 0xeb6   :  { %v3997_v53 = vpop.eup %3996 }
 0xeb7   :  { %v1461_v55 = vadd.f32 0.5, %v1460_v52  ;;  %v1360_v56 = vmul.f32 0.5, %v3997_v53 }
 0xeb9   :  { %v1462_v57 = vsel %vm4382_vm12, %v3995_v51, %v1461_v55  ;;  %v1361_v58 = vadd.f32 0.5, %v1360_v56 }
 0xeba   :  { %1465 = vrot.lane.b32.xlu0 %v1462_v57, %s4095_s28  ;;  %v1463_v4 = vmul.f32 %v1462_v57, %v1271_v28 }
 0xebb   :  { %v1362_v59 = vsel %vm4382_vm12, %v3997_v53, %v1361_v58 }
 0xebc   :  { %1365 = vrot.lane.b32.xlu1 %v1362_v59, %s4095_s28  ;;  %v1363_v9 = vmul.f32 %v1362_v59, %v1171_v30 }
 0xf2c   :  { %v1466_v60 = vpop.permute.xlu0 %1465 }
 0xf2d   :  { %v1468_v62 = vmul.f32 %v1466_v60, %v1462_v57 }
 0xf2e   :  { %v1366_v63 = vpop.permute.xlu1 %1365 }
 0xf2f   :  { %v1368_v3 = vmul.f32 %v1366_v63, %v1362_v59  ;;  %1470 = vrot.lane.b32.xlu0 %v1468_v62, %s4094_s25  ;;  %v1789_v63 = vld [vmem:[#allocation2 + $0x10] sm:$0xf] }
 0xf31   :  { %1370 = vrot.lane.b32.xlu1 %v1368_v3, %s4094_s25 }
 0xfa1   :  { %v1471_v5 = vpop.permute.xlu0 %1470 }
 0xfa2   :  { %v1473_v8 = vadd.f32 %v1471_v5, %v1463_v4 }
 0xfa3   :  { %v1371_v10 = vpop.permute.xlu1 %1370 }
 0xfa4   :  { %3998 = vtanh.f32 %v1473_v8  ;;  %v1373_v11 = vadd.f32 %v1371_v10, %v1363_v9 }
 0xfa6   :  { %4000 = vtanh.f32 %v1373_v11 }
 0xfae   :  { %v3999_v13 = vpop.eup %3998 }
 0xfaf   :  { %1476 = vrot.lane.b32.xlu0 %v3999_v13, %s4095_s28 }
 0xfb0   :  { %v4001_v14 = vpop.eup %4000 }
 0xfb1   :  { %1376 = vrot.lane.b32.xlu1 %v4001_v14, %s4095_s28 }
0x1021   :  { %v1477_v15 = vpop.permute.xlu0 %1476 }
0x1022   :  { %v1479_v34 = vmul.f32 %v1477_v15, %v1462_v57 }
0x1023   :  { %v1377_v16 = vpop.permute.xlu1 %1376 }
0x1024   :  { %v4514_v17 = vmul.f32 %v1377_v16, %v1362_v59  ;;  %1481 = vrot.lane.b32.xlu1 %v1479_v34, %s4094_s25 }
0x1026   :  { %1484 = vrot.lane.b32.xlu0 %v4514_v17, %s4095_s28 }
0x1096   :  { %v1482_v19 = vpop.permute.xlu1 %1481 }
0x1097   :  { %3594 = vmatmul.mubr.msk.f32.vlgmr.msra.gmra.mrb[14].mxu0 %vm151_vm3, %v1482_v19 }
0x1098   :  { %v1485_v20 = vpop.permute.xlu0 %1484  ;;  %3839 = vmatpush3.bf16.msra.mxu0 %v4402_v45  ;;  %3612 = vmatprep.mubr.msk.f32.mxu0 %vm4083_vm1, %v4082_v0 }
0x1099   :  { %v1487_v21 = vsel %vm151_vm3, %v1482_v19, %v1485_v20  ;;  %3840 = vmatprep.subr.bf16.mxu0 %v4084_v6 }
0x109a   :  { %3583 = vmatmul.mubr.msk.f32.vlgmr.msra.gmra.mrb[12].mxu1 %vm1079_vm13, %v1487_v21 }
0x109b   :  { %3851 = vmatpush3.bf16.msra.mxu1 %v4338_v1  ;;  %3623 = vmatprep.mubr.msk.f32.mxu1 %vm4083_vm1, %v4082_v0 }
0x109c   :  { %3842 = vmatpush3.bf16.msra.mxu0 %v4408_v47  ;;  %3852 = vmatprep.subr.bf16.mxu1 %v4084_v6 }
0x109d   :  { %3843 = vmatprep.subr.bf16.mxu0 %v4084_v6 }
0x109f   :  { %3854 = vmatpush3.bf16.msra.mxu1 %v4348_v7 }
0x10a0   :  { %3845 = vmatpush3.bf16.msra.mxu0 %v4418_v50  ;;  %3855 = vmatprep.subr.bf16.mxu1 %v4084_v6 }
0x10a1   :  { %3846 = vmatprep.subr.bf16.mxu0 %v4084_v6 }
0x10a4   :  { %3848 = vmatpush3.bf16.msra.mxu0 %v4429_v54 }
0x10a5   :  { %3867 = vmatprep.subr.bf16.mxu0 %v4084_v6 }
0x116a   :  { %v1656_v23 = vpop.f32.mrb[14].mxu0 }
0x116b   :  { %v1660_v24 = vadd.f32 %v1656_v23, %v1587_v22  ;;  %v3595_v25 = vpop.f32.mrb[15].mxu0 }
0x116d   :  { %4002 = vtanh.f32 %v1660_v24  ;;  %v1557_v26 = vpop.f32.mrb[12].mxu1 }
0x116e   :  { %v1558_v27 = vadd.f32 %v4461_v61, %v1557_v26  ;;  %v3584_v28 = vpop.f32.mrb[13].mxu1 }
0x1170   :  { %4004 = vtanh.f32 %v1558_v27 }
0x1177   :  { %v4003_v29 = vpop.eup %4002 }
0x1178   :  { %v1662_v30 = vmul.f32 0.5, %v4003_v29 }
0x117a   :  { %v4005_v31 = vpop.eup %4004  ;;  %v1663_v32 = vadd.f32 0.5, %v1662_v30 }
0x117b   :  { %v1562_v35 = vmul.f32 0.5, %v4005_v31 }
0x117c   :  { %v1664_v36 = vsel %vm4382_vm12, %v4003_v29, %v1663_v32 }
0x117d   :  { %1667 = vrot.lane.b32.xlu0 %v1664_v36, %s4095_s28  ;;  %v1563_v2 = vadd.f32 0.5, %v1562_v35  ;;  %v1665_v43 = vmul.f32 %v1664_v36, %v1473_v8 }
0x117f   :  { %v1564_v38 = vsel %vm4382_vm12, %v4005_v31, %v1563_v2 }
0x1180   :  { %1567 = vrot.lane.b32.xlu1 %v1564_v38, %s4095_s28  ;;  %v1565_v48 = vmul.f32 %v1564_v38, %v1373_v11 }
0x11ef   :  { %v1668_v39 = vpop.permute.xlu0 %1667 }
0x11f0   :  { %v1670_v40 = vmul.f32 %v1668_v39, %v1664_v36 }
0x11f2   :  { %v1568_v41 = vpop.permute.xlu1 %1567  ;;  %1672 = vrot.lane.b32.xlu0 %v1670_v40, %s4094_s25 }
0x11f3   :  { %v1570_v42 = vmul.f32 %v1568_v41, %v1564_v38 }
0x11f5   :  { %1572 = vrot.lane.b32.xlu1 %v1570_v42, %s4094_s25  ;;  %v1991_v42 = vld [vmem:[#allocation2 + $0x14] sm:$0xf] }
0x1264   :  { %v1673_v44 = vpop.permute.xlu0 %1672 }
0x1265   :  { %v1675_v46 = vadd.f32 %v1673_v44, %v1665_v43 }
0x1267   :  { %4006 = vtanh.f32 %v1675_v46  ;;  %v1573_v49 = vpop.permute.xlu1 %1572 }
0x1268   :  { %v1575_v51 = vadd.f32 %v1573_v49, %v1565_v48 }
0x126a   :  { %4008 = vtanh.f32 %v1575_v51 }
0x1271   :  { %v4007_v52 = vpop.eup %4006 }
0x1272   :  { %1678 = vrot.lane.b32.xlu0 %v4007_v52, %s4095_s28 }
0x1274   :  { %v4009_v53 = vpop.eup %4008 }
0x1275   :  { %1578 = vrot.lane.b32.xlu1 %v4009_v53, %s4095_s28 }
0x12e4   :  { %v1679_v55 = vpop.permute.xlu0 %1678 }
0x12e5   :  { %v1681_v56 = vmul.f32 %v1679_v55, %v1664_v36 }
0x12e7   :  { %v1579_v57 = vpop.permute.xlu1 %1578  ;;  %1683 = vrot.lane.b32.xlu1 %v1681_v56, %s4094_s25 }
0x12e8   :  { %v4550_v58 = vmul.f32 %v1579_v57, %v1564_v38 }
0x12ea   :  { %1686 = vrot.lane.b32.xlu0 %v4550_v58, %s4095_s28 }
0x1359   :  { %v1684_v59 = vpop.permute.xlu1 %1683 }
0x135a   :  { %3624 = vmatmul.mubr.msk.f32.vlgmr.msra.gmra.mrb[14].mxu1 %vm151_vm3, %v1684_v59 }
0x135b   :  { %3857 = vmatpush3.bf16.msra.mxu1 %v4402_v45  ;;  %3642 = vmatprep.mubr.msk.f32.mxu1 %vm4083_vm1, %v4082_v0 }
0x135c   :  { %v1687_v60 = vpop.permute.xlu0 %1686  ;;  %3858 = vmatprep.subr.bf16.mxu1 %v4084_v6 }
0x135d   :  { %v1689_v62 = vsel %vm151_vm3, %v1684_v59, %v1687_v60 }
0x135e   :  { %3613 = vmatmul.mubr.msk.f32.vlgmr.msra.gmra.mrb[16].mxu0 %vm1079_vm13, %v1689_v62 }
0x135f   :  { %3869 = vmatpush3.bf16.msra.mxu0 %v4338_v1  ;;  %3860 = vmatpush3.bf16.msra.mxu1 %v4408_v47 }
0x1360   :  { %3870 = vmatprep.subr.bf16.mxu0 %v4084_v6  ;;  %3861 = vmatprep.subr.bf16.mxu1 %v4084_v6 }
0x1361   :  { %3653 = vmatprep.mubr.msk.f32.mxu0 %vm4083_vm1, %v4082_v0 }
0x1363   :  { %3872 = vmatpush3.bf16.msra.mxu0 %v4348_v7  ;;  %3863 = vmatpush3.bf16.msra.mxu1 %v4418_v50 }
0x1364   :  { %3864 = vmatprep.subr.bf16.mxu1 %v4084_v6  ;;  %3873 = vmatprep.subr.bf16.mxu0 %v4084_v6 }
0x1367   :  { %3866 = vmatpush3.bf16.msra.mxu1 %v4429_v54 }
0x1368   :  { %3885 = vmatprep.subr.bf16.mxu1 %v4084_v6 }
0x142d   :  { %v1858_v3 = vpop.f32.mrb[14].mxu1 }
0x142e   :  { %v1862_v4 = vadd.f32 %v1858_v3, %v1789_v63  ;;  %v3625_v5 = vpop.f32.mrb[15].mxu1 }
0x1430   :  { %4010 = vtanh.f32 %v1862_v4 }
0x1431   :  { %v1759_v8 = vpop.f32.mrb[16].mxu0 }
0x1432   :  { %v1760_v9 = vadd.f32 %v4461_v61, %v1759_v8  ;;  %v3614_v10 = vpop.f32.mrb[17].mxu0 }
0x1434   :  { %4012 = vtanh.f32 %v1760_v9 }
0x143a   :  { %v4011_v11 = vpop.eup %4010 }
0x143b   :  { %v1864_v13 = vmul.f32 0.5, %v4011_v11 }
0x143d   :  { %v1865_v14 = vadd.f32 0.5, %v1864_v13 }
0x143e   :  { %v4013_v15 = vpop.eup %4012 }
0x143f   :  { %v1866_v34 = vsel %vm4382_vm12, %v4011_v11, %v1865_v14  ;;  %v1764_v16 = vmul.f32 0.5, %v4013_v15 }
0x1440   :  { %1869 = vrot.lane.b32.xlu0 %v1866_v34, %s4095_s28  ;;  %v1867_v25 = vmul.f32 %v1866_v34, %v1675_v46 }
0x1441   :  { %v1765_v19 = vadd.f32 0.5, %v1764_v16 }
0x1443   :  { %v1766_v20 = vsel %vm4382_vm12, %v4013_v15, %v1765_v19 }
0x1444   :  { %1769 = vrot.lane.b32.xlu1 %v1766_v20, %s4095_s28  ;;  %v1767_v28 = vmul.f32 %v1766_v20, %v1575_v51 }
0x14b2   :  { %v1870_v21 = vpop.permute.xlu0 %1869 }
0x14b3   :  { %v1872_v22 = vmul.f32 %v1870_v21, %v1866_v34 }
0x14b5   :  { %1874 = vrot.lane.b32.xlu0 %v1872_v22, %s4094_s25 }
0x14b6   :  { %v1770_v23 = vpop.permute.xlu1 %1769 }
0x14b7   :  { %v1772_v24 = vmul.f32 %v1770_v23, %v1766_v20 }
0x14b9   :  { %1774 = vrot.lane.b32.xlu1 %v1772_v24, %s4094_s25 }
0x1527   :  { %v1875_v26 = vpop.permute.xlu0 %1874 }
0x1528   :  { %v1877_v27 = vadd.f32 %v1875_v26, %v1867_v25  ;;  %v2193_v25 = vld [vmem:[#allocation2 + $0x18] sm:$0xf] }
0x152a   :  { %4014 = vtanh.f32 %v1877_v27 }
0x152b   :  { %v1775_v29 = vpop.permute.xlu1 %1774 }
0x152c   :  { %v1777_v30 = vadd.f32 %v1775_v29, %v1767_v28 }
0x152e   :  { %4016 = vtanh.f32 %v1777_v30 }
0x1534   :  { %v4015_v31 = vpop.eup %4014 }
0x1535   :  { %1880 = vrot.lane.b32.xlu0 %v4015_v31, %s4095_s28 }
0x1538   :  { %v4017_v32 = vpop.eup %4016 }
0x1539   :  { %1780 = vrot.lane.b32.xlu1 %v4017_v32, %s4095_s28 }
0x15a7   :  { %v1881_v35 = vpop.permute.xlu0 %1880 }
0x15a8   :  { %v1883_v36 = vmul.f32 %v1881_v35, %v1866_v34 }
0x15aa   :  { %1885 = vrot.lane.b32.xlu1 %v1883_v36, %s4094_s25 }
0x15ab   :  { %v1781_v2 = vpop.permute.xlu1 %1780 }
0x15ac   :  { %v4585_v38 = vmul.f32 %v1781_v2, %v1766_v20 }
0x15ae   :  { %1888 = vrot.lane.b32.xlu0 %v4585_v38, %s4095_s28 }
0x161c   :  { %v1886_v39 = vpop.permute.xlu1 %1885 }
0x161d   :  { %3654 = vmatmul.mubr.msk.f32.vlgmr.msra.gmra.mrb[18].mxu0 %vm151_vm3, %v1886_v39 }
0x161e   :  { %3875 = vmatpush3.bf16.msra.mxu0 %v4402_v45  ;;  %3672 = vmatprep.mubr.msk.f32.mxu0 %vm4083_vm1, %v4082_v0 }
0x161f   :  { %3876 = vmatprep.subr.bf16.mxu0 %v4084_v6 }
0x1620   :  { %v1889_v40 = vpop.permute.xlu0 %1888 }
0x1621   :  { %v1891_v41 = vsel %vm151_vm3, %v1886_v39, %v1889_v40 }
0x1622   :  { %3643 = vmatmul.mubr.msk.f32.vlgmr.msra.gmra.mrb[16].mxu1 %vm1079_vm13, %v1891_v41  ;;  %3878 = vmatpush3.bf16.msra.mxu0 %v4408_v47 }
0x1623   :  { %3887 = vmatpush3.bf16.msra.mxu1 %v4338_v1  ;;  %3879 = vmatprep.subr.bf16.mxu0 %v4084_v6 }
0x1624   :  { %3888 = vmatprep.subr.bf16.mxu1 %v4084_v6  ;;  %3683 = vmatprep.mubr.msk.f32.mxu1 %vm4083_vm1, %v4082_v0 }
0x1626   :  { %3881 = vmatpush3.bf16.msra.mxu0 %v4418_v50 }
0x1627   :  { %3890 = vmatpush3.bf16.msra.mxu1 %v4348_v7  ;;  %3882 = vmatprep.subr.bf16.mxu0 %v4084_v6 }
0x1628   :  { %3891 = vmatprep.subr.bf16.mxu1 %v4084_v6 }
0x162a   :  { %3884 = vmatpush3.bf16.msra.mxu0 %v4429_v54 }
0x162b   :  { %3903 = vmatprep.subr.bf16.mxu0 %v4084_v6 }
0x16f0   :  { %v2060_v43 = vpop.f32.mrb[18].mxu0 }
0x16f1   :  { %v2064_v44 = vadd.f32 %v2060_v43, %v1991_v42  ;;  %v3655_v46 = vpop.f32.mrb[19].mxu0 }
0x16f3   :  { %4018 = vtanh.f32 %v2064_v44 }
0x16f5   :  { %v1961_v48 = vpop.f32.mrb[16].mxu1 }
0x16f6   :  { %v1962_v49 = vadd.f32 %v4461_v61, %v1961_v48  ;;  %v3644_v51 = vpop.f32.mrb[17].mxu1 }
0x16f8   :  { %4020 = vtanh.f32 %v1962_v49 }
0x16fd   :  { %v4019_v52 = vpop.eup %4018 }
0x16fe   :  { %v2066_v53 = vmul.f32 0.5, %v4019_v52 }
0x1700   :  { %v2067_v55 = vadd.f32 0.5, %v2066_v53 }
0x1702   :  { %v4021_v56 = vpop.eup %4020  ;;  %v2068_v57 = vsel %vm4382_vm12, %v4019_v52, %v2067_v55 }
0x1703   :  { %2071 = vrot.lane.b32.xlu0 %v2068_v57, %s4095_s28  ;;  %v1966_v59 = vmul.f32 0.5, %v4021_v56  ;;  %v2069_v8 = vmul.f32 %v2068_v57, %v1877_v27 }
0x1705   :  { %v1967_v60 = vadd.f32 0.5, %v1966_v59 }
0x1707   :  { %v1968_v62 = vsel %vm4382_vm12, %v4021_v56, %v1967_v60 }
0x1708   :  { %1971 = vrot.lane.b32.xlu1 %v1968_v62, %s4095_s28  ;;  %v1969_v11 = vmul.f32 %v1968_v62, %v1777_v30 }
0x1775   :  { %v2072_v63 = vpop.permute.xlu0 %2071 }
0x1776   :  { %v2074_v3 = vmul.f32 %v2072_v63, %v2068_v57 }
0x1778   :  { %2076 = vrot.lane.b32.xlu0 %v2074_v3, %s4094_s25 }
0x177a   :  { %v1972_v4 = vpop.permute.xlu1 %1971 }
0x177b   :  { %v1974_v5 = vmul.f32 %v1972_v4, %v1968_v62 }
0x177d   :  { %1976 = vrot.lane.b32.xlu1 %v1974_v5, %s4094_s25 }
0x17ea   :  { %v2077_v9 = vpop.permute.xlu0 %2076 }
0x17eb   :  { %v2079_v10 = vadd.f32 %v2077_v9, %v2069_v8 }
0x17ed   :  { %4022 = vtanh.f32 %v2079_v10 }
0x17ef   :  { %v1977_v13 = vpop.permute.xlu1 %1976 }
0x17f0   :  { %v1979_v14 = vadd.f32 %v1977_v13, %v1969_v11 }
0x17f2   :  { %4024 = vtanh.f32 %v1979_v14 }
0x17f7   :  { %v4023_v15 = vpop.eup %4022 }
0x17f8   :  { %2082 = vrot.lane.b32.xlu0 %v4023_v15, %s4095_s28 }
0x17fc   :  { %v4025_v34 = vpop.eup %4024 }
0x17fd   :  { %1982 = vrot.lane.b32.xlu1 %v4025_v34, %s4095_s28 }
0x186a   :  { %v2083_v16 = vpop.permute.xlu0 %2082 }
0x186b   :  { %v2085_v19 = vmul.f32 %v2083_v16, %v2068_v57 }
0x186d   :  { %2087 = vrot.lane.b32.xlu1 %v2085_v19, %s4094_s25 }
0x186f   :  { %v1983_v20 = vpop.permute.xlu1 %1982 }
0x1870   :  { %v4620_v21 = vmul.f32 %v1983_v20, %v1968_v62 }
0x1872   :  { %2090 = vrot.lane.b32.xlu0 %v4620_v21, %s4095_s28 }
0x18df   :  { %v2088_v22 = vpop.permute.xlu1 %2087 }
0x18e0   :  { %3684 = vmatmul.mubr.msk.f32.vlgmr.msra.gmra.mrb[18].mxu1 %vm151_vm3, %v2088_v22 }
0x18e1   :  { %3893 = vmatpush3.bf16.msra.mxu1 %v4402_v45  ;;  %3702 = vmatprep.mubr.msk.f32.mxu1 %vm4083_vm1, %v4082_v0 }
0x18e2   :  { %3894 = vmatprep.subr.bf16.mxu1 %v4084_v6 }
0x18e4   :  { %v2091_v23 = vpop.permute.xlu0 %2090 }
0x18e5   :  { %v2093_v24 = vsel %vm151_vm3, %v2088_v22, %v2091_v23  ;;  %3896 = vmatpush3.bf16.msra.mxu1 %v4408_v47 }
0x18e6   :  { %3673 = vmatmul.mubr.msk.f32.vlgmr.msra.gmra.mrb[20].mxu0 %vm1079_vm13, %v2093_v24  ;;  %3897 = vmatprep.subr.bf16.mxu1 %v4084_v6 }
0x18e7   :  { %3905 = vmatpush3.bf16.msra.mxu0 %v4338_v1  ;;  %3713 = vmatprep.mubr.msk.f32.mxu0 %vm4083_vm1, %v4082_v0 }
0x18e8   :  { %3906 = vmatprep.subr.bf16.mxu0 %v4084_v6 }
0x18e9   :  { %3899 = vmatpush3.bf16.msra.mxu1 %v4418_v50 }
0x18ea   :  { %3900 = vmatprep.subr.bf16.mxu1 %v4084_v6 }
0x18eb   :  { %3908 = vmatpush3.bf16.msra.mxu0 %v4348_v7 }
0x18ec   :  { %3909 = vmatprep.subr.bf16.mxu0 %v4084_v6 }
0x18ed   :  { %3902 = vmatpush3.bf16.msra.mxu1 %v4429_v54 }
0x19b3   :  { %v2262_v26 = vpop.f32.mrb[18].mxu1 }
0x19b4   :  { %v2266_v27 = vadd.f32 %v2262_v26, %v2193_v25  ;;  %v3685_v28 = vpop.f32.mrb[19].mxu1 }
0x19b6   :  { %4026 = vtanh.f32 %v2266_v27 }
0x19b9   :  { %v2163_v1 = vpop.f32.mrb[20].mxu0 }
0x19ba   :  { %v2164_v29 = vadd.f32 %v4461_v61, %v2163_v1  ;;  %v3674_v30 = vpop.f32.mrb[21].mxu0 }
0x19bc   :  { %4028 = vtanh.f32 %v2164_v29 }
0x19c0   :  { %v4027_v31 = vpop.eup %4026 }
0x19c1   :  { %v2268_v32 = vmul.f32 0.5, %v4027_v31 }
0x19c3   :  { %v2269_v35 = vadd.f32 0.5, %v2268_v32 }
0x19c5   :  { %v2270_v7 = vsel %vm4382_vm12, %v4027_v31, %v2269_v35 }
0x19c6   :  { %v4029_v36 = vpop.eup %4028  ;;  %2273 = vrot.lane.b32.xlu0 %v2270_v7, %s4095_s28  ;;  %v2271_v46 = vmul.f32 %v2270_v7, %v2079_v10 }
0x19c7   :  { %v2168_v2 = vmul.f32 0.5, %v4029_v36 }
0x19c9   :  { %v2169_v39 = vadd.f32 0.5, %v2168_v2 }
0x19cb   :  { %v2170_v40 = vsel %vm4382_vm12, %v4029_v36, %v2169_v39 }
0x19cc   :  { %2173 = vrot.lane.b32.xlu1 %v2170_v40, %s4095_s28  ;;  %v2171_v51 = vmul.f32 %v2170_v40, %v1979_v14 }
0x1a38   :  { %v2274_v41 = vpop.permute.xlu0 %2273 }
0x1a39   :  { %v2276_v42 = vmul.f32 %v2274_v41, %v2270_v7 }
0x1a3b   :  { %2278 = vrot.lane.b32.xlu0 %v2276_v42, %s4094_s25 }
0x1a3e   :  { %v2174_v43 = vpop.permute.xlu1 %2173 }
0x1a3f   :  { %v2176_v44 = vmul.f32 %v2174_v43, %v2170_v40 }
0x1a41   :  { %2178 = vrot.lane.b32.xlu1 %v2176_v44, %s4094_s25 }
0x1aad   :  { %v2279_v48 = vpop.permute.xlu0 %2278 }
0x1aae   :  { %v2281_v49 = vadd.f32 %v2279_v48, %v2271_v46 }
0x1ab0   :  { %4030 = vtanh.f32 %v2281_v49 }
0x1ab3   :  { %v2179_v52 = vpop.permute.xlu1 %2178 }
0x1ab4   :  { %v2181_v53 = vadd.f32 %v2179_v52, %v2171_v51 }
0x1ab6   :  { %4032 = vtanh.f32 %v2181_v53 }
0x1aba   :  { %v4031_v55 = vpop.eup %4030 }
0x1abb   :  { %2284 = vrot.lane.b32.xlu0 %v4031_v55, %s4095_s28  ;;  %v2601_v55 = vld [vmem:[%s5028_s4 + $0x98] sm:$0xff] }
0x1ac0   :  { %v4033_v56 = vpop.eup %4032 }
0x1ac1   :  { %2184 = vrot.lane.b32.xlu1 %v4033_v56, %s4095_s28 }
0x1b2d   :  { %v2285_v57 = vpop.permute.xlu0 %2284 }
0x1b2e   :  { %v2287_v59 = vmul.f32 %v2285_v57, %v2270_v7  ;;  %v2604_v57 = vld [vmem:[%s5028_s4 + $0xb0] sm:$0xff] }
0x1b30   :  { %2289 = vrot.lane.b32.xlu1 %v2287_v59, %s4094_s25 }
0x1b33   :  { %v2185_v60 = vpop.permute.xlu1 %2184 }
0x1b34   :  { %v4654_v62 = vmul.f32 %v2185_v60, %v2170_v40 }
0x1b36   :  { %2292 = vrot.lane.b32.xlu0 %v4654_v62, %s4095_s28 }
0x1ba2   :  { %v2290_v63 = vpop.permute.xlu1 %2289 }
0x1ba3   :  { %3714 = vmatmul.mubr.msk.f32.vlgmr.msra.gmra.mrb[22].mxu0 %vm151_vm3, %v2290_v63 }
0x1ba4   :  { %3911 = vmatpush3.bf16.msra.mxu0 %v4402_v45  ;;  %3732 = vmatprep.mubr.msk.f32.mxu0 %vm4083_vm1, %v4082_v0  ;;  %v2395_v45 = vld [vmem:[#allocation2 + $0x1c] sm:$0xf] }
0x1ba5   :  { %3912 = vmatprep.subr.bf16.mxu0 %v4084_v6 }
0x1ba8   :  { %v2293_v3 = vpop.permute.xlu0 %2292  ;;  %3914 = vmatpush3.bf16.msra.mxu0 %v4408_v47 }
0x1ba9   :  { %v2295_v4 = vsel %vm151_vm3, %v2290_v63, %v2293_v3  ;;  %3915 = vmatprep.subr.bf16.mxu0 %v4084_v6 }
0x1baa   :  { %3703 = vmatmul.mubr.msk.f32.vlgmr.msra.gmra.mrb[20].mxu1 %vm1079_vm13, %v2295_v4 }
0x1bac   :  { %3917 = vmatpush3.bf16.msra.mxu0 %v4418_v50 }
0x1bad   :  { %3918 = vmatprep.subr.bf16.mxu0 %v4084_v6 }
0x1bb0   :  { %3920 = vmatpush3.bf16.msra.mxu0 %v4429_v54 }
0x1c76   :  { %v2464_v5 = vpop.f32.mrb[22].mxu0 }
0x1c77   :  { %v2468_v8 = vadd.f32 %v2464_v5, %v2395_v45  ;;  %v3715_v9 = vpop.f32.mrb[23].mxu0 }
0x1c79   :  { %4034 = vtanh.f32 %v2468_v8 }
0x1c7d   :  { %v2365_v10 = vpop.f32.mrb[20].mxu1 }
0x1c7e   :  { %v2366_v47 = vadd.f32 %v4461_v61, %v2365_v10  ;;  %v3704_v11 = vpop.f32.mrb[21].mxu1 }
0x1c7f   :  { %v4732_v11 = vld [vmem:[%s5030_s5 + $0xe] ss:$0 sm:$0xff]  ;;  %s4096_s5 = smov 125  }
0x1c80   :  { %4036 = vtanh.f32 %v2366_v47 }
0x1c83   :  { %v4035_v13 = vpop.eup %4034 }
0x1c84   :  { %v2470_v14 = vmul.f32 0.5, %v4035_v13 }
0x1c86   :  { %v2471_v15 = vadd.f32 0.5, %v2470_v14 }
0x1c88   :  { %v2472_v50 = vsel %vm4382_vm12, %v4035_v13, %v2471_v15 }
0x1c89   :  { %2475 = vrot.lane.b32.xlu0 %v2472_v50, %s4095_s28  ;;  %v2473_v24 = vmul.f32 %v2472_v50, %v2281_v49 }
0x1c8a   :  { %v4037_v6 = vpop.eup %4036 }
0x1c8b   :  { %v2370_v54 = vmul.f32 0.5, %v4037_v6 }
0x1c8d   :  { %v2371_v34 = vadd.f32 0.5, %v2370_v54 }
0x1c8f   :  { %v2372_v16 = vsel %vm4382_vm12, %v4037_v6, %v2371_v34 }
0x1c90   :  { %2375 = vrot.lane.b32.xlu1 %v2372_v16, %s4095_s28  ;;  %v2373_v27 = vmul.f32 %v2372_v16, %v2181_v53 }
0x1cfb   :  { %v2476_v19 = vpop.permute.xlu0 %2475 }
0x1cfc   :  { %v2478_v20 = vmul.f32 %v2476_v19, %v2472_v50 }
0x1cfe   :  { %2480 = vrot.lane.b32.xlu0 %v2478_v20, %s4094_s25 }
0x1d02   :  { %v2376_v22 = vpop.permute.xlu1 %2375 }
0x1d03   :  { %v2378_v23 = vmul.f32 %v2376_v22, %v2372_v16 }
0x1d05   :  { %2380 = vrot.lane.b32.xlu1 %v2378_v23, %s4094_s25 }
0x1d70   :  { %v2481_v25 = vpop.permute.xlu0 %2480 }
0x1d71   :  { %v2483_v26 = vadd.f32 %v2481_v25, %v2473_v24 }
0x1d73   :  { %4038 = vtanh.f32 %v2483_v26 }
0x1d77   :  { %v2381_v28 = vpop.permute.xlu1 %2380 }
0x1d78   :  { %v2383_v1 = vadd.f32 %v2381_v28, %v2373_v27 }
0x1d7a   :  { %4040 = vtanh.f32 %v2383_v1 }
0x1d7d   :  { %v4039_v29 = vpop.eup %4038 }
0x1d7e   :  { %2486 = vrot.lane.b32.xlu0 %v4039_v29, %s4095_s28 }
0x1d84   :  { %v4041_v30 = vpop.eup %4040 }
0x1d85   :  { %2386 = vrot.lane.b32.xlu1 %v4041_v30, %s4095_s28 }
0x1df0   :  { %v2487_v31 = vpop.permute.xlu0 %2486 }
0x1df1   :  { %v2489_v32 = vmul.f32 %v2487_v31, %v2472_v50 }
0x1df3   :  { %2491 = vrot.lane.b32.xlu1 %v2489_v32, %s4094_s25 }
0x1df7   :  { %v2387_v35 = vpop.permute.xlu1 %2386 }
0x1df8   :  { %v2389_v7 = vmul.f32 %v2387_v35, %v2372_v16 }
0x1dfa   :  { %2494 = vrot.lane.b32.xlu0 %v2389_v7, %s4095_s28 }
0x1e65   :  { %v2492_v36 = vpop.permute.xlu1 %2491 }
0x1e6c   :  { %v2495_v2 = vpop.permute.xlu0 %2494 }
0x1e6d   :  { %v2497_v39 = vsel %vm151_vm3, %v2492_v36, %v2495_v2 }
0x1e6e   :  { %3733 = vmatmul.mubr.msk.f32.vlgmr.msra.gmra.mrb[24].mxu0 %vm1079_vm13, %v2497_v39 }
0x1f41   :  { %v2567_v40 = vpop.f32.mrb[24].mxu0 }
0x1f42   :  { %v2568_v41 = vadd.f32 %v4461_v61, %v2567_v40  ;;  %v3734_v42 = vpop.f32.mrb[25].mxu0 }
0x1f44   :  { %4042 = vtanh.f32 %v2568_v41 }
0x1f4e   :  { %v4043_v43 = vpop.eup %4042 }
0x1f4f   :  { %v2572_v44 = vmul.f32 0.5, %v4043_v43 }
0x1f51   :  { %v2573_v46 = vadd.f32 0.5, %v2572_v44 }
0x1f53   :  { %v2574_v48 = vsel %vm4382_vm12, %v4043_v43, %v2573_v46 }
0x1f54   :  { %2577 = vrot.lane.b32.xlu1 %v2574_v48, %s4095_s28  ;;  %v2575_v61 = vmul.f32 %v2574_v48, %v2383_v1 }
0x1fc6   :  { %v2578_v49 = vpop.permute.xlu1 %2577 }
0x1fc7   :  { %v2580_v51 = vmul.f32 %v2578_v49, %v2574_v48 }
0x1fc9   :  { %2582 = vrot.lane.b32.xlu0 %v2580_v51, %s4094_s25 }
0x1fcd   :  { %1179 = vrot.lane.b32.xlu0 %v4479_v37, %s4094_s25  ;;  %v2602_v37 = vld [vmem:[%s5028_s4 + $0xa0] sm:$0xff] }
0x1fd1   :  { %1583 = vrot.lane.b32.xlu0 %v4550_v58, %s4094_s25  ;;  %v3921_v58 = vpack.c.bf16 %v2602_v37, %v2601_v55 }
0x1fd3   :  { %3922 = vmatprep.subr.bf16.mxu1 %v3921_v58 }
0x1fd4   :  { %3924 = vmatpush3.bf16.msra.mxu1 %v3921_v58 }
0x1fd5   :  { %1987 = vrot.lane.b32.xlu0 %v4620_v21, %s4094_s25  ;;  %v2603_v21 = vld [vmem:[%s5028_s4 + $0xa8] sm:$0xff] }
0x1fd6   :  { %v3925_v59 = vpack.c.bf16 %v2604_v57, %v2603_v21 }
0x1fd8   :  { %3926 = vmatprep.subr.bf16.mxu1 %v3925_v59 }
0x1fd9   :  { %2391 = vrot.lane.b32.xlu0 %v2389_v7, %s4094_s25  ;;  %3928 = vmatpush3.bf16.msra.mxu1 %v3925_v59 }
0x203b   :  { %v2583_v33 = vpop.permute.xlu0 %2582 }
0x203c   :  { %v2585_v52 = vadd.f32 %v2583_v33, %v2575_v61 }
0x203e   :  { %4044 = vtanh.f32 %v2585_v52 }
0x203f   :  { %v1180_v53 = vpop.permute.xlu0 %1179 }
0x2040   :  { %1182 = vst.msk [vmem:[#allocation3] sm:$0xf] %vm107_vm2, %v1180_v53 }
0x2043   :  { %v1584_v56 = vpop.permute.xlu0 %1583 }
0x2044   :  { %1586 = vst.msk [vmem:[#allocation3 + $0x8] sm:$0xf] %vm107_vm2, %v1584_v56 }
0x2047   :  { %v1988_v60 = vpop.permute.xlu0 %1987 }
0x2048   :  { %v4045_v63 = vpop.eup %4044  ;;  %1990 = vst.msk [vmem:[#allocation3 + $0x10] sm:$0xf] %vm107_vm2, %v1988_v60 }
0x2049   :  { %2588 = vrot.lane.b32.xlu1 %v4045_v63, %s4095_s28  ;;  %s4097_s28 = smov 6  }
0x204b   :  { %v2392_v3 = vpop.permute.xlu0 %2391 }
0x204c   :  { %2394 = vst.msk [vmem:[#allocation3 + $0x18] sm:$0xf] %vm107_vm2, %v2392_v3 }
0x204d   :  { %1381 = vrot.lane.b32.xlu1 %v4514_v17, %s4094_s25 }
0x2051   :  { %1785 = vrot.lane.b32.xlu1 %v4585_v38, %s4094_s25 }
0x2055   :  { %2189 = vrot.lane.b32.xlu1 %v4654_v62, %s4094_s25 }
0x20bb   :  { %v2589_v4 = vpop.permute.xlu1 %2588 }
0x20bc   :  { %v2591_v45 = vmul.f32 %v2589_v4, %v2574_v48 }
0x20be   :  { %2593 = vrot.lane.b32.xlu1 %v2591_v45, %s4094_s25 }
0x20bf   :  { %v1382_v5 = vpop.permute.xlu1 %1381 }
0x20c0   :  { %1384 = vst.msk [vmem:[#allocation3 + $0x4] sm:$0xf] %vm107_vm2, %v1382_v5 }
0x20c3   :  { %v1786_v8 = vpop.permute.xlu1 %1785 }
0x20c4   :  { %1788 = vst.msk [vmem:[#allocation3 + $0xc] sm:$0xf] %vm107_vm2, %v1786_v8 }
0x20c7   :  { %v2190_v9 = vpop.permute.xlu1 %2189  ;;  %v2597_v10 = vld [vmem:[#allocation3] sm:$0xff] }
0x20c8   :  { %2192 = vst.msk [vmem:[#allocation3 + $0x14] sm:$0xf] %vm107_vm2, %v2190_v9  ;;  %3743 = vmatprep.mubr.msk.f32.mxu1 %vm151_vm3, %v2597_v10 }
0x20cb   :  { %v2598_v17 = vld [vmem:[#allocation3 + $0x8] sm:$0xff] }
0x20cc   :  { %3744 = vmatmul.mubr.msk.f32.vlgmr.msra.gmra.mrb[22].mxu1 %vm151_vm3, %v2598_v17 }
0x20cf   :  { %v2599_v38 = vld [vmem:[#allocation3 + $0x10] sm:$0xff] }
0x20d0   :  { %3746 = vmatprep.mubr.msk.f32.mxu1 %vm151_vm3, %v2599_v38 }
0x2130   :  { %v2594_v62 = vpop.permute.xlu1 %2593 }
0x2131   :  { %2596 = vst.msk [vmem:[#allocation3 + $0x1c] sm:$0xf] %vm107_vm2, %v2594_v62 }
0x2138   :  { %v2600_v47 = vld [vmem:[#allocation3 + $0x18] sm:$0xff] }
0x2139   :  { %3747 = vmatmul.mubr.msk.f32.gmra.mrb[24].mxu1 %vm151_vm3, %v2600_v47  ;;  %vm339_vm3 = vcmask 19456  }
0x213a   :  { %v340_v26 = vsel %vm339_vm3, %v4214_v18, -inf }
0x219f   :  { %v3745_v13 = vpop.f32.mrb[22].mxu1 }
0x21a0   :  { %v4735_v14 = vadd.f32 %v3745_v13, %v4732_v11  ;;  %v2688_v15 = vpop.f32.mrb[23].mxu1 }
0x21a1   :  { %v4738_v50 = vadd.f32 %v4732_v11, %v2688_v15 }
0x21a2   :  { %2818 = vrot.lane.b32.xlu1 %v4735_v14, %s4089_s11 }
0x21a3   :  { %2816 = vrot.lane.b32.xlu0 %v4738_v50, %s4089_s11 }
0x220c   :  { %v4744_v6 = vpop.f32.mrb[24].mxu1 }
0x220d   :  { %v2698_v54 = vpop.f32.mrb[25].mxu1  ;;  %v4812_v63 = vadd.f32 %v4744_v6, %v4732_v11 }
0x220e   :  { %v4797_v33 = vadd.f32 %v4732_v11, %v2698_v54 }
0x2214   :  { %v2819_v34 = vpop.permute.xlu1 %2818 }
0x2215   :  { %v2817_v16 = vpop.permute.xlu0 %2816  ;;  %vm2829_vm1 = vcmp.gt.f32.partialorder %v4735_v14, %v2819_v34 }
0x2216   :  { %vm2828_vm2 = vcmp.gt.f32.partialorder %v4738_v50, %v2817_v16  ;;  %v4755_v22 = vsel %vm2829_vm1, 1.0, %v4082_v0 }
0x2217   :  { %v4749_v19 = vsel %vm2828_vm2, 1.0, %v4082_v0  ;;  %v2888_v24 = vsub.f32 1.0, %v4755_v22 }
0x2218   :  { %v4752_v20 = vsub.f32 1.0, %v4749_v19 }
0x2219   :  { %v2910_v25 = vrot.slane %v2888_v24, 4 }
0x221a   :  { %2847 = vrot.lane.b32.xlu0 %v4752_v20, %s4096_s5  ;;  %v2866_v23 = vrot.slane %v4752_v20, 4 }
0x221c   :  { %2870 = vrot.lane.b32.xlu1 %v2866_v23, %s4096_s5 }
0x221e   :  { %2892 = vrot.lane.b32.xlu0 %v2888_v24, %s4096_s5 }
0x2222   :  { %2914 = vrot.lane.b32.xlu0 %v2910_v25, %s4096_s5 }
0x2240   :  { %341 = vmax.xlane.f32.xlu1 %v340_v26 }
0x2251   :  { %2735 = vrot.lane.b32.xlu1 %v4738_v50, %s4086_s29 }
0x228c   :  { %v2848_v27 = vpop.permute.xlu0 %2847 }
0x228d   :  { %v4769_v28 = vmul.f32 %v2848_v27, %v4752_v20 }
0x228e   :  { %v2871_v29 = vpop.permute.xlu1 %2870 }
0x228f   :  { %v4772_v1 = vmul.f32 %v2866_v23, %v4769_v28  ;;  %v2852_v3 = vsel %vm2851_vm14, %v4769_v28, -inf }
0x2290   :  { %v2893_v32 = vpop.permute.xlu0 %2892 }
0x2291   :  { %v4775_v30 = vmul.f32 %v2871_v29, %v4772_v1 }
0x2293   :  { %v2889_v31 = vmul.f32 %v2888_v24, %v4775_v30  ;;  %v2874_v52 = vsel %vm2851_vm14, %v4775_v30, -inf }
0x2294   :  { %v2915_v53 = vpop.permute.xlu0 %2914 }
0x2295   :  { %v4778_v35 = vmul.f32 %v2893_v32, %v2889_v31 }
0x2297   :  { %v2912_v7 = vmul.f32 %v2910_v25, %v4778_v35  ;;  %v2896_v13 = vsel %vm2851_vm14, %v4778_v35, -inf }
0x2299   :  { %v3042_v36 = vrot.slane %v2912_v7, 4  ;;  %v4822_v4 = vmul.f32 %v2915_v53, %v2912_v7 }
0x229b   :  { %v4782_v2 = vsel %vm730_vm8, %v2889_v31, %v3042_v36  ;;  %v2918_v45 = vsel %vm2851_vm14, %v4822_v4, -inf }
0x22cd   :  { %v342_v39 = vpop.xlane.xlu1 %341 }
0x22ce   :  { %v343_v40 = vsub.f32 %v4214_v18, %v342_v39 }
0x22d0   :  { %v344_v41 = vmul.f32 1.442695, %v343_v40 }
0x22d1   :  { %v2736_v42 = vpop.permute.xlu1 %2735 }
0x22d2   :  { %4046 = vpow2.f32 %v344_v41  ;;  %v2747_v43 = vsub.f32 %v4738_v50, %v2736_v42 }
0x22d4   :  { %v3253_v44 = vmul.f32 -1.442695, %v2747_v43 }
0x22d6   :  { %4048 = vpow2.f32 %v3253_v44 }
0x22dc   :  { %v4786_v46 = vpop.eup %4046 }
0x22dd   :  { %v346_v48 = vsel %vm339_vm3, %v4786_v46, 0.0 }
0x22de   :  { %347 = vadd.xlane.f32.xlu0 %v346_v48 }
0x22e0   :  { %v4049_v49 = vpop.eup %4048 }
0x22e1   :  { %v2763_v51 = vadd.f32 1.0, %v4049_v49 }
0x22e3   :  { %4050 = vrcp.f32 %v2763_v51 }
0x22ed   :  { %v4790_v61 = vpop.eup %4050 }
0x22ee   :  { %v2775_v18 = vsub.f32 1.0, %v4790_v61 }
0x22f0   :  { %2783 = vrot.lane.b32.xlu1 %v2775_v18, %s4089_s11 }
0x22f4   :  { %2737 = vrot.lane.b32.xlu0 %v4735_v14, %s4086_s29 }
0x22f8   :  { %2820 = vrot.lane.b32.xlu0 %v4797_v33, %s4089_s11 }
0x2317   :  { %2875 = vmax.xlane.f32.xlu0 %v2874_v52 }
0x2362   :  { %v4826_v5 = vpop.permute.xlu1 %2783 }
0x236b   :  { %v4803_v55 = vpop.xlane.xlu0 %347 }
0x236f   :  { %v2738_v37 = vpop.permute.xlu0 %2737 }
0x2370   :  { %v2748_v58 = vsub.f32 %v4735_v14, %v2738_v37 }
0x2372   :  { %v3254_v56 = vmul.f32 -1.442695, %v2748_v58 }
0x2373   :  { %v2821_v9 = vpop.permute.xlu0 %2820 }
0x2374   :  { %4052 = vpow2.f32 %v3254_v56  ;;  %vm2830_vm5 = vcmp.gt.f32.partialorder %v4797_v33, %v2821_v9 }
0x2375   :  { %v4837_v62 = vsel %vm2830_vm5, 1.0, %v4082_v0  ;;  %vm3166_vm5 = vcmask 80896  }
0x2376   :  { %v2932_v47 = vsub.f32 1.0, %v4837_v62 }
0x2378   :  { %v2954_v11 = vrot.slane %v2932_v47, 4  ;;  %v2933_v56 = vmul.f32 %v2932_v47, %v4822_v4 }
0x237e   :  { %v4053_v21 = vpop.eup %4052 }
0x237f   :  { %v2764_v57 = vadd.f32 1.0, %v4053_v21 }
0x2381   :  { %4054 = vrcp.f32 %v2764_v57 }
0x238b   :  { %v4806_v59 = vpop.eup %4054 }
0x238c   :  { %v2776_v60 = vsub.f32 1.0, %v4806_v59 }
0x238e   :  { %2785 = vrot.lane.b32.xlu1 %v2776_v60, %s4089_s11 }
0x2392   :  { %2822 = vrot.lane.b32.xlu1 %v4812_v63, %s4089_s11 }
0x23a4   :  { %v2876_v15 = vpop.xlane.xlu0 %2875 }
0x23a5   :  { %v2877_v6 = vrot.slane %v2876_v15, 4 }
0x23a7   :  { %v2878_v54 = vmax.f32 %v2876_v15, %v2877_v6 }
0x23a9   :  { %v2879_v34 = vrot.slane %v2878_v54, 2 }
0x23ab   :  { %v2880_v26 = vmax.f32 %v2878_v54, %v2879_v34 }
0x23ad   :  { %v2881_v36 = vrot.slane %v2880_v26, 1 }
0x23af   :  { %v2882_v43 = vmax.f32 %v2880_v26, %v2881_v36 }
0x23b6   :  { %2853 = vmax.xlane.f32.xlu1 %v2852_v3 }
0x23c7   :  { %2741 = vrot.lane.b32.xlu1 %v4812_v63, %s4086_s29 }
0x23cb   :  { %2739 = vrot.lane.b32.xlu1 %v4797_v33, %s4086_s29 }
0x23ef   :  { %2919 = vmax.xlane.f32.xlu1 %v2918_v45 }
0x2400   :  { %v4828_v8 = vpop.permute.xlu1 %2785 }
0x2404   :  { %v2823_v10 = vpop.permute.xlu1 %2822 }
0x2405   :  { %vm2831_vm6 = vcmp.gt.f32.partialorder %v4812_v63, %v2823_v10 }
0x2406   :  { %v4833_v17 = vsel %vm2831_vm6, 1.0, %v4082_v0  ;;  %vm3176_vm6 = vcmask 171008  }
0x2407   :  { %v2976_v38 = vsub.f32 1.0, %v4833_v17 }
0x2409   :  { %2980 = vrot.lane.b32.xlu0 %v2976_v38, %s4096_s5  ;;  %v2998_v6 = vrot.slane %v2976_v38, 4 }
0x240d   :  { %2936 = vrot.lane.b32.xlu0 %v2932_v47, %s4096_s5 }
0x2411   :  { %2958 = vrot.lane.b32.xlu0 %v2954_v11, %s4096_s5 }
0x2430   :  { %2897 = vmax.xlane.f32.xlu0 %v2896_v13 }
0x2443   :  { %v2854_v16 = vpop.xlane.xlu1 %2853 }
0x2444   :  { %v2855_v23 = vrot.slane %v2854_v16, 4 }
0x2446   :  { %v2856_v24 = vmax.f32 %v2854_v16, %v2855_v23 }
0x2447   :  { %v2742_v25 = vpop.permute.xlu1 %2741 }
0x2448   :  { %v2857_v27 = vrot.slane %v2856_v24, 2  ;;  %v2750_v29 = vsub.f32 %v4812_v63, %v2742_v25  ;;  %v3012_v25 = vrot.slane %v4778_v35, 4 }
0x244a   :  { %v3256_v31 = vmul.f32 -1.442695, %v2750_v29  ;;  %v2858_v32 = vmax.f32 %v2856_v24, %v2857_v27  ;;  %v3003_v24 = vrot.slane %v4769_v28, 4 }
0x244b   :  { %v2740_v7 = vpop.permute.xlu1 %2739 }
0x244c   :  { %4056 = vpow2.f32 %v3256_v31  ;;  %v2749_v39 = vsub.f32 %v4797_v33, %v2740_v7  ;;  %v2859_v40 = vrot.slane %v2858_v32, 1 }
0x244e   :  { %v3255_v41 = vmul.f32 -1.442695, %v2749_v39  ;;  %v2860_v42 = vmax.f32 %v2858_v32, %v2859_v40 }
0x2450   :  { %4058 = vpow2.f32 %v3255_v41  ;;  %3933 = vpush %v2860_v42 }
0x2451   :  { %3935 = vpush %v2882_v43 }
0x2456   :  { %v4057_v44 = vpop.eup %4056 }
0x2457   :  { %v2766_v48 = vadd.f32 1.0, %v4057_v44 }
0x2459   :  { %4060 = vrcp.f32 %v2766_v48 }
0x245a   :  { %v4059_v49 = vpop.eup %4058 }
0x245b   :  { %v2765_v51 = vadd.f32 1.0, %v4059_v49 }
0x245d   :  { %4062 = vrcp.f32 %v2765_v51 }
0x245e   :  { %4064 = vrcp.f32 %v4803_v55 }
0x2463   :  { %v4847_v18 = vpop.eup %4060 }
0x2464   :  { %v2778_v52 = vsub.f32 1.0, %v4847_v18 }
0x2466   :  { %2789 = vrot.lane.b32.xlu0 %v2778_v52, %s4089_s11 }
0x2467   :  { %v4851_v53 = vpop.eup %4062 }
0x2468   :  { %v2777_v37 = vsub.f32 1.0, %v4851_v53 }
0x246a   :  { %2787 = vrot.lane.b32.xlu1 %v2777_v37, %s4089_s11 }
0x247b   :  { %v2981_v58 = vpop.permute.xlu0 %2980 }
0x247c   :  { %v2920_v28 = vpop.xlane.xlu1 %2919 }
0x247d   :  { %v2921_v27 = vrot.slane %v2920_v28, 4 }
0x247f   :  { %v2937_v21 = vpop.permute.xlu0 %2936  ;;  %v2922_v29 = vmax.f32 %v2920_v28, %v2921_v27 }
0x2480   :  { %v2939_v57 = vmul.f32 %v2937_v21, %v2933_v56 }
0x2481   :  { %v2923_v35 = vrot.slane %v2922_v29, 2  ;;  %s4880_s29 = spop %3933 }
0x2482   :  { %v2956_v60 = vmul.f32 %v2954_v11, %v2939_v57  ;;  %v2940_v10 = vsel %vm2851_vm14, %v2939_v57, -inf }
0x2483   :  { %v2959_v3 = vpop.permute.xlu0 %2958  ;;  %v2924_v7 = vmax.f32 %v2922_v29, %v2923_v35  ;;  %v2862_v35 = vstv %s4880_s29 }
0x2484   :  { %v3045_v45 = vrot.slane %v2956_v60, 4  ;;  %v2961_v9 = vmul.f32 %v2959_v3, %v2956_v60  ;;  %vm2863_vm12 = vcmp.ge.f32.partialorder %v2862_v35, 0.5 }
0x2485   :  { %2941 = vmax.xlane.f32.xlu0 %v2940_v10  ;;  %v2925_v40 = vrot.slane %v2924_v7, 1 }
0x2486   :  { %v2977_v13 = vmul.f32 %v2976_v38, %v2961_v9  ;;  %v4858_v15 = vsel %vm730_vm8, %v2933_v56, %v3045_v45  ;;  %v2962_v23 = vsel %vm2851_vm14, %v2961_v9, -inf  ;;  %v3021_v38 = vrot.slane %v2939_v57, 4 }
0x2487   :  { %v2926_v43 = vmax.f32 %v2924_v7, %v2925_v40 }
0x2488   :  { %v2983_v54 = vmul.f32 %v2981_v58, %v2977_v13 }
0x248a   :  { %v2984_v34 = vsel %vm2851_vm14, %v2983_v54, -inf  ;;  %v3000_v16 = vmul.f32 %v2998_v6, %v2983_v54  ;;  %v3030_v26 = vrot.slane %v2983_v54, 4  ;;  %vm3147_vm14 = vcmask 48128  }
0x248b   :  { %2985 = vmax.xlane.f32.xlu0 %v2984_v34 }
0x248c   :  { %v3048_v47 = vrot.slane %v3000_v16, 4 }
0x248e   :  { %2963 = vmax.xlane.f32.xlu1 %v2962_v23  ;;  %v4863_v11 = vsel %vm730_vm8, %v2977_v13, %v3048_v47 }
0x249f   :  { %3004 = vrot.lane.b32.xlu1 %v3003_v24, %s4087_s30 }
0x24a1   :  { %3008 = vrot.lane.b32.xlu0 %v4775_v30, %s4087_s30 }
0x24a3   :  { %3013 = vrot.lane.b32.xlu1 %v3012_v25, %s4087_s30 }
0x24a5   :  { %3022 = vrot.lane.b32.xlu0 %v3021_v38, %s4087_s30 }
0x24a7   :  { %3017 = vrot.lane.b32.xlu1 %v4822_v4, %s4087_s30 }
0x24a9   :  { %3031 = vrot.lane.b32.xlu0 %v3030_v26, %s4087_s30 }
0x24ab   :  { %3026 = vrot.lane.b32.xlu1 %v2961_v9, %s4087_s30  ;;  %s3936_s30 = spop %3935 }
0x24ac   :  { %v2884_v47 = vstv %s3936_s30 }
0x24ad   :  { %vm2885_vm11 = vcmp.ge.f32.partialorder %v2884_v47, 0.5 }
0x24bd   :  { %v2898_v31 = vpop.xlane.xlu0 %2897 }
0x24be   :  { %v2899_v32 = vrot.slane %v2898_v31, 4 }
0x24c0   :  { %v2900_v30 = vmax.f32 %v2898_v31, %v2899_v32  ;;  %v3262_v31 = vsel %vm2885_vm11, 1.0, %v4082_v0 }
0x24c2   :  { %v2901_v36 = vrot.slane %v2900_v30, 2 }
0x24c4   :  { %v2902_v39 = vmax.f32 %v2900_v30, %v2901_v36  ;;  %v3039_v30 = vrot.slane %v4772_v1, 4  ;;  %v2890_v36 = vmul.f32 %v3262_v31, %v4755_v22 }
0x24c6   :  { %v2903_v41 = vrot.slane %v2902_v39, 1  ;;  %v3050_v40 = vsel %vm730_vm8, %v4752_v20, %v3039_v30 }
0x24c8   :  { %v2904_v42 = vmax.f32 %v2902_v39, %v2903_v41  ;;  %v3261_v41 = vsel %vm2863_vm12, 1.0, %v4082_v0 }
0x24c9   :  { %v2869_v1 = vmul.f32 %v3261_v41, %v4749_v19 }
0x24ca   :  { %3937 = vpush %v2904_v42 }
0x24cb   :  { %3939 = vpush %v2926_v43 }
0x24d8   :  { %v4876_v4 = vpop.permute.xlu0 %2789 }
0x24dc   :  { %v4878_v51 = vpop.permute.xlu1 %2787 }
0x24fb   :  { %s3938_s11 = spop %3937 }
0x24fc   :  { %v2906_v13 = vstv %s3938_s11  ;;  %s3940_s16 = spop %3939 }
0x24fd   :  { %vm2907_vm10 = vcmp.ge.f32.partialorder %v2906_v13, 0.5 }
0x24fe   :  { %v3263_v27 = vsel %vm2907_vm10, 1.0, %v4082_v0 }
0x24ff   :  { %v2913_v7 = vmul.f32 %v3263_v27, %v4755_v22  ;;  %v3054_v22 = vsel %vm730_vm8, %v4749_v19, %v2869_v1  ;;  %v2928_v19 = vstv %s3940_s16 }
0x2500   :  { %vm2929_vm13 = vcmp.ge.f32.partialorder %v2928_v19, 0.5 }
0x2501   :  { %v3055_v39 = vsel %vm730_vm8, %v2890_v36, %v2913_v7 }
0x2512   :  { %v2942_v44 = vpop.xlane.xlu0 %2941 }
0x2513   :  { %v2943_v48 = vrot.slane %v2942_v44, 4 }
0x2515   :  { %v2944_v49 = vmax.f32 %v2942_v44, %v2943_v48 }
0x2517   :  { %v2945_v52 = vrot.slane %v2944_v49, 2 }
0x2518   :  { %v2986_v37 = vpop.xlane.xlu0 %2985 }
0x2519   :  { %v2987_v58 = vrot.slane %v2986_v37, 4  ;;  %v2946_v56 = vmax.f32 %v2944_v49, %v2945_v52  ;;  %v4065_v52 = vpop.eup %4064 }
0x251a   :  { %v350_v55 = vmul.f32 %v4065_v52, %v4786_v46 }
0x251b   :  { %v2988_v21 = vmax.f32 %v2986_v37, %v2987_v58  ;;  %v2964_v57 = vpop.xlane.xlu1 %2963  ;;  %v2947_v60 = vrot.slane %v2946_v56, 1 }
0x251c   :  { %v2965_v3 = vrot.slane %v2964_v57, 4  ;;  %v3009_v24 = vpop.permute.xlu0 %3008 }
0x251d   :  { %v2989_v45 = vrot.slane %v2988_v21, 2  ;;  %v2948_v9 = vmax.f32 %v2946_v56, %v2947_v60  ;;  %v725_v60 = vsel %vm724_vm7, %v350_v55, %v4363_v12  ;;  %v3249_v12 = vmul.f32 -1.442695, %v4738_v50 }
0x251e   :  { %v2966_v10 = vmax.f32 %v2964_v57, %v2965_v3  ;;  %v3058_v46 = vsel %vm730_vm8, %v725_v60, 0.0 }
0x251f   :  { %3941 = vpush %v2948_v9  ;;  %v3005_v6 = vpop.permute.xlu1 %3004  ;;  %v2990_v54 = vmax.f32 %v2988_v21, %v2989_v45  ;;  %4066 = vpow2.f32 %v3249_v12 }
0x2520   :  { %v2967_v34 = vrot.slane %v2966_v10, 2  ;;  %v3034_v16 = vsel %vm730_vm8, 1.0, %v3005_v6  ;;  %v3023_v42 = vpop.permute.xlu0 %3022  ;;  %v3250_v6 = vmul.f32 -1.442695, %v4735_v14 }
0x2521   :  { %3061 = vperm.xlu1 %3966, %v3034_v16   ;;  %v2991_v38 = vrot.slane %v2990_v54, 1 }
0x2522   :  { %v2968_v23 = vmax.f32 %v2966_v10, %v2967_v34  ;;  %4068 = vpow2.f32 %v3250_v6 }
0x2523   :  { %v3014_v25 = vpop.permute.xlu1 %3013  ;;  %v2992_v32 = vmax.f32 %v2990_v54, %v2991_v38 }
0x2524   :  { %v3035_v26 = vsel %vm730_vm8, %v3009_v24, %v3014_v25  ;;  %v2969_v28 = vrot.slane %v2968_v23, 1  ;;  %v3032_v44 = vpop.permute.xlu0 %3031 }
0x2525   :  { %3085 = vrot.lane.b32.xlu1 %v3035_v26, %s4097_s28  ;;  %3066 = vperm.xlu0 %3967, %v3035_v26  }
0x2526   :  { %v2970_v29 = vmax.f32 %v2968_v23, %v2969_v28 }
0x2528   :  { %3943 = vpush %v2970_v29 }
0x2529   :  { %3945 = vpush %v2992_v32  ;;  %3101 = vrot.lane.b32.xlu1 %v4782_v2, %s4098_s14  ;;  %3083 = vrot.lane.b32.xlu0 %v3034_v16, %s4097_s28  ;;  %v3018_v2 = vpop.permute.xlu1 %3017  ;;  %v3251_v16 = vmul.f32 -1.442695, %v4797_v33 }
0x252a   :  { %v3036_v20 = vsel %vm730_vm8, %v3018_v2, %v3023_v42 }
0x252d   :  { %3117 = vrot.lane.b32.xlu1 %v3055_v39, %s4097_s28  ;;  %3099 = vrot.lane.b32.xlu0 %v3050_v40, %s4098_s14  ;;  %v3027_v43 = vpop.permute.xlu1 %3026 }
0x252e   :  { %v3037_v48 = vsel %vm730_vm8, %v3027_v43, %v3032_v44 }
0x2531   :  { %3129 = vrot.lane.b32.xlu1 %v3055_v39, %s4099_s15  ;;  %3103 = vrot.lane.b32.xlu0 %v4858_v15, %s4098_s14  ;;  %v3264_v15 = vsel %vm2929_vm13, 1.0, %v4082_v0 }
0x2532   :  { %v2934_v37 = vmul.f32 %v3264_v15, %v4837_v62 }
0x2535   :  { %3105 = vrot.lane.b32.xlu1 %v4863_v11, %s4098_s14  ;;  %3115 = vrot.lane.b32.xlu0 %v3054_v22, %s4097_s28 }
0x2539   :  { %3127 = vrot.lane.b32.xlu0 %v3054_v22, %s4099_s15  ;;  %3071 = vperm.xlu1 %3966, %v3036_v20  }
0x253d   :  { %3087 = vrot.lane.b32.xlu0 %v3036_v20, %s4097_s28  ;;  %3076 = vperm.xlu1 %3966, %v3037_v48  }
0x2541   :  { %3089 = vrot.lane.b32.xlu1 %v3037_v48, %s4097_s28 }
0x2550   :  { %s3942_s17 = spop %3941 }
0x2551   :  { %v2950_v11 = vstv %s3942_s17 }
0x2552   :  { %vm2951_vm1 = vcmp.ge.f32.partialorder %v2950_v11, 0.5 }
0x2553   :  { %v3265_v49 = vsel %vm2951_vm1, 1.0, %v4082_v0 }
0x2554   :  { %v2957_v58 = vmul.f32 %v3265_v49, %v4837_v62 }
0x2556   :  { %v3056_v56 = vsel %vm730_vm8, %v2934_v37, %v2957_v58 }
0x2557   :  { %3119 = vrot.lane.b32.xlu0 %v3056_v56, %s4097_s28 }
0x2559   :  { %s3944_s18 = spop %3943 }
0x255a   :  { %v2972_v21 = vstv %s3944_s18  ;;  %s3946_s1 = spop %3945 }
0x255b   :  { %vm2973_vm2 = vcmp.ge.f32.partialorder %v2972_v21, 0.5  ;;  %v2994_v57 = vstv %s3946_s1  ;;  %3131 = vrot.lane.b32.xlu0 %v3056_v56, %s4099_s15 }
0x255c   :  { %v3266_v3 = vsel %vm2973_vm2, 1.0, %v4082_v0  ;;  %vm2995_vm3 = vcmp.ge.f32.partialorder %v2994_v57, 0.5 }
0x255d   :  { %v2978_v62 = vmul.f32 %v3266_v3, %v4833_v17  ;;  %v3267_v45 = vsel %vm2995_vm3, 1.0, %v4082_v0 }
0x255e   :  { %v3001_v9 = vmul.f32 %v3267_v45, %v4833_v17  ;;  %v3252_v17 = vmul.f32 -1.442695, %v4812_v63 }
0x255f   :  { %3141 = vrot.lane.b32.xlu0 %v3058_v46, %s4100_s19 }
0x2560   :  { %v3057_v10 = vsel %vm730_vm8, %v2978_v62, %v3001_v9  ;;  %4070 = vpow2.f32 %v3252_v17  ;;  %vm2807_vm8 = vcmask 31744  }
0x2561   :  { %3121 = vrot.lane.b32.xlu1 %v3057_v10, %s4097_s28  ;;  %4072 = vpow2.f32 %v3251_v16 }
0x2565   :  { %3133 = vrot.lane.b32.xlu1 %v3057_v10, %s4099_s15 }
0x2569   :  { %3143 = vrot.lane.b32.xlu1 %v4082_v0, %s4100_s19  ;;  %v4067_v0 = vpop.eup %4066 }
0x256a   :  { %v2719_v24 = vadd.f32 1.0, %v4067_v0  ;;  %v4069_v14 = vpop.eup %4068 }
0x256b   :  { %v4071_v38 = vpop.eup %4070  ;;  %v2720_v28 = vadd.f32 1.0, %v4069_v14 }
0x256c   :  { %4074 = vrcp.f32 %v2719_v24  ;;  %v4073_v63 = vpop.eup %4072  ;;  %v2722_v27 = vadd.f32 1.0, %v4071_v38 }
0x256d   :  { %v2721_v33 = vadd.f32 1.0, %v4073_v63  ;;  %4076 = vrcp.f32 %v2720_v28 }
0x256e   :  { %4078 = vrcp.f32 %v2722_v27 }
0x256f   :  { %4080 = vrcp.f32 %v2721_v33 }
0x2576   :  { %v4075_v31 = vpop.eup %4074 }
0x2577   :  { %v2795_v30 = vsel %vm383_vm15, %v4075_v31, %v4790_v61  ;;  %v4077_v40 = vpop.eup %4076 }
0x2578   :  { %v2799_v7 = vsel %vm385_vm4, %v2795_v30, %v4826_v5  ;;  %v4079_v1 = vpop.eup %4078  ;;  %v2796_v2 = vsel %vm383_vm15, %v4077_v40, %v4806_v59 }
0x2579   :  { %v2803_v39 = vsel %vm724_vm7, %v2799_v7, %v4075_v31  ;;  %v4081_v22 = vpop.eup %4080  ;;  %v2800_v42 = vsel %vm385_vm4, %v2796_v2, %v4828_v8  ;;  %v2798_v44 = vsel %vm383_vm15, %v4079_v1, %v4847_v18 }
0x257a   :  { %v2808_v20 = vsel %vm2807_vm8, %v2803_v39, %v4790_v61  ;;  %v2797_v48 = vsel %vm383_vm15, %v4081_v22, %v4851_v53  ;;  %v2802_v19 = vsel %vm385_vm4, %v2798_v44, %v4876_v4  ;;  %v2804_v11 = vsel %vm724_vm7, %v2800_v42, %v4077_v40 }
0x257b   :  { %v2801_v15 = vsel %vm385_vm4, %v2797_v48, %v4878_v51  ;;  %v2812_v49 = vsel %vm835_vm9, %v2808_v20, %v4826_v5  ;;  %v2806_v58 = vsel %vm724_vm7, %v2802_v19, %v4079_v1  ;;  %v2809_v55 = vsel %vm2807_vm8, %v2804_v11, %v4806_v59 }
0x257c   :  { %v2805_v56 = vsel %vm724_vm7, %v2801_v15, %v4081_v22  ;;  %vm3152_vm15 = vcmask 56320   ;;  %vm3161_vm4 = vcmask 72704   ;;  %v2811_v3 = vsel %vm2807_vm8, %v2806_v58, %v4847_v18 }
0x257d   :  { %v2810_v5 = vsel %vm2807_vm8, %v2805_v56, %v4851_v53  ;;  %v2813_v45 = vsel %vm835_vm9, %v2809_v55, %v4828_v8  ;;  %vm3171_vm7 = vcmask 130048   ;;  %v2815_v53 = vsel %vm835_vm9, %v2811_v3, %v4876_v4 }
0x257e   :  { %v2814_v10 = vsel %vm835_vm9, %v2810_v5, %v4878_v51 }
0x25a0   :  { %v3062_v13 = vpop.permute.xlu1 %3061 }
0x25a1   :  { %v3079_v52 = vmul.f32 %v3062_v13, %v2812_v49 }
0x25a4   :  { %v4932_v54 = vpop.permute.xlu0 %3066  ;;  %v4935_v34 = vpop.permute.xlu1 %3085 }
0x25a5   :  { %v3080_v9 = vmul.f32 %v4932_v54, %v2813_v45 }
0x25a7   :  { %v3149_v54 = vsel %vm3147_vm14, %v3080_v9, %v4935_v34 }
0x25a8   :  { %v3084_v47 = vpop.permute.xlu0 %3083  ;;  %v4938_v23 = vpop.permute.xlu1 %3101 }
0x25a9   :  { %v3148_v21 = vsel %vm3147_vm14, %v3079_v52, %v3084_v47  ;;  %v3154_v4 = vsel %vm3152_vm15, %v3149_v54, %v4938_v23 }
0x25ac   :  { %v3100_v50 = vpop.permute.xlu0 %3099  ;;  %v4940_v25 = vpop.permute.xlu1 %3117 }
0x25ad   :  { %v3153_v57 = vsel %vm3152_vm15, %v3148_v21, %v3100_v50  ;;  %v3158_v34 = vsel %vm32_vm0, %v3154_v4, %v4940_v25 }
0x25b0   :  { %v4942_v26 = vpop.permute.xlu0 %3103  ;;  %v4944_v29 = vpop.permute.xlu1 %3129 }
0x25b1   :  { %v3163_v63 = vsel %vm3161_vm4, %v3158_v34, %v4944_v29 }
0x25b2   :  { %v3168_v27 = vsel %vm3166_vm5, %v3163_v63, 0.0 }
0x25b4   :  { %v3116_v35 = vpop.permute.xlu0 %3115  ;;  %v3106_v32 = vpop.permute.xlu1 %3105 }
0x25b5   :  { %v3157_v60 = vsel %vm32_vm0, %v3153_v57, %v3116_v35 }
0x25b8   :  { %v3128_v36 = vpop.permute.xlu0 %3127  ;;  %v3072_v41 = vpop.permute.xlu1 %3071 }
0x25b9   :  { %v3162_v59 = vsel %vm3161_vm4, %v3157_v60, %v3128_v36  ;;  %v3081_v12 = vmul.f32 %v3072_v41, %v2814_v10 }
0x25ba   :  { %v3167_v18 = vsel %vm3166_vm5, %v3162_v59, 0.0 }
0x25bc   :  { %v3088_v43 = vpop.permute.xlu0 %3087  ;;  %v3077_v61 = vpop.permute.xlu1 %3076 }
0x25bd   :  { %v3082_v13 = vmul.f32 %v3077_v61, %v2815_v53  ;;  %v3150_v17 = vsel %vm3147_vm14, %v3081_v12, %v3088_v43 }
0x25be   :  { %v3155_v0 = vsel %vm3152_vm15, %v3150_v17, %v4942_v26 }
0x25c0   :  { %v3090_v46 = vpop.permute.xlu1 %3089 }
0x25c1   :  { %v3151_v16 = vsel %vm3147_vm14, %v3082_v13, %v3090_v46 }
0x25c2   :  { %v3156_v50 = vsel %vm3152_vm15, %v3151_v16, %v3106_v32 }
0x25c9   :  { %v3120_v37 = vpop.permute.xlu0 %3119 }
0x25ca   :  { %v3159_v24 = vsel %vm32_vm0, %v3155_v0, %v3120_v37 }
0x25cd   :  { %v3132_v62 = vpop.permute.xlu0 %3131 }
0x25ce   :  { %v3164_v28 = vsel %vm3161_vm4, %v3159_v24, %v3132_v62 }
0x25cf   :  { %v3169_v26 = vsel %vm3166_vm5, %v3164_v28, 0.0 }
0x25d1   :  { %v3142_v6 = vpop.permute.xlu0 %3141 }
0x25d2   :  { %v3172_v8 = vsel %vm3171_vm7, %v3167_v18, %v3142_v6 }
0x25d3   :  { %v3177_v51 = vsel %vm3176_vm6, %v3172_v8, 0.0  ;;  %v3122_v47 = vpop.permute.xlu1 %3121 }
0x25d4   :  { %3181 = vst [vmem:[%s5034_s6] sm:$0xff] %v3177_v51  ;;  %v3160_v14 = vsel %vm32_vm0, %v3156_v50, %v3122_v47 }
0x25d7   :  { %v3134_v38 = vpop.permute.xlu1 %3133 }
0x25d8   :  { %v3165_v23 = vsel %vm3161_vm4, %v3160_v14, %v3134_v38 }
0x25d9   :  { %v3170_v33 = vsel %vm3166_vm5, %v3165_v23, 0.0 }
0x25db   :  { %v3144_v35 = vpop.permute.xlu1 %3143 }
0x25dc   :  { %v3173_v25 = vsel %vm3171_vm7, %v3168_v27, %v3144_v35  ;;  %v3174_v31 = vsel %vm3171_vm7, %v3169_v26, %v3144_v35  ;;  %v3175_v32 = vsel %vm3171_vm7, %v3170_v33, %v3144_v35 }
0x25dd   :  { %v3178_v30 = vsel %vm3176_vm6, %v3173_v25, 0.0  ;;  %v3179_v29 = vsel %vm3176_vm6, %v3174_v31, 0.0  ;;  %v3180_v7 = vsel %vm3176_vm6, %v3175_v32, 0.0 }
0x25de   :  { %3182 = vst [vmem:[%s5034_s6 + $0x8] sm:$0xff] %v3178_v30  ;;  %3183 = vst [vmem:[%s5034_s6 + $0x10] sm:$0xff] %v3179_v29 }
0x25df   :  { %3184 = vst [vmem:[%s5034_s6 + $0x18] sm:$0xff] %v3180_v7 }

</bundles_post_ra>
